<compile_context>
chip_gen: v5e
topology: v5e:2x2
jax: 0.10.0
libtpu: 0.0.40
codegen_flags: <defaults>
</compile_context>

<pallas_src>
import jax
import jax.numpy as jnp
from jax.experimental import pallas as pl
from jax.experimental.pallas import tpu as pltpu


def autoencoder_kernel(x_ref, w1_ref, b1_ref, w2_ref, b2_ref, o_ref):
    # Hoisted bias loads (once per grid step).
    b1 = b1_ref[...]                      # (1, H) f32, broadcasts over batch
    b2 = b2_ref[...]                      # (1, D) f32

    # Cast the streamed f32 activation tile to the weight (MXU) dtype inside
    # the kernel so no separate HBM read+write pass is spent on it in the
    # wrapper (the VPU cast hides under the x-tile DMA / MXU work).
    x = x_ref[...].astype(w1_ref.dtype)

    # encoder.to_feature: Linear + ReLU. bf16 MXU matmul with f32 accumulation;
    # bias + ReLU epilogue in f32 on the VPU (v5e has no bf16 VPU path).
    h = jnp.dot(x, w1_ref[...], preferred_element_type=jnp.float32)
    h = jnp.maximum(h + b1, 0.0)

    # encoder.to_latent / decoder.to_feature are identities; .view(B, -1) is a
    # no-op for 2-D x. decoder.to_data: Linear, again bf16 MXU + f32 acc.
    y = jnp.dot(h.astype(w2_ref.dtype), w2_ref[...],
                preferred_element_type=jnp.float32)
    o_ref[...] = (y + b2).astype(o_ref.dtype)


def _vmem_capacity_bytes():
    """Per-core VMEM capacity; conservative default if the query fails."""
    try:
        cap = int(getattr(pltpu.get_tpu_info(), "vmem_capacity_bytes", 0))
        if cap > 0:
            return cap
    except Exception:
        pass
    return 64 * 1024 * 1024   # v7x per-TensorCore VMEM (smallest generation)


def _resident_vmem_estimate(tb, D, H, w_itemsize, x_itemsize, out_itemsize):
    # Conservative: assume the compiler double-buffers everything.
    weights = (D * H + H * D) * w_itemsize * 2
    biases = (H + D) * 4 * 2
    x_tiles = tb * D * x_itemsize * 2
    out_tiles = tb * D * out_itemsize * 2
    temporaries = tb * (H + D) * 4            # f32 h + epilogue temporaries
    return weights + biases + x_tiles + out_tiles + temporaries


def autoencoder_forward(x, w1, b1, w2, b2, *, tb=256, out_dtype=None,
                        single_buffer_weights=True):
    """x: [B, D]; w1: [D, H]; b1: [1, H]; w2: [H, D]; b2: [1, D] -> [B, D].

    Weights are used in whatever dtype they are stored in (pre-cast them to
    bf16 once at init for the MXU fast path). Set out_dtype=jnp.bfloat16 to
    cut output HBM traffic by ~2x if downstream tolerates it.
    """
    B, D = x.shape
    Dw, H = w1.shape
    assert Dw == D and w2.shape == (H, D)
    assert b1.shape == (1, H) and b2.shape == (1, D)
    out_dtype = x.dtype if out_dtype is None else out_dtype

    # Feature dims live on the lane axis as full-extent blocks; multiples of
    # 128 keep the MXU fully fed.
    assert D % 128 == 0 and H % 128 == 0, "D and H must be multiples of 128"

    # Clamp the batch tile: a single full-extent block when B <= tb (always a
    # legal block shape), otherwise a multiple of 8 sublanes; the trailing
    # partial block (B % tb != 0) is handled by Pallas boundary masking, so no
    # padding / output slicing is needed.
    if B <= tb:
        tb = B
    else:
        tb = max(8, (tb // 8) * 8)
    num_tiles = pl.cdiv(B, tb)

    b1f = b1.astype(jnp.float32)
    b2f = b2.astype(jnp.float32)

    # ---- VMEM budgeting (generation- and size-aware) ----------------------
    w_item = jnp.dtype(w1.dtype).itemsize
    x_item = jnp.dtype(x.dtype).itemsize
    o_item = jnp.dtype(out_dtype).itemsize
    needed = _resident_vmem_estimate(tb, D, H, w_item, x_item, o_item)
    cap = (_vmem_capacity_bytes() * 3) // 4      # leave compiler headroom
    if needed > cap:
        # TODO(synk): streamed-weight / K-tiled fallback (grid axis over H with
        # an f32 VMEM accumulator, marked "arbitrary") for very large D*H.
        raise ValueError(
            f"Resident-weight VMEM footprint ~{needed / 2**20:.1f} MiB exceeds "
            f"~{cap / 2**20:.0f} MiB available on this TPU generation; reduce "
            "D*H or add a streamed-weight path.")
    vmem_limit = max(32 * 1024 * 1024, min(cap, (needed * 3) // 2))

    # ---- Cost estimate for XLA scheduling ----------------------------------
    bytes_accessed = (B * D * x_item
                      + (D * H + H * D) * w_item
                      + (H + D) * 4
                      + B * D * o_item)
    cost = pl.CostEstimate(flops=4 * B * D * H,   # two matmuls
                           transcendentals=0,
                           bytes_accessed=bytes_accessed)

    def run(weight_pipeline_mode):
        wkw = ({} if weight_pipeline_mode is None
               else {"pipeline_mode": weight_pipeline_mode})
        grid_spec = pl.GridSpec(
            grid=(num_tiles,),
            in_specs=[
                pl.BlockSpec((tb, D), lambda i: (i, 0)),         # x (streamed)
                pl.BlockSpec((D, H), lambda i: (0, 0), **wkw),   # w1 (resident)
                pl.BlockSpec((1, H), lambda i: (0, 0), **wkw),   # b1 (resident)
                pl.BlockSpec((H, D), lambda i: (0, 0), **wkw),   # w2 (resident)
                pl.BlockSpec((1, D), lambda i: (0, 0), **wkw),   # b2 (resident)
            ],
            out_specs=pl.BlockSpec((tb, D), lambda i: (i, 0)),
        )
        return pl.pallas_call(
            autoencoder_kernel,
            out_shape=jax.ShapeDtypeStruct((B, D), out_dtype),
            grid_spec=grid_spec,
            compiler_params=pltpu.CompilerParams(
                # Batch tiles are independent -> shard across TCs on v7x.
                dimension_semantics=("parallel",),
                vmem_limit_bytes=int(vmem_limit),
            ),
            cost_estimate=cost,
        )(x, w1, b1f, w2, b2f)

    if single_buffer_weights:
        # Constant-index operands only need one buffer; fall back to the
        # default double-buffered pipeline if this JAX build rejects it.
        try:
            return run(pl.Buffered(1))
        except Exception:
            pass
    return run(None)


def init_params(key, d_in, d_hidden, matmul_dtype=jnp.bfloat16):
    # PyTorch Linear stores weight as (out, in) and computes x @ W^T + b, so
    # build the (in, out)-transposed matrices directly. Weights are cast to
    # the MXU dtype ONCE here (not per forward call); biases stay f32 for the
    # f32 epilogue.
    # TODO(synk): weights_init (model-specific init heuristic) is not
    # reproduced; deterministic random init stands in for it.
    k1, k2, k3, k4 = jax.random.split(key, 4)
    w1 = (jax.random.normal(k1, (d_in, d_hidden), jnp.float32) * 0.02
          ).astype(matmul_dtype)
    b1 = jax.random.normal(k2, (1, d_hidden), jnp.float32) * 0.02
    w2 = (jax.random.normal(k3, (d_hidden, d_in), jnp.float32) * 0.02
          ).astype(matmul_dtype)
    b2 = jax.random.normal(k4, (1, d_in), jnp.float32) * 0.02
    return w1, b1, w2, b2


def reference_forward(x, w1, b1, w2, b2):
    # Mirrors the kernel numerics: bf16 matmul inputs, f32 accumulation,
    # f32 bias/ReLU epilogue.
    h = jnp.dot(x.astype(w1.dtype), w1,
                preferred_element_type=jnp.float32) + b1
    h = jnp.maximum(h, 0.0)
    return jnp.dot(h.astype(w2.dtype), w2,
                   preferred_element_type=jnp.float32) + b2


if __name__ == "__main__":
    # Small demo shapes: data dim D and hidden (feature/latent) dim H are 256
    # so the MXU sees full-width tiles; B=384 with tb=256 gives two grid steps
    # with a partial trailing block, exercising the no-pad boundary path.
    B, D, H = 384, 256, 256

    key = jax.random.PRNGKey(0)
    kx, kp = jax.random.split(key)
    x = jax.random.normal(kx, (B, D), jnp.float32)
    w1, b1, w2, b2 = init_params(kp, D, H)          # bf16 weights, f32 biases

    out = autoencoder_forward(x, w1, b1, w2, b2, tb=256)
    out = jax.block_until_ready(out)

    ref = reference_forward(x, w1, b1, w2, b2)

    assert out.shape == (B, D)
    assert out.dtype == x.dtype
    assert jnp.allclose(out, ref.astype(out.dtype), atol=2e-3, rtol=2e-3)
    print("KERNEL_OK")
</pallas_src>

<mosaic_0001>
module attributes {stable_mosaic.version = 11 : i64} {
  func.func @autoencoder_kernel(%arg0: i32, %arg1: memref<256x256xf32, #tpu.memory_space<vmem>>, %arg2: memref<256x256xbf16, #tpu.memory_space<vmem>>, %arg3: memref<1x256xf32, #tpu.memory_space<vmem>>, %arg4: memref<256x256xbf16, #tpu.memory_space<vmem>>, %arg5: memref<1x256xf32, #tpu.memory_space<vmem>>, %arg6: memref<256x256xf32, #tpu.memory_space<vmem>>) attributes {dimension_semantics = [#tpu.dimension_semantics<parallel>], iteration_bounds = array<i64: 2>, scalar_prefetch = 0 : i64, scratch_operands = 0 : i64, tpu.core_type = #tpu.core_type<tc>, window_params = [{transform_indices = @transform_0, window_bounds = array<i64: 256, 256>}, {pipeline_mode = #tpu.pipeline_mode<synchronous>, transform_indices = @transform_1, window_bounds = array<i64: 256, 256>}, {pipeline_mode = #tpu.pipeline_mode<synchronous>, transform_indices = @transform_2, window_bounds = array<i64: 1, 256>}, {pipeline_mode = #tpu.pipeline_mode<synchronous>, transform_indices = @transform_3, window_bounds = array<i64: 256, 256>}, {pipeline_mode = #tpu.pipeline_mode<synchronous>, transform_indices = @transform_4, window_bounds = array<i64: 1, 256>}, {transform_indices = @transform_5, window_bounds = array<i64: 256, 256>}]} {
    %c0 = arith.constant 0 : index
    %c0_0 = arith.constant 0 : index
    %0 = vector.load %arg3[%c0, %c0_0] : memref<1x256xf32, #tpu.memory_space<vmem>>, vector<1x256xf32>
    %c0_1 = arith.constant 0 : index
    %c0_2 = arith.constant 0 : index
    %1 = vector.load %arg5[%c0_1, %c0_2] : memref<1x256xf32, #tpu.memory_space<vmem>>, vector<1x256xf32>
    %c0_3 = arith.constant 0 : index
    %c0_4 = arith.constant 0 : index
    %2 = vector.load %arg1[%c0_3, %c0_4] : memref<256x256xf32, #tpu.memory_space<vmem>>, vector<256x256xf32>
    %3 = arith.truncf %2 : vector<256x256xf32> to vector<256x256xbf16>
    %c0_5 = arith.constant 0 : index
    %c0_6 = arith.constant 0 : index
    %4 = vector.load %arg2[%c0_5, %c0_6] : memref<256x256xbf16, #tpu.memory_space<vmem>>, vector<256x256xbf16>
    %cst = arith.constant dense<0.000000e+00> : vector<256x256xf32>
    %5 = tpu.matmul %3, %4, %cst {dimension_numbers = #tpu.dot_dimension_numbers<[1], [0], [0], [1], [0, 0, 1, 1], [], []>} : vector<256x256xbf16>, vector<256x256xbf16>, vector<256x256xf32> -> vector<256x256xf32>
    %6 = vector.broadcast %0 : vector<1x256xf32> to vector<256x256xf32>
    %7 = arith.addf %5, %6 : vector<256x256xf32>
    %cst_7 = arith.constant 0.000000e+00 : f32
    %8 = vector.broadcast %cst_7 : f32 to vector<256x256xf32>
    %9 = arith.maximumf %7, %8 : vector<256x256xf32>
    %10 = arith.truncf %9 : vector<256x256xf32> to vector<256x256xbf16>
    %c0_8 = arith.constant 0 : index
    %c0_9 = arith.constant 0 : index
    %11 = vector.load %arg4[%c0_8, %c0_9] : memref<256x256xbf16, #tpu.memory_space<vmem>>, vector<256x256xbf16>
    %cst_10 = arith.constant dense<0.000000e+00> : vector<256x256xf32>
    %12 = tpu.matmul %10, %11, %cst_10 {dimension_numbers = #tpu.dot_dimension_numbers<[1], [0], [0], [1], [0, 0, 1, 1], [], []>} : vector<256x256xbf16>, vector<256x256xbf16>, vector<256x256xf32> -> vector<256x256xf32>
    %13 = vector.broadcast %1 : vector<1x256xf32> to vector<256x256xf32>
    %14 = arith.addf %12, %13 : vector<256x256xf32>
    %c0_11 = arith.constant 0 : index
    %c0_12 = arith.constant 0 : index
    %15 = vector.load %arg6[%c0_11, %c0_12] : memref<256x256xf32, #tpu.memory_space<vmem>>, vector<256x256xf32>
    tpu.vector_store %arg6[%c0_11, %c0_12], %14 {strides = array<i32>} : memref<256x256xf32, #tpu.memory_space<vmem>>, vector<256x256xf32>,
    return
  }
  func.func @transform_0(%arg0: i32) -> (i32, i32) {
    %c0_i32 = arith.constant 0 : i32
    %c0_i32_0 = arith.constant 0 : i32
    return %arg0, %c0_i32 : i32, i32
  }
  func.func @transform_1(%arg0: i32) -> (i32, i32) {
    %c0_i32 = arith.constant 0 : i32
    %c0_i32_0 = arith.constant 0 : i32
    %c0_i32_1 = arith.constant 0 : i32
    return %c0_i32, %c0_i32_0 : i32, i32
  }
  func.func @transform_2(%arg0: i32) -> (i32, i32) {
    %c0_i32 = arith.constant 0 : i32
    %c0_i32_0 = arith.constant 0 : i32
    %c0_i32_1 = arith.constant 0 : i32
    return %c0_i32, %c0_i32_0 : i32, i32
  }
  func.func @transform_3(%arg0: i32) -> (i32, i32) {
    %c0_i32 = arith.constant 0 : i32
    %c0_i32_0 = arith.constant 0 : i32
    %c0_i32_1 = arith.constant 0 : i32
    return %c0_i32, %c0_i32_0 : i32, i32
  }
  func.func @transform_4(%arg0: i32) -> (i32, i32) {
    %c0_i32 = arith.constant 0 : i32
    %c0_i32_0 = arith.constant 0 : i32
    %c0_i32_1 = arith.constant 0 : i32
    return %c0_i32, %c0_i32_0 : i32, i32
  }
  func.func @transform_5(%arg0: i32) -> (i32, i32) {
    %c0_i32 = arith.constant 0 : i32
    %c0_i32_0 = arith.constant 0 : i32
    return %arg0, %c0_i32 : i32, i32
  }
}

module attributes {stable_mosaic.version = 11 : i64} {
  func.func @autoencoder_kernel(%arg0: i32, %arg1: memref<256x256xf32, #tpu.memory_space<vmem>>, %arg2: memref<256x256xbf16, #tpu.memory_space<vmem>>, %arg3: memref<1x256xf32, #tpu.memory_space<vmem>>, %arg4: memref<256x256xbf16, #tpu.memory_space<vmem>>, %arg5: memref<1x256xf32, #tpu.memory_space<vmem>>, %arg6: memref<256x256xf32, #tpu.memory_space<vmem>>) attributes {dimension_semantics = [#tpu.dimension_semantics<parallel>], iteration_bounds = array<i64: 2>, scalar_prefetch = 0 : i64, scratch_operands = 0 : i64, tpu.core_type = #tpu.core_type<tc>, window_params = [{transform_indices = @transform_0, window_bounds = array<i64: 256, 256>}, {pipeline_mode = #tpu.pipeline_mode<synchronous>, transform_indices = @transform_1, window_bounds = array<i64: 256, 256>}, {pipeline_mode = #tpu.pipeline_mode<synchronous>, transform_indices = @transform_2, window_bounds = array<i64: 1, 256>}, {pipeline_mode = #tpu.pipeline_mode<synchronous>, transform_indices = @transform_3, window_bounds = array<i64: 256, 256>}, {pipeline_mode = #tpu.pipeline_mode<synchronous>, transform_indices = @transform_4, window_bounds = array<i64: 1, 256>}, {transform_indices = @transform_5, window_bounds = array<i64: 256, 256>}]} {
    %c0 = arith.constant 0 : index
    %c0_0 = arith.constant 0 : index
    %0 = vector.load %arg3[%c0, %c0_0] : memref<1x256xf32, #tpu.memory_space<vmem>>, vector<1x256xf32>
    %c0_1 = arith.constant 0 : index
    %c0_2 = arith.constant 0 : index
    %1 = vector.load %arg5[%c0_1, %c0_2] : memref<1x256xf32, #tpu.memory_space<vmem>>, vector<1x256xf32>
    %c0_3 = arith.constant 0 : index
    %c0_4 = arith.constant 0 : index
    %2 = vector.load %arg1[%c0_3, %c0_4] : memref<256x256xf32, #tpu.memory_space<vmem>>, vector<256x256xf32>
    %3 = arith.truncf %2 : vector<256x256xf32> to vector<256x256xbf16>
    %c0_5 = arith.constant 0 : index
    %c0_6 = arith.constant 0 : index
    %4 = vector.load %arg2[%c0_5, %c0_6] : memref<256x256xbf16, #tpu.memory_space<vmem>>, vector<256x256xbf16>
    %cst = arith.constant dense<0.000000e+00> : vector<256x256xf32>
    %5 = tpu.matmul %3, %4, %cst {dimension_numbers = #tpu.dot_dimension_numbers<[1], [0], [0], [1], [0, 0, 1, 1], [], []>} : vector<256x256xbf16>, vector<256x256xbf16>, vector<256x256xf32> -> vector<256x256xf32>
    %6 = vector.broadcast %0 : vector<1x256xf32> to vector<256x256xf32>
    %7 = arith.addf %5, %6 : vector<256x256xf32>
    %cst_7 = arith.constant 0.000000e+00 : f32
    %8 = vector.broadcast %cst_7 : f32 to vector<256x256xf32>
    %9 = arith.maximumf %7, %8 : vector<256x256xf32>
    %10 = arith.truncf %9 : vector<256x256xf32> to vector<256x256xbf16>
    %c0_8 = arith.constant 0 : index
    %c0_9 = arith.constant 0 : index
    %11 = vector.load %arg4[%c0_8, %c0_9] : memref<256x256xbf16, #tpu.memory_space<vmem>>, vector<256x256xbf16>
    %cst_10 = arith.constant dense<0.000000e+00> : vector<256x256xf32>
    %12 = tpu.matmul %10, %11, %cst_10 {dimension_numbers = #tpu.dot_dimension_numbers<[1], [0], [0], [1], [0, 0, 1, 1], [], []>} : vector<256x256xbf16>, vector<256x256xbf16>, vector<256x256xf32> -> vector<256x256xf32>
    %13 = vector.broadcast %1 : vector<1x256xf32> to vector<256x256xf32>
    %14 = arith.addf %12, %13 : vector<256x256xf32>
    %c0_11 = arith.constant 0 : index
    %c0_12 = arith.constant 0 : index
    %15 = vector.load %arg6[%c0_11, %c0_12] : memref<256x256xf32, #tpu.memory_space<vmem>>, vector<256x256xf32>
    tpu.vector_store %arg6[%c0_11, %c0_12], %14 {strides = array<i32>} : memref<256x256xf32, #tpu.memory_space<vmem>>, vector<256x256xf32>,
    return
  }
  func.func @transform_0(%arg0: i32) -> (i32, i32) {
    %c0_i32 = arith.constant 0 : i32
    %c0_i32_0 = arith.constant 0 : i32
    return %arg0, %c0_i32 : i32, i32
  }
  func.func @transform_1(%arg0: i32) -> (i32, i32) {
    %c0_i32 = arith.constant 0 : i32
    %c0_i32_0 = arith.constant 0 : i32
    %c0_i32_1 = arith.constant 0 : i32
    return %c0_i32, %c0_i32_0 : i32, i32
  }
  func.func @transform_2(%arg0: i32) -> (i32, i32) {
    %c0_i32 = arith.constant 0 : i32
    %c0_i32_0 = arith.constant 0 : i32
    %c0_i32_1 = arith.constant 0 : i32
    return %c0_i32, %c0_i32_0 : i32, i32
  }
  func.func @transform_3(%arg0: i32) -> (i32, i32) {
    %c0_i32 = arith.constant 0 : i32
    %c0_i32_0 = arith.constant 0 : i32
    %c0_i32_1 = arith.constant 0 : i32
    return %c0_i32, %c0_i32_0 : i32, i32
  }
  func.func @transform_4(%arg0: i32) -> (i32, i32) {
    %c0_i32 = arith.constant 0 : i32
    %c0_i32_0 = arith.constant 0 : i32
    %c0_i32_1 = arith.constant 0 : i32
    return %c0_i32, %c0_i32_0 : i32, i32
  }
  func.func @transform_5(%arg0: i32) -> (i32, i32) {
    %c0_i32 = arith.constant 0 : i32
    %c0_i32_0 = arith.constant 0 : i32
    return %arg0, %c0_i32 : i32, i32
  }
}

</mosaic_0001>

<bundles_post_ra>
// kernel: tpu_custom_call.1
= control target key start
LH: loop header
LB: loop body
LE: loop exit
PB: predicated region body
PF: predicated region fallthrough
CT: control target
= control target key end

     0   :  { %s3118_s0 = inlined_call_operand.hbm [shape: f32[384,256], index: 0, kind: input, shape index: {}]   ;;  %s3119_s1 = inlined_call_operand.hbm [shape: bf16[256,256], index: 1, kind: input, shape index: {}]   ;;  %s3120_s2 = inlined_call_operand.hbm [shape: f32[1,256], index: 2, kind: input, shape index: {}]   ;;  %s3121_s3 = inlined_call_operand.hbm [shape: bf16[256,256], index: 3, kind: input, shape index: {}]   ;;  %s3122_s4 = inlined_call_operand.vmem [shape: f32[1,256], index: 4, kind: input, shape index: {}]   ;;  %s3123_s5 = inlined_call_operand.hbm [shape: f32[384,256], index: 5, kind: output, shape index: {}]  }
   0x1   :  { %3127 = sst [smem:[#allocation15_spill]] %s3119_s1 }
   0x2   :  { %10 = vsyncpa [#allocation3], 0 }
   0x3   :  { %12 = vsyncpa [#allocation3 + $0x1], 0 }
   0x4   :  { %13 = vsyncpa [#allocation6], 0 }
   0x5   :  { %14 = vsyncpa [#allocation9], 0 }
   0x6   :  { %15 = vsyncpa [#allocation4], 0 }
   0x7   :  { %17 = vsyncpa [#allocation4 + $0x1], 0  ;;  %s2496_s18 = smov 0   ;;  %s2498_s19 = smov 0  }
   0x8   :  { %s2500_s20 = smov 0   ;;  %s2502_s21 = smov 0  }
   0x9 LB: > { %s2517_s22 = sadd.s32 4294967295, %s2453_s21   ;;  %s1805_s23 = sadd.s32 4294967294, %s2453_s21   ;;  %s2453_s21 = sphi %s2502_s21, %s3147_s21   ;;  %s2449_s20 = sphi %s2500_s20, %s3146_s20   ;;  %s2445_s19 = sphi %s2498_s19, %s3145_s19   ;;  %s2441_s18 = sphi %s2496_s18, %s3144_s18  }
   0xa   : > { %s2521_s24 = sadd.s32 1, %s2453_s21   ;;  %s30_s25 = sadd.s32 1, %s2449_s20 }
   0xb   : > { %s27_s26 = ssub.s32 %s2453_s21, %s2521_s24  ;;  %p37_p0 = scmp.ne.s32.totalorder %s2449_s20, %s2445_s19 }
   0xc   : > { %p28_p1 = scmp.eq.s32.totalorder %s27_s26, 0  ;;  %p38_p2 = scmp.eq.s32.totalorder %s2453_s21, 0 }
   0xd   : > { %p43_p3 = scmp.ne.s32.totalorder %s2445_s19, %s2441_s18  ;;  %p3126_p4 = scmp.eq.s32.totalorder %s2517_s22, 0 }
   0xe   : > { %s2533_s27 = scalar_select %p28_p1, %s2449_s20, %s30_s25  }
   0xf   : > { %p2535_p5 = por %p38_p2, %p37_p0  ;;  %p2541_p6 = por %p3126_p4, %p43_p3 }
  0x10   : > { %p151_p7 = scmp.eq.s32.totalorder %s2517_s22, 1  ;;  %p157_p8 = scmp.eq.s32.totalorder %s1805_s23, 1 }
  0x11   : > { %p1806_p9 = scmp.ge.s32.totalorder %s2453_s21, 1  ;;  %p164_p10 = scmp.lt.s32.totalorder %s2453_s21, 3 }
  0x12   : > { %p2548_p11 = por %p151_p7, %p37_p0  ;;  %p2552_p12 = por %p157_p8, %p43_p3 }
  0x13   : > { %p2556_p13 = pnand %p1806_p9, %p164_p10  ;;  %s3133_s1 = sld [smem:[#allocation15_spill]] }
  0x14   : > { %s3131_s6 = scalar_select %p2552_p12, 1, 0 }
  0x15   : > { %p2177_p1 = pneg %p2556_p13  ;;  %s2455_s11 = smov [#allocation5]  }
  0x16   : > { %s177_s12 = sshll.u32 %s2455_s11, 4  ;;  %s190_s16 = sshll.u32 %s3120_s2, 4  ;;  %s178_s12 = int_to_ptr.vmem [resolvable:$true] %s177_s12  ;;  %s191_s16 = int_to_ptr.hbm [resolvable:$true] %s190_s16 }
  0x17   : > { %p2567_p0 = pnand %p2177_p1, %p3126_p4  ;;  %s2456_s17 = smov 128  }
  0x18   : > { %s2457_s23 = smov 8   ;;  %s201_s8 = sshll.u32 %s3121_s3, 4  ;;  %s202_s8 = int_to_ptr.hbm [resolvable:$true] %s201_s8 }
  0x19   : > { %s175_s10 = sshll.u32 %s3133_s1, 4  ;;  %s2458_s9 = smov [#allocation7]   ;;  %s176_s10 = int_to_ptr.hbm [resolvable:$true] %s175_s10 }
  0x1a   : > { %2180 = dma.hbm_to_vmem [thread:$0]  (!%p2567_p0), %s176_s10, 4096, %s178_s12, [#allocation6], %s2456_s17, %s2456_s17, %s2457_s23  }
  0x1b   : > { %s192_s11 = sshll.u32 %s2458_s9, 4  ;;  %s2459_s14 = smov [#allocation8]   ;;  %s193_s11 = int_to_ptr.vmem [resolvable:$true] %s192_s11 }
  0x1c   : > { %2183 = dma.hbm_to_vmem [thread:$0]  (!%p2567_p0), %s191_s16, 32, %s193_s11, [#allocation6]  }
  0x1d   : > { %s203_s15 = sshll.u32 %s2459_s14, 4  ;;  %p3125_p2 = scmp.ge.s32.totalorder %s2453_s21, 2  ;;  %s204_s15 = int_to_ptr.vmem [resolvable:$true] %s203_s15 }
  0x1e   : > { %2186 = dma.hbm_to_vmem [thread:$0]  (!%p2567_p0), %s202_s8, 4096, %s204_s15, [#allocation9], %s2456_s17, %s2456_s17, %s2457_s23  }
  0x1f   : > { %216 = sbr.rel (%p3125_p2) target bundleno = 73 (0x49), region = 32 }
  0x24   : > { %219 = sbr.rel (!%p2535_p5) target bundleno = 73 (0x49), region = 36  ;;  %s220_s10 = sand.u32 (%p2535_p5), 1, %s2449_s20  }
  0x25   : > { %s1812_s12 = sshll.u32 (%p2535_p5), %s2453_s21, 5  ;;  %s1811_s25 = sshll.u32 (%p2535_p5), %s220_s10, 9 }
  0x26   : > { %s226_s26 = ssub.s32 (%p2535_p5), 48, %s1812_s12  ;;  %s2593_s23 = scalar_lea.sflag (%p2535_p5), [#allocation3], %s220_s10 }
  0x27   : > { %p227_p3 = scmp.lt.s32.totalorder (%p2535_p5), %s226_s26, 32  ;;  %s224_s8 = scalar_lea.vmem (%p2535_p5), [#allocation2], %s1811_s25 }
  0x29   : > { %s3149_s26 = smov (!%p227_p3, %s226_s26), 32 }
  0x2a   : > { %s2093_s13 = sshll.u32 %s3149_s26, 4 }
  0x2b   : > { %s231_s16 = ssub.s32 512, %s2093_s13 }
  0x2c   : > { %s232_s17 = sshll.u32 %s231_s16, 4 }
  0x2d   : > { %233 = vsyncadd %s2593_s23, %s232_s17  ;;  %p2596_p5 = scmp.ne.s32.totalorder %s2093_s13, 0  ;;  %s2095_s9 = sshll.u32 %s2453_s21, 9 }
  0x2e   : > { %s237_s15 = scalar_lea.hbm %s3118_s0, %s2095_s9  ;;  %s2604_s12 = sshll.u32 %s224_s8, 4  ;;  %s242_s12 = int_to_ptr.vmem [resolvable:$true] %s2604_s12 }
  0x2f   : > { %s239_s10 = sshll.u32 %s237_s15, 4  ;;  %s3124_s25 = sshll.u32 %s3149_s26, 8  ;;  %s2607_s10 = int_to_ptr.hbm [resolvable:$true] %s239_s10 }
  0x30   : > { %s2329_s16 = sshra.s32 %s2607_s10, 4  ;;  %s2331_s13 = sshrl.u32 %s3124_s25, 4  ;;  %s2330_s16 = int_to_ptr.hbm [resolvable:$true] %s2329_s16 }
  0x31   : > { %s2336_s17 = scalar_lea.hbm %s2330_s16, %s2331_s13  ;;  %s2340_s8 = scalar_lea.hbm %s3118_s0, 768 }
  0x32   : > { %p2337_p7 = scmp.ne.s32.totalorder %s2330_s16, %s2336_s17  ;;  %p2341_p10 = scmp.lt.s32.totalorder %s2330_s16, %s3118_s0 }
  0x33   : > { %p2342_p1 = scmp.lt.s32.totalorder %s2340_s8, %s2336_s17 }
  0x34   : > { %p2338_p8 = pnand %p2337_p7, %p2596_p5 }
  0x35   : > { %p2343_p0 = por %p2342_p1, %p2341_p10 }
  0x36   : > { %p2339_p9 = pneg %p2338_p8 }
  0x38   : > { %p2344_p3 = pnand %p2343_p0, %p2339_p9 }
  0x3a   : > { %2347 = shalt.err (!%p2344_p3)
}
  0x3b   : > { %s2348_s25 = sshra.s32 %s242_s12, 4  ;;  %s2460_s11 = smov [#allocation2]   ;;  %s2349_s25 = int_to_ptr.vmem [resolvable:$true] %s2348_s25 }
  0x3c   : > { %s2355_s1 = scalar_lea.vmem %s2349_s25, %s2331_s13  ;;  %s2359_s9 = scalar_lea.vmem %s2460_s11, 1024 }
  0x3d   : > { %p2356_p7 = scmp.ne.s32.totalorder %s2349_s25, %s2355_s1  ;;  %p2361_p4 = scmp.lt.s32.totalorder %s2359_s9, %s2355_s1 }
  0x3f   : > { %p2357_p8 = pnand %p2356_p7, %p2596_p5 }
  0x41   : > { %p2358_p2 = pneg %p2357_p8 }
  0x43   : > { %p2363_p12 = pnand %p2361_p4, %p2358_p2 }
  0x45   : > { %2366 = shalt.err (!%p2363_p12)
}
  0x46   : > { %s2461_s16 = smov 256   ;;  %s2462_s17 = smov 16  }
  0x47   : > { %s3136_s8 = sshll.u32 %s3149_s26, 8 }
  0x48   : > { %247 = dma.hbm_to_vmem [thread:$0]  (%p2596_p5), %s2607_s10, %s3136_s8, %s242_s12, %s2593_s23, %s2461_s16, %s2461_s16, %s2462_s17  }
  0x49 PF: > { %253 = sbr.rel (%p2556_p13) target bundleno = 793 (0x319), region = 40  ;;  %s2636_s1 = sand.u32 (!%p2556_p13), 1, %s2445_s19  }
  0x4a   : > { %s1821_s25 = sshll.u32 (!%p2556_p13), %s2636_s1, 9  ;;  %s256_s13 = scalar_lea.sflag (!%p2556_p13), [#allocation3], %s2636_s1 }
  0x4b   : > { %s2642_s14 = scalar_lea.vmem (!%p2556_p13), [#allocation2], %s1821_s25 }
  0x4e   : > { %2424 = dma.done.wait (%p2541_p6), %s256_s13, 8192  }
  0x4f   : > { %2426 = vsyncadd (%p2541_p6), %s256_s13, 4294959104  ;;  %p3137_p4 = scmp.eq.s32.totalorder %s2517_s22, 0 }
  0x51   : > { %2428 = dma.done.wait (%p3137_p4), [#allocation6], 4128   ;;  %p3138_p12 = pmov %p3137_p4 }
  0x52   : > { %p3139_p13 = pmov %p3137_p4 }
  0x53   : > { %2430 = vsyncadd (%p3138_p12), [#allocation6], 4294963168 }
  0x54   : > { %2432 = dma.done.wait (%p3139_p13), [#allocation9], 4096   ;;  %p3140_p2 = pmov %p3137_p4 }
  0x55   : > { %v1884_v0 = vld [vmem:[#allocation5 + $0x70] sm:$0xf]  ;;  %v2111_v1 = vld [vmem:[#allocation5 + $0x74] sm:$0xf0]  ;;  %v2110_v5 = vld [vmem:[#allocation5 + $0x74] sm:$0xf] }
  0x56   : > { %2434 = vsyncadd (%p3140_p2), [#allocation9], 4294963200  ;;  %v1948_v2 = vld [vmem:[#allocation5 + $0xf0] sm:$0xf]  ;;  %v1885_v3 = vor.u32 %v2111_v1, %v1884_v0  ;;  %v2127_v4 = vld [vmem:[#allocation5 + $0xf4] sm:$0xf0] }
  0x57   : > { %v1886_v6 = vld [vmem:[#allocation5 + $0x78] sm:$0xf0]  ;;  %v1949_v7 = vor.u32 %v2127_v4, %v1948_v2  ;;  %v2126_v9 = vld [vmem:[#allocation5 + $0xf4] sm:$0xf]  ;;  %v1876_v11 = vld [vmem:[#allocation5 + $0x60] sm:$0xf] }
  0x58   : > { %v1889_v8 = vor.u32 %v2110_v5, %v1886_v6  ;;  %v1950_v10 = vld [vmem:[#allocation5 + $0xf8] sm:$0xf0]  ;;  %609 = vmatpush.bf16.msra.mxu0 %v1885_v3  ;;  %v2109_v13 = vld [vmem:[#allocation5 + $0x64] sm:$0xf0]  ;;  %v1940_v14 = vld [vmem:[#allocation5 + $0xe0] sm:$0xf] }
  0x59   : > { %v1953_v12 = vor.u32 %v2126_v9, %v1950_v10  ;;  %v2125_v15 = vld [vmem:[#allocation5 + $0xe4] sm:$0xf0]  ;;  %698 = vmatpush.bf16.msra.mxu1 %v1949_v7  ;;  %v1877_v16 = vor.u32 %v2109_v13, %v1876_v11  ;;  %v2108_v18 = vld [vmem:[#allocation5 + $0x64] sm:$0xf]  ;;  %v1878_v19 = vld [vmem:[#allocation5 + $0x68] sm:$0xf0] }
  0x5a   : > { %787 = vmatpush.bf16.msra.mxu2 %v1889_v8  ;;  %v1941_v17 = vor.u32 %v2125_v15, %v1940_v14  ;;  %v2124_v20 = vld [vmem:[#allocation5 + $0xe4] sm:$0xf]  ;;  %v1881_v21 = vor.u32 %v2108_v18, %v1878_v19  ;;  %v1942_v22 = vld [vmem:[#allocation5 + $0xe8] sm:$0xf0]  ;;  %v1868_v23 = vld [vmem:[#allocation5 + $0x50] sm:$0xf] }
  0x5b   : > { %876 = vmatpush.bf16.msra.mxu3 %v1953_v12  ;;  %v2107_v24 = vld [vmem:[#allocation5 + $0x54] sm:$0xf0]  ;;  %v1945_v25 = vor.u32 %v2124_v20, %v1942_v22  ;;  %v1932_v26 = vld [vmem:[#allocation5 + $0xd0] sm:$0xf]  ;;  %v2106_v28 = vld [vmem:[#allocation5 + $0x54] sm:$0xf] }
  0x5c   : > { %v2123_v27 = vld [vmem:[#allocation5 + $0xd4] sm:$0xf0]  ;;  %610 = vmatpush.bf16.msra.mxu0 %v1877_v16  ;;  %v1869_v29 = vor.u32 %v2107_v24, %v1868_v23  ;;  %v1870_v30 = vld [vmem:[#allocation5 + $0x58] sm:$0xf0]  ;;  %v2122_v31 = vld [vmem:[#allocation5 + $0xd4] sm:$0xf] }
  0x5d   : > { %v1934_v32 = vld [vmem:[#allocation5 + $0xd8] sm:$0xf0]  ;;  %699 = vmatpush.bf16.msra.mxu1 %v1941_v17  ;;  %v1933_v33 = vor.u32 %v2123_v27, %v1932_v26  ;;  %v1873_v34 = vor.u32 %v2106_v28, %v1870_v30  ;;  %v1860_v35 = vld [vmem:[#allocation5 + $0x40] sm:$0xf]  ;;  %v2105_v36 = vld [vmem:[#allocation5 + $0x44] sm:$0xf0] }
  0x5e   : > { %788 = vmatpush.bf16.msra.mxu2 %v1881_v21  ;;  %v1924_v37 = vld [vmem:[#allocation5 + $0xc0] sm:$0xf]  ;;  %v1937_v38 = vor.u32 %v2122_v31, %v1934_v32  ;;  %v2121_v39 = vld [vmem:[#allocation5 + $0xc4] sm:$0xf0]  ;;  %v2104_v40 = vld [vmem:[#allocation5 + $0x44] sm:$0xf]  ;;  %v1861_v44 = vor.u32 %v2105_v36, %v1860_v35 }
  0x5f   : > { %877 = vmatpush.bf16.msra.mxu3 %v1945_v25  ;;  %v1862_v41 = vld [vmem:[#allocation5 + $0x48] sm:$0xf0]  ;;  %v2120_v42 = vld [vmem:[#allocation5 + $0xc4] sm:$0xf]  ;;  %v1925_v45 = vor.u32 %v2121_v39, %v1924_v37  ;;  %v1852_v47 = vld [vmem:[#allocation5 + $0x30] sm:$0xf] }
  0x60   : > { %v1926_v43 = vld [vmem:[#allocation5 + $0xc8] sm:$0xf0]  ;;  %611 = vmatpush.bf16.msra.mxu0 %v1869_v29  ;;  %v1865_v46 = vor.u32 %v2104_v40, %v1862_v41  ;;  %v2103_v48 = vld [vmem:[#allocation5 + $0x34] sm:$0xf0]  ;;  %v1916_v49 = vld [vmem:[#allocation5 + $0xb0] sm:$0xf] }
  0x61   : > { %700 = vmatpush.bf16.msra.mxu1 %v1933_v33  ;;  %v1929_v50 = vor.u32 %v2120_v42, %v1926_v43  ;;  %v2119_v51 = vld [vmem:[#allocation5 + $0xb4] sm:$0xf0]  ;;  %v2102_v52 = vld [vmem:[#allocation5 + $0x34] sm:$0xf]  ;;  %v1854_v53 = vld [vmem:[#allocation5 + $0x38] sm:$0xf0]  ;;  %v1853_v56 = vor.u32 %v2103_v48, %v1852_v47 }
  0x62   : > { %789 = vmatpush.bf16.msra.mxu2 %v1873_v34  ;;  %v2118_v54 = vld [vmem:[#allocation5 + $0xb4] sm:$0xf]  ;;  %v1918_v55 = vld [vmem:[#allocation5 + $0xb8] sm:$0xf0]  ;;  %v1917_v57 = vor.u32 %v2119_v51, %v1916_v49  ;;  %v1857_v58 = vor.u32 %v2102_v52, %v1854_v53  ;;  %v1844_v59 = vld [vmem:[#allocation5 + $0x20] sm:$0xf] }
  0x63   : > { %878 = vmatpush.bf16.msra.mxu3 %v1937_v38  ;;  %v2101_v60 = vld [vmem:[#allocation5 + $0x24] sm:$0xf0]  ;;  %v1908_v61 = vld [vmem:[#allocation5 + $0xa0] sm:$0xf]  ;;  %v1921_v62 = vor.u32 %v2118_v54, %v1918_v55  ;;  %v2100_v0 = vld [vmem:[#allocation5 + $0x24] sm:$0xf] }
  0x64   : > { %612 = vmatpush.bf16.msra.mxu0 %v1861_v44  ;;  %v2117_v63 = vld [vmem:[#allocation5 + $0xa4] sm:$0xf0]  ;;  %v1846_v1 = vld [vmem:[#allocation5 + $0x28] sm:$0xf0]  ;;  %v2116_v2 = vld [vmem:[#allocation5 + $0xa4] sm:$0xf]  ;;  %v1845_v4 = vor.u32 %v2101_v60, %v1844_v59 }
  0x65   : > { %701 = vmatpush.bf16.msra.mxu1 %v1925_v45  ;;  %v1910_v3 = vld [vmem:[#allocation5 + $0xa8] sm:$0xf0]  ;;  %v1909_v5 = vor.u32 %v2117_v63, %v1908_v61  ;;  %v1849_v6 = vor.u32 %v2100_v0, %v1846_v1  ;;  %v1836_v7 = vld [vmem:[#allocation5 + $0x10] sm:$0xf]  ;;  %v2099_v8 = vld [vmem:[#allocation5 + $0x14] sm:$0xf0] }
  0x66   : > { %790 = vmatpush.bf16.msra.mxu2 %v1865_v46  ;;  %v1900_v9 = vld [vmem:[#allocation5 + $0x90] sm:$0xf]  ;;  %v1913_v10 = vor.u32 %v2116_v2, %v1910_v3  ;;  %v2115_v11 = vld [vmem:[#allocation5 + $0x94] sm:$0xf0]  ;;  %v2098_v12 = vld [vmem:[#allocation5 + $0x14] sm:$0xf]  ;;  %v1837_v16 = vor.u32 %v2099_v8, %v1836_v7 }
  0x67   : > { %879 = vmatpush.bf16.msra.mxu3 %v1929_v50  ;;  %v1838_v13 = vld [vmem:[#allocation5 + $0x18] sm:$0xf0]  ;;  %v2114_v14 = vld [vmem:[#allocation5 + $0x94] sm:$0xf]  ;;  %v1828_v17 = vld [vmem:[#allocation5] sm:$0xf]  ;;  %v1901_v19 = vor.u32 %v2115_v11, %v1900_v9 }
  0x68   : > { %613 = vmatpush.bf16.msra.mxu0 %v1853_v56  ;;  %v1902_v15 = vld [vmem:[#allocation5 + $0x98] sm:$0xf0]  ;;  %v2097_v18 = vld [vmem:[#allocation5 + $0x4] sm:$0xf0]  ;;  %v1841_v20 = vor.u32 %v2098_v12, %v1838_v13  ;;  %v1892_v21 = vld [vmem:[#allocation5 + $0x80] sm:$0xf] }
  0x69   : > { %702 = vmatpush.bf16.msra.mxu1 %v1917_v57  ;;  %v2113_v22 = vld [vmem:[#allocation5 + $0x84] sm:$0xf0]  ;;  %v2096_v23 = vld [vmem:[#allocation5 + $0x4] sm:$0xf]  ;;  %v1905_v24 = vor.u32 %v2114_v14, %v1902_v15  ;;  %v1830_v25 = vld [vmem:[#allocation5 + $0x8] sm:$0xf0]  ;;  %v1829_v31 = vor.u32 %v2097_v18, %v1828_v17 }
  0x6a   : > { %791 = vmatpush.bf16.msra.mxu2 %v1857_v58  ;;  %v2112_v26 = vld [vmem:[#allocation5 + $0x84] sm:$0xf]  ;;  %v1894_v27 = vld [vmem:[#allocation5 + $0x88] sm:$0xf0]  ;;  %v2142_v29 = vld [vmem:[#allocation8 + $0x74] sm:$0xf]  ;;  %v1893_v35 = vor.u32 %v2113_v22, %v1892_v21  ;;  %v1833_v36 = vor.u32 %v2096_v23, %v1830_v25 }
  0x6b   : > { %880 = vmatpush.bf16.msra.mxu3 %v1921_v62  ;;  %v316_v28 = vld [vmem:[%s2642_s14] sm:$0xff]  ;;  %v318_v32 = vld [vmem:[%s2642_s14 + $0x10] sm:$0xff]  ;;  %v317_v37 = vld [vmem:[%s2642_s14 + $0x8] sm:$0xff]  ;;  %v1897_v39 = vor.u32 %v2112_v26, %v1894_v27  ;;  %s2895_s26 = scalar_lea.vmem [#allocation10], %s1821_s25  ;;  %s1679_s23 = scalar_lea.sflag [#allocation4], %s2636_s1 }
  0x6c   : > { %614 = vmatpush.bf16.msra.mxu0 %v1845_v4  ;;  %v2014_v30 = vld [vmem:[#allocation8 + $0x78] sm:$0xf0]  ;;  %v2158_v33 = vld [vmem:[#allocation8 + $0xf4] sm:$0xf]  ;;  %v2012_v41 = vld [vmem:[#allocation8 + $0x70] sm:$0xf]  ;;  %v380_v43 = vpack.c.bf16 %v318_v32, %v316_v28 }
  0x6d   : > { %703 = vmatpush.bf16.msra.mxu1 %v1909_v5  ;;  %v2078_v34 = vld [vmem:[#allocation8 + $0xf8] sm:$0xf0]  ;;  %v2017_v40 = vor.u32 %v2142_v29, %v2014_v30  ;;  %v2143_v42 = vld [vmem:[#allocation8 + $0x74] sm:$0xf0]  ;;  %v2076_v45 = vld [vmem:[#allocation8 + $0xf0] sm:$0xf] }
  0x6e   : > { %792 = vmatpush.bf16.msra.mxu2 %v1849_v6  ;;  %v319_v38 = vld [vmem:[%s2642_s14 + $0x18] sm:$0xff]  ;;  %v2081_v44 = vor.u32 %v2158_v33, %v2078_v34  ;;  %v2013_v48 = vor.u32 %v2143_v42, %v2012_v41  ;;  %v2140_v50 = vld [vmem:[#allocation8 + $0x64] sm:$0xf]  ;;  %v2006_v51 = vld [vmem:[#allocation8 + $0x68] sm:$0xf0]  ;;  %s2083_s28 = sshll.u32 (%p2548_p11), %s2517_s22, 5 }
  0x6f   : > { %881 = vmatpush.bf16.msra.mxu3 %v1913_v10  ;;  %v2159_v46 = vld [vmem:[#allocation8 + $0xf4] sm:$0xf0]  ;;  %v381_v47 = vpack.c.bf16 %v319_v38, %v317_v37  ;;  %v2156_v52 = vld [vmem:[#allocation8 + $0xe4] sm:$0xf]  ;;  %v2009_v53 = vor.u32 %v2140_v50, %v2006_v51  ;;  %v2070_v54 = vld [vmem:[#allocation8 + $0xe8] sm:$0xf0] }
  0x70   : > { %615 = vmatpush.bf16.msra.mxu0 %v1837_v16  ;;  %v2077_v49 = vor.u32 %v2159_v46, %v2076_v45  ;;  %v2004_v55 = vld [vmem:[#allocation8 + $0x60] sm:$0xf]  ;;  %v2141_v56 = vld [vmem:[#allocation8 + $0x64] sm:$0xf0]  ;;  %v2073_v57 = vor.u32 %v2156_v52, %v2070_v54  ;;  %v322_v63 = vld [vmem:[%s2642_s14 + $0x30] sm:$0xff]  ;;  %s1687_s12 = ssub.s32 (%p2548_p11), 48, %s2083_s28 }
  0x71   : > { %704 = vmatpush.bf16.msra.mxu1 %v1901_v19  ;;  %v2005_v58 = vor.u32 %v2141_v56, %v2004_v55  ;;  %v2068_v59 = vld [vmem:[#allocation8 + $0xe0] sm:$0xf]  ;;  %v2157_v60 = vld [vmem:[#allocation8 + $0xe4] sm:$0xf0]  ;;  %v323_v1 = vld [vmem:[%s2642_s14 + $0x38] sm:$0xff]  ;;  %p1688_p6 = scmp.lt.s32.totalorder (%p2548_p11), %s1687_s12, 32 }
  0x72   : > { %793 = vmatpush.bf16.msra.mxu2 %v1841_v20  ;;  %v2069_v61 = vor.u32 %v2157_v60, %v2068_v59  ;;  %v320_v62 = vld [vmem:[%s2642_s14 + $0x20] sm:$0xff]  ;;  %v321_v0 = vld [vmem:[%s2642_s14 + $0x28] sm:$0xff]  ;;  %v326_v5 = vld [vmem:[%s2642_s14 + $0x50] sm:$0xff] }
  0x73   : > { %882 = vmatpush.bf16.msra.mxu3 %v1905_v24  ;;  %v382_v2 = vpack.c.bf16 %v322_v63, %v320_v62  ;;  %v383_v3 = vpack.c.bf16 %v323_v1, %v321_v0  ;;  %v324_v4 = vld [vmem:[%s2642_s14 + $0x40] sm:$0xff]  ;;  %v325_v6 = vld [vmem:[%s2642_s14 + $0x48] sm:$0xff]  ;;  %v327_v7 = vld [vmem:[%s2642_s14 + $0x58] sm:$0xff] }
  0x74   : > { %616 = vmatpush.bf16.msra.mxu0 %v1829_v31  ;;  %v384_v8 = vpack.c.bf16 %v326_v5, %v324_v4  ;;  %v385_v9 = vpack.c.bf16 %v327_v7, %v325_v6  ;;  %v2138_v10 = vld [vmem:[#allocation8 + $0x54] sm:$0xf]  ;;  %v1998_v11 = vld [vmem:[#allocation8 + $0x58] sm:$0xf0]  ;;  %v1996_v15 = vld [vmem:[#allocation8 + $0x50] sm:$0xf] }
  0x75   : > { %705 = vmatpush.bf16.msra.mxu1 %v1893_v35  ;;  %v2154_v12 = vld [vmem:[#allocation8 + $0xd4] sm:$0xf]  ;;  %v2001_v13 = vor.u32 %v2138_v10, %v1998_v11  ;;  %v2062_v14 = vld [vmem:[#allocation8 + $0xd8] sm:$0xf0]  ;;  %v2139_v16 = vld [vmem:[#allocation8 + $0x54] sm:$0xf0] }
  0x76   : > { %794 = vmatpush.bf16.msra.mxu2 %v1833_v36  ;;  %v2065_v17 = vor.u32 %v2154_v12, %v2062_v14  ;;  %v1997_v18 = vor.u32 %v2139_v16, %v1996_v15  ;;  %v2060_v19 = vld [vmem:[#allocation8 + $0xd0] sm:$0xf]  ;;  %v2155_v20 = vld [vmem:[#allocation8 + $0xd4] sm:$0xf0]  ;;  %v328_v22 = vld [vmem:[%s2642_s14 + $0x60] sm:$0xff] }
  0x77   : > { %883 = vmatpush.bf16.msra.mxu3 %v1897_v39  ;;  %617 = vmatmul.bf16.vlgmr.msra.gmra.mxu0 %v380_v43  ;;  %v2061_v21 = vor.u32 %v2155_v20, %v2060_v19  ;;  %v330_v23 = vld [vmem:[%s2642_s14 + $0x70] sm:$0xff]  ;;  %v329_v24 = vld [vmem:[%s2642_s14 + $0x68] sm:$0xff]  ;;  %v331_v25 = vld [vmem:[%s2642_s14 + $0x78] sm:$0xff] }
  0x78   : > { %706 = vmatmul.bf16.vlgmr.msra.gmra.mxu1 %v381_v47  ;;  %1258 = vmatpush.bf16.msrb.mxu0 %v2013_v48  ;;  %v386_v26 = vpack.c.bf16 %v330_v23, %v328_v22  ;;  %v387_v27 = vpack.c.bf16 %v331_v25, %v329_v24  ;;  %v332_v28 = vld [vmem:[%s2642_s14 + $0x80] sm:$0xff]  ;;  %v334_v29 = vld [vmem:[%s2642_s14 + $0x90] sm:$0xff]  ;;  %v333_v30 = vld [vmem:[%s2642_s14 + $0x88] sm:$0xff] }
  0x79   : > { %795 = vmatmul.bf16.vlgmr.msra.gmra.mxu2 %v380_v43  ;;  %1347 = vmatpush.bf16.msrb.mxu1 %v2077_v49  ;;  %v335_v31 = vld [vmem:[%s2642_s14 + $0x98] sm:$0xff]  ;;  %v388_v32 = vpack.c.bf16 %v334_v29, %v332_v28  ;;  %v2136_v34 = vld [vmem:[#allocation8 + $0x44] sm:$0xf]  ;;  %v1990_v35 = vld [vmem:[#allocation8 + $0x48] sm:$0xf0] }
  0x7a   : > { %1436 = vmatpush.bf16.msrb.mxu2 %v2017_v40  ;;  %884 = vmatmul.bf16.vlgmr.msra.gmra.mxu3 %v381_v47  ;;  %v389_v33 = vpack.c.bf16 %v335_v31, %v333_v30  ;;  %v2152_v36 = vld [vmem:[#allocation8 + $0xc4] sm:$0xf]  ;;  %v1993_v37 = vor.u32 %v2136_v34, %v1990_v35  ;;  %v2054_v38 = vld [vmem:[#allocation8 + $0xc8] sm:$0xf0]  ;;  %v1988_v39 = vld [vmem:[#allocation8 + $0x40] sm:$0xf] }
  0x7b   : > { %1525 = vmatpush.bf16.msrb.mxu3 %v2081_v44  ;;  %v2137_v40 = vld [vmem:[#allocation8 + $0x44] sm:$0xf0]  ;;  %v2057_v41 = vor.u32 %v2152_v36, %v2054_v38  ;;  %v2052_v43 = vld [vmem:[#allocation8 + $0xc0] sm:$0xf]  ;;  %v338_v47 = vld [vmem:[%s2642_s14 + $0xb0] sm:$0xff] }
  0x7c   : > { %1259 = vmatpush.bf16.msrb.mxu0 %v2005_v58  ;;  %v1989_v42 = vor.u32 %v2137_v40, %v1988_v39  ;;  %v2153_v44 = vld [vmem:[#allocation8 + $0xc4] sm:$0xf0]  ;;  %v336_v46 = vld [vmem:[%s2642_s14 + $0xa0] sm:$0xff]  ;;  %v339_v49 = vld [vmem:[%s2642_s14 + $0xb8] sm:$0xff] }
  0x7d   : > { %1348 = vmatpush.bf16.msrb.mxu1 %v2069_v61  ;;  %v2053_v45 = vor.u32 %v2153_v44, %v2052_v43  ;;  %v337_v48 = vld [vmem:[%s2642_s14 + $0xa8] sm:$0xff]  ;;  %v390_v50 = vpack.c.bf16 %v338_v47, %v336_v46  ;;  %v340_v52 = vld [vmem:[%s2642_s14 + $0xc0] sm:$0xff]  ;;  %v343_v55 = vld [vmem:[%s2642_s14 + $0xd8] sm:$0xff] }
  0x7e   : > { %1437 = vmatpush.bf16.msrb.mxu2 %v2009_v53  ;;  %v391_v51 = vpack.c.bf16 %v339_v49, %v337_v48  ;;  %v342_v53 = vld [vmem:[%s2642_s14 + $0xd0] sm:$0xff]  ;;  %v341_v54 = vld [vmem:[%s2642_s14 + $0xc8] sm:$0xff]  ;;  %v1982_v59 = vld [vmem:[#allocation8 + $0x38] sm:$0xf0] }
  0x7f   : > { %1526 = vmatpush.bf16.msrb.mxu3 %v2073_v57  ;;  %v392_v56 = vpack.c.bf16 %v342_v53, %v340_v52  ;;  %v393_v57 = vpack.c.bf16 %v343_v55, %v341_v54  ;;  %v2134_v58 = vld [vmem:[#allocation8 + $0x34] sm:$0xf]  ;;  %v2046_v62 = vld [vmem:[#allocation8 + $0xb8] sm:$0xf0]  ;;  %v1980_v5 = vld [vmem:[#allocation8 + $0x30] sm:$0xf] }
  0x80   : > { %1260 = vmatpush.bf16.msrb.mxu0 %v1997_v18  ;;  %v2150_v60 = vld [vmem:[#allocation8 + $0xb4] sm:$0xf]  ;;  %v1985_v61 = vor.u32 %v2134_v58, %v1982_v59  ;;  %v344_v0 = vld [vmem:[%s2642_s14 + $0xe0] sm:$0xff]  ;;  %v2135_v6 = vld [vmem:[#allocation8 + $0x34] sm:$0xf0] }
  0x81   : > { %1349 = vmatpush.bf16.msrb.mxu1 %v2061_v21  ;;  %v2049_v63 = vor.u32 %v2150_v60, %v2046_v62  ;;  %v346_v1 = vld [vmem:[%s2642_s14 + $0xf0] sm:$0xff]  ;;  %v2151_v10 = vld [vmem:[#allocation8 + $0xb4] sm:$0xf0]  ;;  %v314_v12 = vld [vmem:[#allocation7] sm:$0x3] }
  0x82   : > { %1438 = vmatpush.bf16.msrb.mxu2 %v2001_v13  ;;  %v394_v4 = vpack.c.bf16 %v346_v1, %v344_v0  ;;  %v2044_v7 = vld [vmem:[#allocation8 + $0xb0] sm:$0xf]  ;;  %v348_v13 = vld [vmem:[%s2642_s14 + $0x100] sm:$0xff]  ;;  %v2690_v15 = vperm.slane %v314_v12, 0  ;;  %v349_v16 = vld [vmem:[%s2642_s14 + $0x108] sm:$0xff]  ;;  %v2695_v24 = vperm.slane %v314_v12, 1 }
  0x83   : > { %1527 = vmatpush.bf16.msrb.mxu3 %v2065_v17  ;;  %v2045_v11 = vor.u32 %v2151_v10, %v2044_v7  ;;  %v350_v14 = vld [vmem:[%s2642_s14 + $0x110] sm:$0xff]  ;;  %v351_v17 = vld [vmem:[%s2642_s14 + $0x118] sm:$0xff]  ;;  %v2132_v25 = vld [vmem:[#allocation8 + $0x24] sm:$0xf] }
  0x84   : > { %1261 = vmatpush.bf16.msrb.mxu0 %v1989_v42  ;;  %v396_v18 = vpack.c.bf16 %v350_v14, %v348_v13  ;;  %v397_v20 = vpack.c.bf16 %v351_v17, %v349_v16  ;;  %v2148_v28 = vld [vmem:[#allocation8 + $0xa4] sm:$0xf]  ;;  %v2038_v29 = vld [vmem:[#allocation8 + $0xa8] sm:$0xf0]  ;;  %v355_v42 = vld [vmem:[%s2642_s14 + $0x138] sm:$0xff] }
  0x85   : > { %1350 = vmatpush.bf16.msrb.mxu1 %v2053_v45  ;;  %v2041_v31 = vor.u32 %v2148_v28, %v2038_v29  ;;  %v352_v39 = vld [vmem:[%s2642_s14 + $0x120] sm:$0xff]  ;;  %v354_v40 = vld [vmem:[%s2642_s14 + $0x130] sm:$0xff]  ;;  %v2133_v46 = vld [vmem:[#allocation8 + $0x24] sm:$0xf0] }
  0x86   : > { %1439 = vmatpush.bf16.msrb.mxu2 %v1993_v37  ;;  %v1972_v45 = vld [vmem:[#allocation8 + $0x20] sm:$0xf]  ;;  %v2149_v49 = vld [vmem:[#allocation8 + $0xa4] sm:$0xf0]  ;;  %v398_v52 = vpack.c.bf16 %v354_v40, %v352_v39  ;;  %v358_v10 = vld [vmem:[%s2642_s14 + $0x150] sm:$0xff] }
  0x87   : > { %622 = vmatmul.bf16.gmra.mxu0 %v382_v2  ;;  %1528 = vmatpush.bf16.msrb.mxu3 %v2057_v41  ;;  %v353_v41 = vld [vmem:[%s2642_s14 + $0x128] sm:$0xff]  ;;  %v1973_v47 = vor.u32 %v2133_v46, %v1972_v45  ;;  %v2036_v48 = vld [vmem:[#allocation8 + $0xa0] sm:$0xf]  ;;  %v359_v14 = vld [vmem:[%s2642_s14 + $0x158] sm:$0xff] }
  0x88   : > { %711 = vmatmul.bf16.gmra.mxu1 %v383_v3  ;;  %v2037_v53 = vor.u32 %v2149_v49, %v2036_v48  ;;  %v357_v13 = vld [vmem:[%s2642_s14 + $0x148] sm:$0xff]  ;;  %v360_v45 = vld [vmem:[%s2642_s14 + $0x160] sm:$0xff]  ;;  %v362_v46 = vld [vmem:[%s2642_s14 + $0x170] sm:$0xff] }
  0x89   : > { %800 = vmatmul.bf16.gmra.mxu2 %v382_v2  ;;  %v345_v2 = vld [vmem:[%s2642_s14 + $0xe8] sm:$0xff]  ;;  %1351 = vmatpush.bf16.msrb.mxu1 %v2045_v11  ;;  %v363_v48 = vld [vmem:[%s2642_s14 + $0x178] sm:$0xff] }
  0x8a   : > { %889 = vmatmul.bf16.gmra.mxu3 %v383_v3  ;;  %1440 = vmatpush.bf16.msrb.mxu2 %v1985_v61  ;;  %v347_v3 = vld [vmem:[%s2642_s14 + $0xf8] sm:$0xff] }
  0x8b   : > { %1529 = vmatpush.bf16.msrb.mxu3 %v2049_v63 }
  0x8d   : > { %1352 = vmatpush.bf16.msrb.mxu1 %v2037_v53  ;;  %v2131_v53 = vld [vmem:[#allocation8 + $0x14] sm:$0xf0] }
  0x8f   : > { %1530 = vmatpush.bf16.msrb.mxu3 %v2041_v31  ;;  %v1966_v31 = vld [vmem:[#allocation8 + $0x18] sm:$0xf0] }
  0x97   : > { %627 = vmatmul.bf16.gmra.mxu0 %v384_v8 }
  0x98   : > { %716 = vmatmul.bf16.gmra.mxu1 %v385_v9 }
  0x99   : > { %805 = vmatmul.bf16.gmra.mxu2 %v384_v8  ;;  %v395_v8 = vpack.c.bf16 %v347_v3, %v345_v2 }
  0x9a   : > { %894 = vmatmul.bf16.gmra.mxu3 %v385_v9  ;;  %v1981_v9 = vor.u32 %v2135_v6, %v1980_v5 }
  0x9c   : > { %1262 = vmatpush.bf16.msrb.mxu0 %v1981_v9  ;;  %v356_v9 = vld [vmem:[%s2642_s14 + $0x140] sm:$0xff] }
  0x9d   : > { %v400_v17 = vpack.c.bf16 %v358_v10, %v356_v9 }
  0xa0   : > { %1263 = vmatpush.bf16.msrb.mxu0 %v1973_v47  ;;  %v361_v47 = vld [vmem:[%s2642_s14 + $0x168] sm:$0xff] }
  0xa7   : > { %632 = vmatmul.bf16.gmra.mxu0 %v386_v26 }
  0xa8   : > { %721 = vmatmul.bf16.gmra.mxu1 %v387_v27 }
  0xa9   : > { %810 = vmatmul.bf16.gmra.mxu2 %v386_v26  ;;  %v1974_v26 = vld [vmem:[#allocation8 + $0x28] sm:$0xf0] }
  0xaa   : > { %899 = vmatmul.bf16.gmra.mxu3 %v387_v27  ;;  %v1977_v27 = vor.u32 %v2132_v25, %v1974_v26 }
  0xac   : > { %1441 = vmatpush.bf16.msrb.mxu2 %v1977_v27 }
  0xb7   : > { %637 = vmatmul.bf16.gmra.mxu0 %v388_v32 }
  0xb8   : > { %726 = vmatmul.bf16.gmra.mxu1 %v389_v33 }
  0xb9   : > { %815 = vmatmul.bf16.gmra.mxu2 %v388_v32 }
  0xba   : > { %904 = vmatmul.bf16.gmra.mxu3 %v389_v33 }
  0xc7   : > { %642 = vmatmul.bf16.gmra.mxu0 %v390_v50 }
  0xc8   : > { %731 = vmatmul.bf16.gmra.mxu1 %v391_v51 }
  0xc9   : > { %820 = vmatmul.bf16.gmra.mxu2 %v390_v50 }
  0xca   : > { %909 = vmatmul.bf16.gmra.mxu3 %v391_v51 }
  0xd7   : > { %647 = vmatmul.bf16.gmra.mxu0 %v392_v56 }
  0xd8   : > { %736 = vmatmul.bf16.gmra.mxu1 %v393_v57 }
  0xd9   : > { %825 = vmatmul.bf16.gmra.mxu2 %v392_v56 }
  0xda   : > { %914 = vmatmul.bf16.gmra.mxu3 %v393_v57  ;;  %v399_v57 = vpack.c.bf16 %v355_v42, %v353_v41 }
  0xe7   : > { %652 = vmatmul.bf16.gmra.mxu0 %v394_v4 }
  0xe8   : > { %741 = vmatmul.bf16.gmra.mxu1 %v395_v8 }
  0xe9   : > { %830 = vmatmul.bf16.gmra.mxu2 %v394_v4 }
  0xea   : > { %919 = vmatmul.bf16.gmra.mxu3 %v395_v8 }
  0xf4   : > { %v618_v19 = vpop.f32.mrf.mxu0 }
  0xf5   : > { %v619_v21 = vadd.f32 %v618_v19, %v2690_v15  ;;  %v707_v22 = vpop.f32.mrf.mxu1 }
  0xf7   : > { %v708_v23 = vadd.f32 %v707_v22, %v619_v21  ;;  %657 = vmatmul.bf16.gmra.mxu0 %v396_v18  ;;  %v401_v22 = vpack.c.bf16 %v359_v14, %v357_v13 }
  0xf8   : > { %746 = vmatmul.bf16.gmra.mxu1 %v397_v20 }
  0xf9   : > { %835 = vmatmul.bf16.gmra.mxu2 %v396_v18  ;;  %v965_v43 = vmax.f32 %v708_v23, 0.0 }
  0xfa   : > { %924 = vmatmul.bf16.gmra.mxu3 %v397_v20 }
  0xfc   : > { %v796_v30 = vpop.f32.mrf.mxu2  ;;  %v620_v34 = vpop.f32.mrf.mxu0 }
  0xfd   : > { %v797_v32 = vadd.f32 %v796_v30, %v2695_v24  ;;  %v885_v33 = vpop.f32.mrf.mxu3  ;;  %v621_v35 = vadd.f32 %v620_v34, %v2690_v15  ;;  %v709_v36 = vpop.f32.mrf.mxu1  ;;  %v2130_v30 = vld [vmem:[#allocation8 + $0x14] sm:$0xf]  ;;  %v2030_v34 = vld [vmem:[#allocation8 + $0x98] sm:$0xf0] }
  0xff   : > { %v886_v37 = vadd.f32 %v885_v33, %v797_v32  ;;  %v710_v38 = vadd.f32 %v709_v36, %v621_v35  ;;  %v1969_v32 = vor.u32 %v2130_v30, %v1966_v31  ;;  %v2146_v33 = vld [vmem:[#allocation8 + $0x94] sm:$0xf] }
 0x101   : > { %v967_v44 = vmax.f32 %v710_v38, 0.0  ;;  %v966_v62 = vmax.f32 %v886_v37, 0.0  ;;  %v2033_v37 = vor.u32 %v2146_v33, %v2030_v34  ;;  %1442 = vmatpush.bf16.msrb.mxu2 %v1969_v32 }
 0x103   : > { %v2703_v50 = vpack.c.bf16 %v967_v44, %v965_v43  ;;  %1531 = vmatpush.bf16.msrb.mxu3 %v2033_v37 }
 0x104   : > { %v798_v51 = vpop.f32.mrf.mxu2  ;;  %v623_v56 = vpop.f32.mrf.mxu0 }
 0x105   : > { %v799_v54 = vadd.f32 %v798_v51, %v2695_v24  ;;  %v887_v55 = vpop.f32.mrf.mxu3  ;;  %v624_v58 = vadd.f32 %v623_v56, %v2690_v15  ;;  %v712_v59 = vpop.f32.mrf.mxu1  ;;  %v2147_v56 = vld [vmem:[#allocation8 + $0x94] sm:$0xf0] }
 0x107   : > { %v888_v60 = vadd.f32 %v887_v55, %v799_v54  ;;  %v713_v61 = vadd.f32 %v712_v59, %v624_v58  ;;  %662 = vmatmul.bf16.gmra.mxu0 %v398_v52  ;;  %v2028_v55 = vld [vmem:[#allocation8 + $0x90] sm:$0xf]  ;;  %v402_v58 = vpack.c.bf16 %v362_v46, %v360_v45 }
 0x108   : > { %751 = vmatmul.bf16.gmra.mxu1 %v399_v57  ;;  %v2029_v59 = vor.u32 %v2147_v56, %v2028_v55  ;;  %v368_v56 = vld [vmem:[%s2642_s14 + $0x1a0] sm:$0xff] }
 0x109   : > { %v968_v63 = vmax.f32 %v888_v60, 0.0  ;;  %840 = vmatmul.bf16.gmra.mxu2 %v398_v52  ;;  %v969_v11 = vmax.f32 %v713_v61, 0.0  ;;  %v1964_v52 = vld [vmem:[#allocation8 + $0x10] sm:$0xf] }
 0x10a   : > { %929 = vmatmul.bf16.gmra.mxu3 %v399_v57  ;;  %v1965_v54 = vor.u32 %v2131_v53, %v1964_v52  ;;  %1353 = vmatpush.bf16.msrb.mxu1 %v2029_v59  ;;  %v371_v59 = vld [vmem:[%s2642_s14 + $0x1b8] sm:$0xff] }
 0x10b   : > { %v2707_v0 = vpack.c.bf16 %v968_v63, %v966_v62 }
 0x10c   : > { %v801_v1 = vpop.f32.mrf.mxu2  ;;  %v625_v4 = vpop.f32.mrf.mxu0  ;;  %1264 = vmatpush.bf16.msrb.mxu0 %v1965_v54 }
 0x10d   : > { %v802_v2 = vadd.f32 %v801_v1, %v2695_v24  ;;  %v890_v3 = vpop.f32.mrf.mxu3  ;;  %v626_v5 = vadd.f32 %v625_v4, %v2690_v15  ;;  %v714_v6 = vpop.f32.mrf.mxu1  ;;  %v403_v1 = vpack.c.bf16 %v363_v48, %v361_v47 }
 0x10f   : > { %v891_v7 = vadd.f32 %v890_v3, %v802_v2  ;;  %v715_v8 = vadd.f32 %v714_v6, %v626_v5 }
 0x111   : > { %v971_v12 = vmax.f32 %v715_v8, 0.0  ;;  %v970_v28 = vmax.f32 %v891_v7, 0.0 }
 0x113   : > { %v2715_v18 = vpack.c.bf16 %v971_v12, %v969_v11 }
 0x114   : > { %v803_v16 = vpop.f32.mrf.mxu2  ;;  %v628_v21 = vpop.f32.mrf.mxu0 }
 0x115   : > { %v804_v19 = vadd.f32 %v803_v16, %v2695_v24  ;;  %v892_v20 = vpop.f32.mrf.mxu3  ;;  %v629_v23 = vadd.f32 %v628_v21, %v2690_v15  ;;  %v717_v25 = vpop.f32.mrf.mxu1 }
 0x117   : > { %v893_v26 = vadd.f32 %v892_v20, %v804_v19  ;;  %v718_v27 = vadd.f32 %v717_v25, %v629_v23  ;;  %667 = vmatmul.bf16.gmra.mxu0 %v400_v17  ;;  %v364_v19 = vld [vmem:[%s2642_s14 + $0x180] sm:$0xff]  ;;  %v366_v20 = vld [vmem:[%s2642_s14 + $0x190] sm:$0xff]  ;;  %v365_v23 = vld [vmem:[%s2642_s14 + $0x188] sm:$0xff] }
 0x118   : > { %756 = vmatmul.bf16.gmra.mxu1 %v401_v22  ;;  %v367_v25 = vld [vmem:[%s2642_s14 + $0x198] sm:$0xff] }
 0x119   : > { %v972_v29 = vmax.f32 %v893_v26, 0.0  ;;  %845 = vmatmul.bf16.gmra.mxu2 %v400_v17  ;;  %v973_v49 = vmax.f32 %v718_v27, 0.0  ;;  %v404_v27 = vpack.c.bf16 %v366_v20, %v364_v19  ;;  %v405_v32 = vpack.c.bf16 %v367_v25, %v365_v23 }
 0x11a   : > { %934 = vmatmul.bf16.gmra.mxu3 %v401_v22 }
 0x11b   : > { %v2719_v35 = vpack.c.bf16 %v972_v29, %v970_v28 }
 0x11c   : > { %v806_v36 = vpop.f32.mrf.mxu2  ;;  %v630_v40 = vpop.f32.mrf.mxu0 }
 0x11d   : > { %v807_v38 = vadd.f32 %v806_v36, %v2695_v24  ;;  %v895_v39 = vpop.f32.mrf.mxu3  ;;  %v631_v41 = vadd.f32 %v630_v40, %v2690_v15  ;;  %v719_v42 = vpop.f32.mrf.mxu1  ;;  %v2128_v40 = vld [vmem:[#allocation8 + $0x4] sm:$0xf] }
 0x11f   : > { %v896_v43 = vadd.f32 %v895_v39, %v807_v38  ;;  %v720_v44 = vadd.f32 %v719_v42, %v631_v41  ;;  %v1958_v41 = vld [vmem:[#allocation8 + $0x8] sm:$0xf0] }
 0x120   : > { %v1961_v42 = vor.u32 %v2128_v40, %v1958_v41 }
 0x121   : > { %v975_v51 = vmax.f32 %v720_v44, 0.0  ;;  %v974_v6 = vmax.f32 %v896_v43, 0.0  ;;  %v2144_v43 = vld [vmem:[#allocation8 + $0x84] sm:$0xf]  ;;  %v2022_v44 = vld [vmem:[#allocation8 + $0x88] sm:$0xf0] }
 0x122   : > { %v2025_v47 = vor.u32 %v2144_v43, %v2022_v44  ;;  %1443 = vmatpush.bf16.msrb.mxu2 %v1961_v42 }
 0x123   : > { %v2727_v60 = vpack.c.bf16 %v975_v51, %v973_v49 }
 0x124   : > { %v808_v57 = vpop.f32.mrf.mxu2  ;;  %v633_v63 = vpop.f32.mrf.mxu0  ;;  %1532 = vmatpush.bf16.msrb.mxu3 %v2025_v47 }
 0x125   : > { %v809_v61 = vadd.f32 %v808_v57, %v2695_v24  ;;  %v897_v62 = vpop.f32.mrf.mxu3  ;;  %v634_v2 = vadd.f32 %v633_v63, %v2690_v15  ;;  %v722_v3 = vpop.f32.mrf.mxu1  ;;  %v370_v57 = vld [vmem:[%s2642_s14 + $0x1b0] sm:$0xff]  ;;  %v1956_v63 = vld [vmem:[#allocation8] sm:$0xf] }
 0x127   : > { %v898_v4 = vadd.f32 %v897_v62, %v809_v61  ;;  %v723_v5 = vadd.f32 %v722_v3, %v634_v2  ;;  %672 = vmatmul.bf16.gmra.mxu0 %v402_v58  ;;  %v2020_v3 = vld [vmem:[#allocation8 + $0x80] sm:$0xf] }
 0x128   : > { %761 = vmatmul.bf16.gmra.mxu1 %v403_v1 }
 0x129   : > { %v976_v7 = vmax.f32 %v898_v4, 0.0  ;;  %850 = vmatmul.bf16.gmra.mxu2 %v402_v58  ;;  %v977_v21 = vmax.f32 %v723_v5, 0.0  ;;  %v369_v58 = vld [vmem:[%s2642_s14 + $0x1a8] sm:$0xff] }
 0x12a   : > { %939 = vmatmul.bf16.gmra.mxu3 %v403_v1  ;;  %v2129_v1 = vld [vmem:[#allocation8 + $0x4] sm:$0xf0] }
 0x12b   : > { %v2731_v8 = vpack.c.bf16 %v976_v7, %v974_v6  ;;  %v1957_v2 = vor.u32 %v2129_v1, %v1956_v63  ;;  %v2145_v4 = vld [vmem:[#allocation8 + $0x84] sm:$0xf0]  ;;  %v406_v6 = vpack.c.bf16 %v370_v57, %v368_v56 }
 0x12c   : > { %v811_v9 = vpop.f32.mrf.mxu2  ;;  %v635_v12 = vpop.f32.mrf.mxu0  ;;  %v2021_v7 = vor.u32 %v2145_v4, %v2020_v3  ;;  %v378_v3 = vld [vmem:[%s2642_s14 + $0x1f0] sm:$0xff] }
 0x12d   : > { %v812_v10 = vadd.f32 %v811_v9, %v2695_v24  ;;  %v900_v11 = vpop.f32.mrf.mxu3  ;;  %v636_v13 = vadd.f32 %v635_v12, %v2690_v15  ;;  %v724_v14 = vpop.f32.mrf.mxu1  ;;  %1265 = vmatpush.bf16.msrb.mxu0 %v1957_v2  ;;  %v376_v2 = vld [vmem:[%s2642_s14 + $0x1e0] sm:$0xff] }
 0x12e   : > { %1354 = vmatpush.bf16.msrb.mxu1 %v2021_v7  ;;  %v379_v7 = vld [vmem:[%s2642_s14 + $0x1f8] sm:$0xff] }
 0x12f   : > { %v901_v16 = vadd.f32 %v900_v11, %v812_v10  ;;  %v725_v17 = vadd.f32 %v724_v14, %v636_v13  ;;  %v407_v13 = vpack.c.bf16 %v371_v59, %v369_v58 }
 0x131   : > { %v979_v22 = vmax.f32 %v725_v17, 0.0  ;;  %v978_v38 = vmax.f32 %v901_v16, 0.0 }
 0x133   : > { %v2739_v28 = vpack.c.bf16 %v979_v22, %v977_v21 }
 0x134   : > { %v813_v26 = vpop.f32.mrf.mxu2  ;;  %v638_v31 = vpop.f32.mrf.mxu0 }
 0x135   : > { %v814_v29 = vadd.f32 %v813_v26, %v2695_v24  ;;  %v902_v30 = vpop.f32.mrf.mxu3  ;;  %v639_v33 = vadd.f32 %v638_v31, %v2690_v15  ;;  %v727_v34 = vpop.f32.mrf.mxu1 }
 0x137   : > { %v903_v36 = vadd.f32 %v902_v30, %v814_v29  ;;  %v728_v37 = vadd.f32 %v727_v34, %v639_v33  ;;  %677 = vmatmul.bf16.gmra.mxu0 %v404_v27  ;;  %v372_v33 = vld [vmem:[%s2642_s14 + $0x1c0] sm:$0xff]  ;;  %v374_v34 = vld [vmem:[%s2642_s14 + $0x1d0] sm:$0xff] }
 0x138   : > { %766 = vmatmul.bf16.gmra.mxu1 %v405_v32  ;;  %v408_v41 = vpack.c.bf16 %v374_v34, %v372_v33 }
 0x139   : > { %v980_v39 = vmax.f32 %v903_v36, 0.0  ;;  %855 = vmatmul.bf16.gmra.mxu2 %v404_v27  ;;  %v981_v61 = vmax.f32 %v728_v37, 0.0 }
 0x13a   : > { %944 = vmatmul.bf16.gmra.mxu3 %v405_v32 }
 0x13b   : > { %v2743_v45 = vpack.c.bf16 %v980_v39, %v978_v38  ;;  %v373_v38 = vld [vmem:[%s2642_s14 + $0x1c8] sm:$0xff]  ;;  %v375_v39 = vld [vmem:[%s2642_s14 + $0x1d8] sm:$0xff] }
 0x13c   : > { %v816_v46 = vpop.f32.mrf.mxu2  ;;  %v640_v51 = vpop.f32.mrf.mxu0  ;;  %v409_v47 = vpack.c.bf16 %v375_v39, %v373_v38 }
 0x13d   : > { %v817_v48 = vadd.f32 %v816_v46, %v2695_v24  ;;  %v905_v49 = vpop.f32.mrf.mxu3  ;;  %v641_v52 = vadd.f32 %v640_v51, %v2690_v15  ;;  %v729_v53 = vpop.f32.mrf.mxu1 }
 0x13f   : > { %v906_v54 = vadd.f32 %v905_v49, %v817_v48  ;;  %v730_v55 = vadd.f32 %v729_v53, %v641_v52 }
 0x141   : > { %v983_v62 = vmax.f32 %v730_v55, 0.0  ;;  %v982_v20 = vmax.f32 %v906_v54, 0.0 }
 0x143   : > { %v2751_v9 = vpack.c.bf16 %v983_v62, %v981_v61 }
 0x144   : > { %v818_v5 = vpop.f32.mrf.mxu2  ;;  %v643_v12 = vpop.f32.mrf.mxu0 }
 0x145   : > { %v819_v10 = vadd.f32 %v818_v5, %v2695_v24  ;;  %v907_v11 = vpop.f32.mrf.mxu3  ;;  %v644_v14 = vadd.f32 %v643_v12, %v2690_v15  ;;  %v732_v16 = vpop.f32.mrf.mxu1 }
 0x147   : > { %v908_v17 = vadd.f32 %v907_v11, %v819_v10  ;;  %v733_v19 = vadd.f32 %v732_v16, %v644_v14  ;;  %682 = vmatmul.bf16.gmra.mxu0 %v406_v6  ;;  %v410_v11 = vpack.c.bf16 %v378_v3, %v376_v2 }
 0x148   : > { %771 = vmatmul.bf16.gmra.mxu1 %v407_v13 }
 0x149   : > { %v984_v21 = vmax.f32 %v908_v17, 0.0  ;;  %860 = vmatmul.bf16.gmra.mxu2 %v406_v6  ;;  %v985_v36 = vmax.f32 %v733_v19, 0.0  ;;  %v377_v6 = vld [vmem:[%s2642_s14 + $0x1e8] sm:$0xff] }
 0x14a   : > { %949 = vmatmul.bf16.gmra.mxu3 %v407_v13  ;;  %v411_v17 = vpack.c.bf16 %v379_v7, %v377_v6 }
 0x14b   : > { %v2755_v22 = vpack.c.bf16 %v984_v21, %v982_v20 }
 0x14c   : > { %v821_v23 = vpop.f32.mrf.mxu2  ;;  %v645_v27 = vpop.f32.mrf.mxu0 }
 0x14d   : > { %v822_v25 = vadd.f32 %v821_v23, %v2695_v24  ;;  %v910_v26 = vpop.f32.mrf.mxu3  ;;  %v646_v29 = vadd.f32 %v645_v27, %v2690_v15  ;;  %v734_v30 = vpop.f32.mrf.mxu1 }
 0x14f   : > { %v911_v31 = vadd.f32 %v910_v26, %v822_v25  ;;  %v735_v32 = vadd.f32 %v734_v30, %v646_v29 }
 0x151   : > { %v987_v37 = vmax.f32 %v735_v32, 0.0  ;;  %v986_v53 = vmax.f32 %v911_v31, 0.0 }
 0x153   : > { %v2763_v42 = vpack.c.bf16 %v987_v37, %v985_v36 }
 0x154   : > { %v823_v40 = vpop.f32.mrf.mxu2  ;;  %v648_v46 = vpop.f32.mrf.mxu0 }
 0x155   : > { %v824_v43 = vadd.f32 %v823_v40, %v2695_v24  ;;  %v912_v44 = vpop.f32.mrf.mxu3  ;;  %v649_v48 = vadd.f32 %v648_v46, %v2690_v15  ;;  %v737_v49 = vpop.f32.mrf.mxu1 }
 0x157   : > { %v913_v51 = vadd.f32 %v912_v44, %v824_v43  ;;  %v738_v52 = vadd.f32 %v737_v49, %v649_v48  ;;  %687 = vmatmul.bf16.gmra.mxu0 %v408_v41 }
 0x158   : > { %776 = vmatmul.bf16.gmra.mxu1 %v409_v47 }
 0x159   : > { %v988_v54 = vmax.f32 %v913_v51, 0.0  ;;  %865 = vmatmul.bf16.gmra.mxu2 %v408_v41  ;;  %v989_v4 = vmax.f32 %v738_v52, 0.0 }
 0x15a   : > { %954 = vmatmul.bf16.gmra.mxu3 %v409_v47 }
 0x15b   : > { %v2767_v55 = vpack.c.bf16 %v988_v54, %v986_v53 }
 0x15c   : > { %v826_v56 = vpop.f32.mrf.mxu2  ;;  %v650_v59 = vpop.f32.mrf.mxu0 }
 0x15d   : > { %v827_v57 = vadd.f32 %v826_v56, %v2695_v24  ;;  %v915_v58 = vpop.f32.mrf.mxu3  ;;  %v651_v61 = vadd.f32 %v650_v59, %v2690_v15  ;;  %v739_v62 = vpop.f32.mrf.mxu1 }
 0x15f   : > { %v916_v63 = vadd.f32 %v915_v58, %v827_v57  ;;  %v740_v1 = vadd.f32 %v739_v62, %v651_v61 }
 0x161   : > { %v991_v5 = vmax.f32 %v740_v1, 0.0  ;;  %v990_v25 = vmax.f32 %v916_v63, 0.0 }
 0x163   : > { %v2775_v12 = vpack.c.bf16 %v991_v5, %v989_v4 }
 0x164   : > { %v828_v10 = vpop.f32.mrf.mxu2  ;;  %v653_v16 = vpop.f32.mrf.mxu0 }
 0x165   : > { %v829_v13 = vadd.f32 %v828_v10, %v2695_v24  ;;  %v917_v14 = vpop.f32.mrf.mxu3  ;;  %v654_v19 = vadd.f32 %v653_v16, %v2690_v15  ;;  %v742_v20 = vpop.f32.mrf.mxu1 }
 0x167   : > { %v918_v21 = vadd.f32 %v917_v14, %v829_v13  ;;  %v743_v23 = vadd.f32 %v742_v20, %v654_v19  ;;  %692 = vmatmul.bf16.gmra.mxu0 %v410_v11 }
 0x168   : > { %781 = vmatmul.bf16.gmra.mxu1 %v411_v17 }
 0x169   : > { %v992_v26 = vmax.f32 %v918_v21, 0.0  ;;  %870 = vmatmul.bf16.gmra.mxu2 %v410_v11  ;;  %v993_v38 = vmax.f32 %v743_v23, 0.0 }
 0x16a   : > { %959 = vmatmul.bf16.gmra.mxu3 %v411_v17 }
 0x16b   : > { %v2779_v27 = vpack.c.bf16 %v992_v26, %v990_v25 }
 0x16c   : > { %v831_v29 = vpop.f32.mrf.mxu2  ;;  %v655_v32 = vpop.f32.mrf.mxu0 }
 0x16d   : > { %v832_v30 = vadd.f32 %v831_v29, %v2695_v24  ;;  %v920_v31 = vpop.f32.mrf.mxu3  ;;  %v656_v33 = vadd.f32 %v655_v32, %v2690_v15  ;;  %v744_v34 = vpop.f32.mrf.mxu1 }
 0x16f   : > { %v921_v36 = vadd.f32 %v920_v31, %v832_v30  ;;  %v745_v37 = vadd.f32 %v744_v34, %v656_v33 }
 0x171   : > { %v995_v39 = vmax.f32 %v745_v37, 0.0  ;;  %v994_v52 = vmax.f32 %v921_v36, 0.0 }
 0x173   : > { %v2783_v41 = vpack.c.bf16 %v995_v39, %v993_v38 }
 0x174   : > { %v833_v40 = vpop.f32.mrf.mxu2  ;;  %v658_v46 = vpop.f32.mrf.mxu0 }
 0x175   : > { %v834_v43 = vadd.f32 %v833_v40, %v2695_v24  ;;  %v922_v44 = vpop.f32.mrf.mxu3  ;;  %v659_v47 = vadd.f32 %v658_v46, %v2690_v15  ;;  %v747_v48 = vpop.f32.mrf.mxu1 }
 0x177   : > { %v923_v49 = vadd.f32 %v922_v44, %v834_v43  ;;  %v748_v51 = vadd.f32 %v747_v48, %v659_v47  ;;  %1266 = vmatmul.bf16.vlgmr.msrb.gmra.mxu0 %v2703_v50 }
 0x178   : > { %1355 = vmatmul.bf16.vlgmr.msrb.gmra.mxu1 %v2707_v0 }
 0x179   : > { %v996_v53 = vmax.f32 %v923_v49, 0.0  ;;  %1444 = vmatmul.bf16.vlgmr.msrb.gmra.mxu2 %v2703_v50  ;;  %v997_v2 = vmax.f32 %v748_v51, 0.0 }
 0x17a   : > { %1533 = vmatmul.bf16.vlgmr.msrb.gmra.mxu3 %v2707_v0 }
 0x17b   : > { %v2791_v54 = vpack.c.bf16 %v996_v53, %v994_v52 }
 0x17c   : > { %v836_v56 = vpop.f32.mrf.mxu2  ;;  %v660_v59 = vpop.f32.mrf.mxu0 }
 0x17d   : > { %v837_v57 = vadd.f32 %v836_v56, %v2695_v24  ;;  %v925_v58 = vpop.f32.mrf.mxu3  ;;  %v661_v61 = vadd.f32 %v660_v59, %v2690_v15  ;;  %v749_v62 = vpop.f32.mrf.mxu1 }
 0x17f   : > { %v926_v63 = vadd.f32 %v925_v58, %v837_v57  ;;  %v750_v1 = vadd.f32 %v749_v62, %v661_v61 }
 0x181   : > { %v999_v3 = vmax.f32 %v750_v1, 0.0  ;;  %v998_v14 = vmax.f32 %v926_v63, 0.0 }
 0x183   : > { %v2795_v5 = vpack.c.bf16 %v999_v3, %v997_v2 }
 0x184   : > { %v838_v4 = vpop.f32.mrf.mxu2  ;;  %v663_v6 = vpop.f32.mrf.mxu0 }
 0x185   : > { %v839_v50 = vadd.f32 %v838_v4, %v2695_v24  ;;  %v927_v0 = vpop.f32.mrf.mxu3  ;;  %v664_v7 = vadd.f32 %v663_v6, %v2690_v15  ;;  %v752_v10 = vpop.f32.mrf.mxu1 }
 0x187   : > { %v928_v11 = vadd.f32 %v927_v0, %v839_v50  ;;  %v753_v13 = vadd.f32 %v752_v10, %v664_v7  ;;  %1271 = vmatmul.bf16.gmra.mxu0 %v2715_v18 }
 0x188   : > { %1360 = vmatmul.bf16.gmra.mxu1 %v2719_v35 }
 0x189   : > { %v1000_v16 = vmax.f32 %v928_v11, 0.0  ;;  %1449 = vmatmul.bf16.gmra.mxu2 %v2715_v18  ;;  %v1001_v31 = vmax.f32 %v753_v13, 0.0 }
 0x18a   : > { %1538 = vmatmul.bf16.gmra.mxu3 %v2719_v35 }
 0x18b   : > { %v2803_v17 = vpack.c.bf16 %v1000_v16, %v998_v14 }
 0x18c   : > { %v841_v19 = vpop.f32.mrf.mxu2  ;;  %v665_v23 = vpop.f32.mrf.mxu0 }
 0x18d   : > { %v842_v20 = vadd.f32 %v841_v19, %v2695_v24  ;;  %v930_v21 = vpop.f32.mrf.mxu3  ;;  %v666_v25 = vadd.f32 %v665_v23, %v2690_v15  ;;  %v754_v26 = vpop.f32.mrf.mxu1 }
 0x18f   : > { %v931_v29 = vadd.f32 %v930_v21, %v842_v20  ;;  %v755_v30 = vadd.f32 %v754_v26, %v666_v25 }
 0x191   : > { %v1003_v32 = vmax.f32 %v755_v30, 0.0  ;;  %v1002_v43 = vmax.f32 %v931_v29, 0.0 }
 0x193   : > { %v2807_v34 = vpack.c.bf16 %v1003_v32, %v1001_v31 }
 0x194   : > { %v843_v33 = vpop.f32.mrf.mxu2  ;;  %v668_v36 = vpop.f32.mrf.mxu0 }
 0x195   : > { %v844_v18 = vadd.f32 %v843_v33, %v2695_v24  ;;  %v932_v35 = vpop.f32.mrf.mxu3  ;;  %v669_v37 = vadd.f32 %v668_v36, %v2690_v15  ;;  %v757_v38 = vpop.f32.mrf.mxu1 }
 0x197   : > { %v933_v39 = vadd.f32 %v932_v35, %v844_v18  ;;  %v758_v40 = vadd.f32 %v757_v38, %v669_v37  ;;  %1276 = vmatmul.bf16.gmra.mxu0 %v2727_v60 }
 0x198   : > { %1365 = vmatmul.bf16.gmra.mxu1 %v2731_v8 }
 0x199   : > { %v1004_v44 = vmax.f32 %v933_v39, 0.0  ;;  %1454 = vmatmul.bf16.gmra.mxu2 %v2727_v60  ;;  %v1005_v58 = vmax.f32 %v758_v40, 0.0 }
 0x19a   : > { %1543 = vmatmul.bf16.gmra.mxu3 %v2731_v8 }
 0x19b   : > { %v2815_v46 = vpack.c.bf16 %v1004_v44, %v1002_v43 }
 0x19c   : > { %v846_v47 = vpop.f32.mrf.mxu2  ;;  %v670_v51 = vpop.f32.mrf.mxu0 }
 0x19d   : > { %v847_v48 = vadd.f32 %v846_v47, %v2695_v24  ;;  %v935_v49 = vpop.f32.mrf.mxu3  ;;  %v671_v52 = vadd.f32 %v670_v51, %v2690_v15  ;;  %v759_v53 = vpop.f32.mrf.mxu1 }
 0x19f   : > { %v936_v56 = vadd.f32 %v935_v49, %v847_v48  ;;  %v760_v57 = vadd.f32 %v759_v53, %v671_v52 }
 0x1a1   : > { %v1007_v59 = vmax.f32 %v760_v57, 0.0  ;;  %v1006_v50 = vmax.f32 %v936_v56, 0.0 }
 0x1a3   : > { %v2819_v62 = vpack.c.bf16 %v1007_v59, %v1005_v58 }
 0x1a4   : > { %v848_v61 = vpop.f32.mrf.mxu2  ;;  %v673_v63 = vpop.f32.mrf.mxu0 }
 0x1a5   : > { %v849_v60 = vadd.f32 %v848_v61, %v2695_v24  ;;  %v937_v8 = vpop.f32.mrf.mxu3  ;;  %v674_v1 = vadd.f32 %v673_v63, %v2690_v15  ;;  %v762_v2 = vpop.f32.mrf.mxu1 }
 0x1a7   : > { %v938_v3 = vadd.f32 %v937_v8, %v849_v60  ;;  %v763_v4 = vadd.f32 %v762_v2, %v674_v1  ;;  %1281 = vmatmul.bf16.gmra.mxu0 %v2739_v28 }
 0x1a8   : > { %1370 = vmatmul.bf16.gmra.mxu1 %v2743_v45 }
 0x1a9   : > { %v1008_v0 = vmax.f32 %v938_v3, 0.0  ;;  %1459 = vmatmul.bf16.gmra.mxu2 %v2739_v28  ;;  %v1009_v21 = vmax.f32 %v763_v4, 0.0 }
 0x1aa   : > { %1548 = vmatmul.bf16.gmra.mxu3 %v2743_v45 }
 0x1ab   : > { %v2827_v6 = vpack.c.bf16 %v1008_v0, %v1006_v50 }
 0x1ac   : > { %v851_v7 = vpop.f32.mrf.mxu2  ;;  %v675_v13 = vpop.f32.mrf.mxu0 }
 0x1ad   : > { %v852_v10 = vadd.f32 %v851_v7, %v2695_v24  ;;  %v940_v11 = vpop.f32.mrf.mxu3  ;;  %v676_v14 = vadd.f32 %v675_v13, %v2690_v15  ;;  %v764_v16 = vpop.f32.mrf.mxu1 }
 0x1af   : > { %v941_v19 = vadd.f32 %v940_v11, %v852_v10  ;;  %v765_v20 = vadd.f32 %v764_v16, %v676_v14 }
 0x1b1   : > { %v1011_v23 = vmax.f32 %v765_v20, 0.0  ;;  %v1010_v18 = vmax.f32 %v941_v19, 0.0 }
 0x1b3   : > { %v2831_v26 = vpack.c.bf16 %v1011_v23, %v1009_v21 }
 0x1b4   : > { %v853_v25 = vpop.f32.mrf.mxu2  ;;  %v678_v29 = vpop.f32.mrf.mxu0 }
 0x1b5   : > { %v854_v28 = vadd.f32 %v853_v25, %v2695_v24  ;;  %v942_v45 = vpop.f32.mrf.mxu3  ;;  %v679_v30 = vadd.f32 %v678_v29, %v2690_v15  ;;  %v767_v31 = vpop.f32.mrf.mxu1 }
 0x1b7   : > { %v943_v32 = vadd.f32 %v942_v45, %v854_v28  ;;  %v768_v33 = vadd.f32 %v767_v31, %v679_v30  ;;  %1286 = vmatmul.bf16.gmra.mxu0 %v2751_v9 }
 0x1b8   : > { %1375 = vmatmul.bf16.gmra.mxu1 %v2755_v22 }
 0x1b9   : > { %v1012_v35 = vmax.f32 %v943_v32, 0.0  ;;  %1464 = vmatmul.bf16.gmra.mxu2 %v2751_v9  ;;  %v1013_v49 = vmax.f32 %v768_v33, 0.0 }
 0x1ba   : > { %1553 = vmatmul.bf16.gmra.mxu3 %v2755_v22 }
 0x1bb   : > { %v2839_v36 = vpack.c.bf16 %v1012_v35, %v1010_v18 }
 0x1bc   : > { %v856_v37 = vpop.f32.mrf.mxu2  ;;  %v680_v40 = vpop.f32.mrf.mxu0 }
 0x1bd   : > { %v857_v38 = vadd.f32 %v856_v37, %v2695_v24  ;;  %v945_v39 = vpop.f32.mrf.mxu3  ;;  %v681_v43 = vadd.f32 %v680_v40, %v2690_v15  ;;  %v769_v44 = vpop.f32.mrf.mxu1 }
 0x1bf   : > { %v946_v47 = vadd.f32 %v945_v39, %v857_v38  ;;  %v770_v48 = vadd.f32 %v769_v44, %v681_v43 }
 0x1c1   : > { %v1015_v51 = vmax.f32 %v770_v48, 0.0  ;;  %v1014_v60 = vmax.f32 %v946_v47, 0.0 }
 0x1c3   : > { %v2843_v53 = vpack.c.bf16 %v1015_v51, %v1013_v49 }
 0x1c4   : > { %v858_v52 = vpop.f32.mrf.mxu2  ;;  %v683_v56 = vpop.f32.mrf.mxu0 }
 0x1c5   : > { %v859_v9 = vadd.f32 %v858_v52, %v2695_v24  ;;  %v947_v22 = vpop.f32.mrf.mxu3  ;;  %v684_v57 = vadd.f32 %v683_v56, %v2690_v15  ;;  %v772_v58 = vpop.f32.mrf.mxu1 }
 0x1c7   : > { %v948_v59 = vadd.f32 %v947_v22, %v859_v9  ;;  %v773_v61 = vadd.f32 %v772_v58, %v684_v57  ;;  %1291 = vmatmul.bf16.gmra.mxu0 %v2763_v42 }
 0x1c8   : > { %1380 = vmatmul.bf16.gmra.mxu1 %v2767_v55 }
 0x1c9   : > { %v1016_v8 = vmax.f32 %v948_v59, 0.0  ;;  %1469 = vmatmul.bf16.gmra.mxu2 %v2763_v42  ;;  %v1017_v11 = vmax.f32 %v773_v61, 0.0 }
 0x1ca   : > { %1558 = vmatmul.bf16.gmra.mxu3 %v2767_v55 }
 0x1cb   : > { %v2851_v63 = vpack.c.bf16 %v1016_v8, %v1014_v60 }
 0x1cc   : > { %v861_v1 = vpop.f32.mrf.mxu2  ;;  %v685_v4 = vpop.f32.mrf.mxu0 }
 0x1cd   : > { %v862_v2 = vadd.f32 %v861_v1, %v2695_v24  ;;  %v950_v3 = vpop.f32.mrf.mxu3  ;;  %v686_v50 = vadd.f32 %v685_v4, %v2690_v15  ;;  %v774_v0 = vpop.f32.mrf.mxu1 }
 0x1cf   : > { %v951_v7 = vadd.f32 %v950_v3, %v862_v2  ;;  %v775_v10 = vadd.f32 %v774_v0, %v686_v50  ;;  %v315_v2 = vld [vmem:[%s3122_s4] sm:$0x3] }
 0x1d0   : > { %v2882_v50 = vperm.slane %v315_v2, 0 }
 0x1d1   : > { %v1019_v13 = vmax.f32 %v775_v10, 0.0  ;;  %v1018_v28 = vmax.f32 %v951_v7, 0.0 }
 0x1d3   : > { %v2855_v16 = vpack.c.bf16 %v1019_v13, %v1017_v11 }
 0x1d4   : > { %v863_v14 = vpop.f32.mrf.mxu2  ;;  %v688_v19 = vpop.f32.mrf.mxu0 }
 0x1d5   : > { %v864_v42 = vadd.f32 %v863_v14, %v2695_v24  ;;  %v952_v55 = vpop.f32.mrf.mxu3  ;;  %v689_v20 = vadd.f32 %v688_v19, %v2690_v15  ;;  %v777_v21 = vpop.f32.mrf.mxu1 }
 0x1d7   : > { %v953_v23 = vadd.f32 %v952_v55, %v864_v42  ;;  %v778_v25 = vadd.f32 %v777_v21, %v689_v20  ;;  %1296 = vmatmul.bf16.gmra.mxu0 %v2775_v12  ;;  %v2891_v20 = vperm.slane %v315_v2, 1 }
 0x1d8   : > { %1385 = vmatmul.bf16.gmra.mxu1 %v2779_v27 }
 0x1d9   : > { %v1020_v45 = vmax.f32 %v953_v23, 0.0  ;;  %1474 = vmatmul.bf16.gmra.mxu2 %v2775_v12  ;;  %v1021_v39 = vmax.f32 %v778_v25, 0.0 }
 0x1da   : > { %1563 = vmatmul.bf16.gmra.mxu3 %v2779_v27 }
 0x1db   : > { %v2863_v29 = vpack.c.bf16 %v1020_v45, %v1018_v28 }
 0x1dc   : > { %v866_v30 = vpop.f32.mrf.mxu2  ;;  %v690_v33 = vpop.f32.mrf.mxu0 }
 0x1dd   : > { %v867_v31 = vadd.f32 %v866_v30, %v2695_v24  ;;  %v955_v32 = vpop.f32.mrf.mxu3  ;;  %v691_v18 = vadd.f32 %v690_v33, %v2690_v15  ;;  %v779_v35 = vpop.f32.mrf.mxu1 }
 0x1df   : > { %v956_v37 = vadd.f32 %v955_v32, %v867_v31  ;;  %v780_v38 = vadd.f32 %v779_v35, %v691_v18 }
 0x1e1   : > { %v1023_v40 = vmax.f32 %v780_v38, 0.0  ;;  %v1022_v9 = vmax.f32 %v956_v37, 0.0 }
 0x1e3   : > { %v2867_v44 = vpack.c.bf16 %v1023_v40, %v1021_v39 }
 0x1e4   : > { %v868_v43 = vpop.f32.mrf.mxu2  ;;  %v693_v47 = vpop.f32.mrf.mxu0 }
 0x1e5   : > { %v869_v12 = vadd.f32 %v868_v43, %v2695_v24  ;;  %v957_v27 = vpop.f32.mrf.mxu3  ;;  %v694_v48 = vadd.f32 %v693_v47, %v2690_v15  ;;  %v782_v49 = vpop.f32.mrf.mxu1 }
 0x1e7   : > { %v958_v51 = vadd.f32 %v957_v27, %v869_v12  ;;  %v783_v52 = vadd.f32 %v782_v49, %v694_v48  ;;  %1301 = vmatmul.bf16.gmra.mxu0 %v2783_v41 }
 0x1e8   : > { %1390 = vmatmul.bf16.gmra.mxu1 %v2791_v54 }
 0x1e9   : > { %v1024_v22 = vmax.f32 %v958_v51, 0.0  ;;  %1479 = vmatmul.bf16.gmra.mxu2 %v2783_v41  ;;  %v1025_v4 = vmax.f32 %v783_v52, 0.0 }
 0x1ea   : > { %1568 = vmatmul.bf16.gmra.mxu3 %v2791_v54 }
 0x1eb   : > { %v2875_v56 = vpack.c.bf16 %v1024_v22, %v1022_v9 }
 0x1ec   : > { %v871_v57 = vpop.f32.mrf.mxu2  ;;  %v695_v61 = vpop.f32.mrf.mxu0 }
 0x1ed   : > { %v872_v58 = vadd.f32 %v871_v57, %v2695_v24  ;;  %v960_v59 = vpop.f32.mrf.mxu3  ;;  %v696_v60 = vadd.f32 %v695_v61, %v2690_v15  ;;  %v784_v8 = vpop.f32.mrf.mxu1 }
 0x1ef   : > { %v961_v1 = vadd.f32 %v960_v59, %v872_v58  ;;  %v785_v3 = vadd.f32 %v784_v8, %v696_v60 }
 0x1f1   : > { %v1027_v41 = vmax.f32 %v785_v3, 0.0  ;;  %v1026_v55 = vmax.f32 %v961_v1, 0.0 }
 0x1f3   : > { %v2884_v0 = vpack.c.bf16 %v1027_v41, %v1025_v4 }
 0x1f4   : > { %v873_v54 = vpop.f32.mrf.mxu2  ;;  %v1267_v11 = vpop.f32.mrf.mxu0 }
 0x1f5   : > { %v874_v7 = vadd.f32 %v873_v54, %v2695_v24  ;;  %v962_v10 = vpop.f32.mrf.mxu3  ;;  %v1268_v15 = vadd.f32 %v1267_v11, %v2882_v50  ;;  %v1356_v13 = vpop.f32.mrf.mxu1 }
 0x1f7   : > { %v963_v14 = vadd.f32 %v962_v10, %v874_v7  ;;  %v1357_v42 = vadd.f32 %v1356_v13, %v1268_v15  ;;  %1306 = vmatmul.bf16.gmra.mxu0 %v2795_v5 }
 0x1f8   : > { %1395 = vmatmul.bf16.gmra.mxu1 %v2803_v17 }
 0x1f9   : > { %v1028_v19 = vmax.f32 %v963_v14, 0.0  ;;  %1484 = vmatmul.bf16.gmra.mxu2 %v2795_v5  ;;  %1614 = vst [vmem:[%s2895_s26] sm:$0xff] %v1357_v42 }
 0x1fa   : > { %1573 = vmatmul.bf16.gmra.mxu3 %v2803_v17 }
 0x1fb   : > { %v2899_v24 = vpack.c.bf16 %v1028_v19, %v1026_v55 }
 0x1fc   : > { %v1445_v21 = vpop.f32.mrf.mxu2  ;;  %v1269_v28 = vpop.f32.mrf.mxu0 }
 0x1fd   : > { %v1446_v23 = vadd.f32 %v1445_v21, %v2891_v20  ;;  %v1534_v25 = vpop.f32.mrf.mxu3  ;;  %v1270_v5 = vadd.f32 %v1269_v28, %v2882_v50  ;;  %v1358_v45 = vpop.f32.mrf.mxu1 }
 0x1ff   : > { %v1535_v30 = vadd.f32 %v1534_v25, %v1446_v23  ;;  %v1359_v31 = vadd.f32 %v1358_v45, %v1270_v5 }
 0x201   : > { %1615 = vst [vmem:[%s2895_s26 + $0x8] sm:$0xff] %v1535_v30 }
 0x202   : > { %1616 = vst [vmem:[%s2895_s26 + $0x10] sm:$0xff] %v1359_v31 }
 0x204   : > { %v1447_v32 = vpop.f32.mrf.mxu2  ;;  %v1272_v18 = vpop.f32.mrf.mxu0 }
 0x205   : > { %v1448_v33 = vadd.f32 %v1447_v32, %v2891_v20  ;;  %v1536_v17 = vpop.f32.mrf.mxu3  ;;  %v1273_v35 = vadd.f32 %v1272_v18, %v2882_v50  ;;  %v1361_v37 = vpop.f32.mrf.mxu1 }
 0x207   : > { %v1537_v38 = vadd.f32 %v1536_v17, %v1448_v33  ;;  %v1362_v39 = vadd.f32 %v1361_v37, %v1273_v35  ;;  %1311 = vmatmul.bf16.gmra.mxu0 %v2807_v34 }
 0x208   : > { %1400 = vmatmul.bf16.gmra.mxu1 %v2815_v46 }
 0x209   : > { %1617 = vst [vmem:[%s2895_s26 + $0x18] sm:$0xff] %v1537_v38  ;;  %1489 = vmatmul.bf16.gmra.mxu2 %v2807_v34 }
 0x20a   : > { %1618 = vst [vmem:[%s2895_s26 + $0x20] sm:$0xff] %v1362_v39  ;;  %1578 = vmatmul.bf16.gmra.mxu3 %v2815_v46 }
 0x20c   : > { %v1450_v40 = vpop.f32.mrf.mxu2  ;;  %v1274_v27 = vpop.f32.mrf.mxu0 }
 0x20d   : > { %v1451_v43 = vadd.f32 %v1450_v40, %v2891_v20  ;;  %v1539_v12 = vpop.f32.mrf.mxu3  ;;  %v1275_v47 = vadd.f32 %v1274_v27, %v2882_v50  ;;  %v1363_v48 = vpop.f32.mrf.mxu1 }
 0x20f   : > { %v1540_v49 = vadd.f32 %v1539_v12, %v1451_v43  ;;  %v1364_v51 = vadd.f32 %v1363_v48, %v1275_v47 }
 0x211   : > { %1619 = vst [vmem:[%s2895_s26 + $0x28] sm:$0xff] %v1540_v49 }
 0x212   : > { %1620 = vst [vmem:[%s2895_s26 + $0x30] sm:$0xff] %v1364_v51 }
 0x214   : > { %v1452_v52 = vpop.f32.mrf.mxu2  ;;  %v1277_v22 = vpop.f32.mrf.mxu0 }
 0x215   : > { %v1453_v34 = vadd.f32 %v1452_v52, %v2891_v20  ;;  %v1541_v9 = vpop.f32.mrf.mxu3  ;;  %v1278_v46 = vadd.f32 %v1277_v22, %v2882_v50  ;;  %v1366_v57 = vpop.f32.mrf.mxu1 }
 0x217   : > { %v1542_v58 = vadd.f32 %v1541_v9, %v1453_v34  ;;  %v1367_v59 = vadd.f32 %v1366_v57, %v1278_v46  ;;  %1316 = vmatmul.bf16.gmra.mxu0 %v2819_v62 }
 0x218   : > { %1405 = vmatmul.bf16.gmra.mxu1 %v2827_v6 }
 0x219   : > { %1621 = vst [vmem:[%s2895_s26 + $0x38] sm:$0xff] %v1542_v58  ;;  %1494 = vmatmul.bf16.gmra.mxu2 %v2819_v62 }
 0x21a   : > { %1622 = vst [vmem:[%s2895_s26 + $0x40] sm:$0xff] %v1367_v59  ;;  %1583 = vmatmul.bf16.gmra.mxu3 %v2827_v6 }
 0x21c   : > { %v1455_v61 = vpop.f32.mrf.mxu2  ;;  %v1279_v1 = vpop.f32.mrf.mxu0 }
 0x21d   : > { %v1456_v60 = vadd.f32 %v1455_v61, %v2891_v20  ;;  %v1544_v8 = vpop.f32.mrf.mxu3  ;;  %v1280_v2 = vadd.f32 %v1279_v1, %v2882_v50  ;;  %v1368_v3 = vpop.f32.mrf.mxu1 }
 0x21f   : > { %v1545_v4 = vadd.f32 %v1544_v8, %v1456_v60  ;;  %v1369_v41 = vadd.f32 %v1368_v3, %v1280_v2 }
 0x221   : > { %1623 = vst [vmem:[%s2895_s26 + $0x48] sm:$0xff] %v1545_v4 }
 0x222   : > { %1624 = vst [vmem:[%s2895_s26 + $0x50] sm:$0xff] %v1369_v41 }
 0x224   : > { %v1457_v54 = vpop.f32.mrf.mxu2  ;;  %v1282_v10 = vpop.f32.mrf.mxu0 }
 0x225   : > { %v1458_v62 = vadd.f32 %v1457_v54, %v2891_v20  ;;  %v1546_v7 = vpop.f32.mrf.mxu3  ;;  %v1283_v6 = vadd.f32 %v1282_v10, %v2882_v50  ;;  %v1371_v11 = vpop.f32.mrf.mxu1 }
 0x227   : > { %v1547_v15 = vadd.f32 %v1546_v7, %v1458_v62  ;;  %v1372_v13 = vadd.f32 %v1371_v11, %v1283_v6  ;;  %1321 = vmatmul.bf16.gmra.mxu0 %v2831_v26 }
 0x228   : > { %1410 = vmatmul.bf16.gmra.mxu1 %v2839_v36 }
 0x229   : > { %1625 = vst [vmem:[%s2895_s26 + $0x58] sm:$0xff] %v1547_v15  ;;  %1499 = vmatmul.bf16.gmra.mxu2 %v2831_v26 }
 0x22a   : > { %1626 = vst [vmem:[%s2895_s26 + $0x60] sm:$0xff] %v1372_v13  ;;  %1588 = vmatmul.bf16.gmra.mxu3 %v2839_v36 }
 0x22c   : > { %v1460_v14 = vpop.f32.mrf.mxu2  ;;  %v1284_v19 = vpop.f32.mrf.mxu0 }
 0x22d   : > { %v1461_v42 = vadd.f32 %v1460_v14, %v2891_v20  ;;  %v1549_v55 = vpop.f32.mrf.mxu3  ;;  %v1285_v21 = vadd.f32 %v1284_v19, %v2882_v50  ;;  %v1373_v23 = vpop.f32.mrf.mxu1 }
 0x22f   : > { %v1550_v25 = vadd.f32 %v1549_v55, %v1461_v42  ;;  %v1374_v28 = vadd.f32 %v1373_v23, %v1285_v21 }
 0x231   : > { %1627 = vst [vmem:[%s2895_s26 + $0x68] sm:$0xff] %v1550_v25 }
 0x232   : > { %1628 = vst [vmem:[%s2895_s26 + $0x70] sm:$0xff] %v1374_v28 }
 0x234   : > { %v1462_v5 = vpop.f32.mrf.mxu2  ;;  %v1287_v30 = vpop.f32.mrf.mxu0 }
 0x235   : > { %v1463_v26 = vadd.f32 %v1462_v5, %v2891_v20  ;;  %v1551_v45 = vpop.f32.mrf.mxu3  ;;  %v1288_v36 = vadd.f32 %v1287_v30, %v2882_v50  ;;  %v1376_v31 = vpop.f32.mrf.mxu1 }
 0x237   : > { %v1552_v32 = vadd.f32 %v1551_v45, %v1463_v26  ;;  %v1377_v33 = vadd.f32 %v1376_v31, %v1288_v36  ;;  %1326 = vmatmul.bf16.gmra.mxu0 %v2843_v53 }
 0x238   : > { %1415 = vmatmul.bf16.gmra.mxu1 %v2851_v63 }
 0x239   : > { %1629 = vst [vmem:[%s2895_s26 + $0x78] sm:$0xff] %v1552_v32  ;;  %1504 = vmatmul.bf16.gmra.mxu2 %v2843_v53 }
 0x23a   : > { %1630 = vst [vmem:[%s2895_s26 + $0x80] sm:$0xff] %v1377_v33  ;;  %1593 = vmatmul.bf16.gmra.mxu3 %v2851_v63 }
 0x23c   : > { %v1465_v17 = vpop.f32.mrf.mxu2  ;;  %v1289_v37 = vpop.f32.mrf.mxu0 }
 0x23d   : > { %v1466_v18 = vadd.f32 %v1465_v17, %v2891_v20  ;;  %v1554_v35 = vpop.f32.mrf.mxu3  ;;  %v1290_v38 = vadd.f32 %v1289_v37, %v2882_v50  ;;  %v1378_v39 = vpop.f32.mrf.mxu1 }
 0x23f   : > { %v1555_v40 = vadd.f32 %v1554_v35, %v1466_v18  ;;  %v1379_v43 = vadd.f32 %v1378_v39, %v1290_v38 }
 0x241   : > { %1631 = vst [vmem:[%s2895_s26 + $0x88] sm:$0xff] %v1555_v40 }
 0x242   : > { %1632 = vst [vmem:[%s2895_s26 + $0x90] sm:$0xff] %v1379_v43 }
 0x244   : > { %v1467_v12 = vpop.f32.mrf.mxu2  ;;  %v1292_v47 = vpop.f32.mrf.mxu0 }
 0x245   : > { %v1468_v53 = vadd.f32 %v1467_v12, %v2891_v20  ;;  %v1556_v27 = vpop.f32.mrf.mxu3  ;;  %v1293_v63 = vadd.f32 %v1292_v47, %v2882_v50  ;;  %v1381_v48 = vpop.f32.mrf.mxu1 }
 0x247   : > { %v1557_v49 = vadd.f32 %v1556_v27, %v1468_v53  ;;  %v1382_v51 = vadd.f32 %v1381_v48, %v1293_v63  ;;  %1331 = vmatmul.bf16.gmra.mxu0 %v2855_v16 }
 0x248   : > { %1420 = vmatmul.bf16.gmra.mxu1 %v2863_v29 }
 0x249   : > { %1633 = vst [vmem:[%s2895_s26 + $0x98] sm:$0xff] %v1557_v49  ;;  %1509 = vmatmul.bf16.gmra.mxu2 %v2855_v16 }
 0x24a   : > { %1634 = vst [vmem:[%s2895_s26 + $0xa0] sm:$0xff] %v1382_v51  ;;  %1598 = vmatmul.bf16.gmra.mxu3 %v2863_v29 }
 0x24c   : > { %v1470_v52 = vpop.f32.mrf.mxu2  ;;  %v1294_v22 = vpop.f32.mrf.mxu0 }
 0x24d   : > { %v1471_v34 = vadd.f32 %v1470_v52, %v2891_v20  ;;  %v1559_v9 = vpop.f32.mrf.mxu3  ;;  %v1295_v46 = vadd.f32 %v1294_v22, %v2882_v50  ;;  %v1383_v57 = vpop.f32.mrf.mxu1 }
 0x24f   : > { %v1560_v58 = vadd.f32 %v1559_v9, %v1471_v34  ;;  %v1384_v59 = vadd.f32 %v1383_v57, %v1295_v46 }
 0x251   : > { %1635 = vst [vmem:[%s2895_s26 + $0xa8] sm:$0xff] %v1560_v58 }
 0x252   : > { %1636 = vst [vmem:[%s2895_s26 + $0xb0] sm:$0xff] %v1384_v59 }
 0x254   : > { %v1472_v61 = vpop.f32.mrf.mxu2  ;;  %v1297_v8 = vpop.f32.mrf.mxu0 }
 0x255   : > { %v1473_v16 = vadd.f32 %v1472_v61, %v2891_v20  ;;  %v1561_v60 = vpop.f32.mrf.mxu3  ;;  %v1298_v29 = vadd.f32 %v1297_v8, %v2882_v50  ;;  %v1386_v1 = vpop.f32.mrf.mxu1 }
 0x257   : > { %v1562_v2 = vadd.f32 %v1561_v60, %v1473_v16  ;;  %v1387_v3 = vadd.f32 %v1386_v1, %v1298_v29  ;;  %1336 = vmatmul.bf16.gmra.mxu0 %v2867_v44 }
 0x258   : > { %1425 = vmatmul.bf16.gmra.mxu1 %v2875_v56 }
 0x259   : > { %1637 = vst [vmem:[%s2895_s26 + $0xb8] sm:$0xff] %v1562_v2  ;;  %1514 = vmatmul.bf16.gmra.mxu2 %v2867_v44 }
 0x25a   : > { %1638 = vst [vmem:[%s2895_s26 + $0xc0] sm:$0xff] %v1387_v3  ;;  %1603 = vmatmul.bf16.gmra.mxu3 %v2875_v56 }
 0x25c   : > { %v1475_v4 = vpop.f32.mrf.mxu2  ;;  %v1299_v62 = vpop.f32.mrf.mxu0 }
 0x25d   : > { %v1476_v41 = vadd.f32 %v1475_v4, %v2891_v20  ;;  %v1564_v54 = vpop.f32.mrf.mxu3  ;;  %v1300_v7 = vadd.f32 %v1299_v62, %v2882_v50  ;;  %v1388_v10 = vpop.f32.mrf.mxu1 }
 0x25f   : > { %v1565_v6 = vadd.f32 %v1564_v54, %v1476_v41  ;;  %v1389_v11 = vadd.f32 %v1388_v10, %v1300_v7 }
 0x261   : > { %1639 = vst [vmem:[%s2895_s26 + $0xc8] sm:$0xff] %v1565_v6 }
 0x262   : > { %1640 = vst [vmem:[%s2895_s26 + $0xd0] sm:$0xff] %v1389_v11 }
 0x264   : > { %v1477_v15 = vpop.f32.mrf.mxu2  ;;  %v1302_v14 = vpop.f32.mrf.mxu0 }
 0x265   : > { %v1478_v44 = vadd.f32 %v1477_v15, %v2891_v20  ;;  %v1566_v13 = vpop.f32.mrf.mxu3  ;;  %v1303_v56 = vadd.f32 %v1302_v14, %v2882_v50  ;;  %v1391_v42 = vpop.f32.mrf.mxu1 }
 0x267   : > { %v1567_v55 = vadd.f32 %v1566_v13, %v1478_v44  ;;  %v1392_v19 = vadd.f32 %v1391_v42, %v1303_v56  ;;  %1341 = vmatmul.bf16.gmra.mxu0 %v2884_v0 }
 0x268   : > { %1430 = vmatmul.bf16.gmra.mxu1 %v2899_v24 }
 0x269   : > { %1641 = vst [vmem:[%s2895_s26 + $0xd8] sm:$0xff] %v1567_v55  ;;  %1519 = vmatmul.bf16.gmra.mxu2 %v2884_v0 }
 0x26a   : > { %1642 = vst [vmem:[%s2895_s26 + $0xe0] sm:$0xff] %v1392_v19  ;;  %1608 = vmatmul.bf16.gmra.mxu3 %v2899_v24 }
 0x26c   : > { %v1480_v21 = vpop.f32.mrf.mxu2  ;;  %v1304_v28 = vpop.f32.mrf.mxu0 }
 0x26d   : > { %v1481_v23 = vadd.f32 %v1480_v21, %v2891_v20  ;;  %v1569_v25 = vpop.f32.mrf.mxu3  ;;  %v1305_v5 = vadd.f32 %v1304_v28, %v2882_v50  ;;  %v1393_v26 = vpop.f32.mrf.mxu1 }
 0x26f   : > { %v1570_v45 = vadd.f32 %v1569_v25, %v1481_v23  ;;  %v1394_v30 = vadd.f32 %v1393_v26, %v1305_v5 }
 0x271   : > { %1643 = vst [vmem:[%s2895_s26 + $0xe8] sm:$0xff] %v1570_v45 }
 0x272   : > { %1644 = vst [vmem:[%s2895_s26 + $0xf0] sm:$0xff] %v1394_v30 }
 0x274   : > { %v1482_v36 = vpop.f32.mrf.mxu2  ;;  %v1307_v24 = vpop.f32.mrf.mxu0 }
 0x275   : > { %v1483_v0 = vadd.f32 %v1482_v36, %v2891_v20  ;;  %v1571_v31 = vpop.f32.mrf.mxu3  ;;  %v1308_v32 = vadd.f32 %v1307_v24, %v2882_v50  ;;  %v1396_v33 = vpop.f32.mrf.mxu1 }
 0x277   : > { %v1572_v17 = vadd.f32 %v1571_v31, %v1483_v0  ;;  %v1397_v18 = vadd.f32 %v1396_v33, %v1308_v32 }
 0x279   : > { %1645 = vst [vmem:[%s2895_s26 + $0xf8] sm:$0xff] %v1572_v17 }
 0x27a   : > { %1646 = vst [vmem:[%s2895_s26 + $0x100] sm:$0xff] %v1397_v18 }
 0x27c   : > { %v1485_v35 = vpop.f32.mrf.mxu2  ;;  %v1309_v39 = vpop.f32.mrf.mxu0 }
 0x27d   : > { %v1486_v37 = vadd.f32 %v1485_v35, %v2891_v20  ;;  %v1574_v38 = vpop.f32.mrf.mxu3  ;;  %v1310_v40 = vadd.f32 %v1309_v39, %v2882_v50  ;;  %v1398_v43 = vpop.f32.mrf.mxu1 }
 0x27f   : > { %v1575_v12 = vadd.f32 %v1574_v38, %v1486_v37  ;;  %v1399_v53 = vadd.f32 %v1398_v43, %v1310_v40 }
 0x281   : > { %1647 = vst [vmem:[%s2895_s26 + $0x108] sm:$0xff] %v1575_v12 }
 0x282   : > { %1648 = vst [vmem:[%s2895_s26 + $0x110] sm:$0xff] %v1399_v53 }
 0x284   : > { %v1487_v27 = vpop.f32.mrf.mxu2  ;;  %v1312_v48 = vpop.f32.mrf.mxu0 }
 0x285   : > { %v1488_v47 = vadd.f32 %v1487_v27, %v2891_v20  ;;  %v1576_v63 = vpop.f32.mrf.mxu3  ;;  %v1313_v49 = vadd.f32 %v1312_v48, %v2882_v50  ;;  %v1401_v51 = vpop.f32.mrf.mxu1 }
 0x287   : > { %v1577_v52 = vadd.f32 %v1576_v63, %v1488_v47  ;;  %v1402_v34 = vadd.f32 %v1401_v51, %v1313_v49 }
 0x289   : > { %1649 = vst [vmem:[%s2895_s26 + $0x118] sm:$0xff] %v1577_v52 }
 0x28a   : > { %1650 = vst [vmem:[%s2895_s26 + $0x120] sm:$0xff] %v1402_v34 }
 0x28c   : > { %v1490_v9 = vpop.f32.mrf.mxu2  ;;  %v1314_v57 = vpop.f32.mrf.mxu0 }
 0x28d   : > { %v1491_v22 = vadd.f32 %v1490_v9, %v2891_v20  ;;  %v1579_v46 = vpop.f32.mrf.mxu3  ;;  %v1315_v58 = vadd.f32 %v1314_v57, %v2882_v50  ;;  %v1403_v59 = vpop.f32.mrf.mxu1 }
 0x28f   : > { %v1580_v61 = vadd.f32 %v1579_v46, %v1491_v22  ;;  %v1404_v16 = vadd.f32 %v1403_v59, %v1315_v58 }
 0x291   : > { %1651 = vst [vmem:[%s2895_s26 + $0x128] sm:$0xff] %v1580_v61 }
 0x292   : > { %1652 = vst [vmem:[%s2895_s26 + $0x130] sm:$0xff] %v1404_v16 }
 0x294   : > { %v1492_v60 = vpop.f32.mrf.mxu2  ;;  %v1317_v1 = vpop.f32.mrf.mxu0 }
 0x295   : > { %v1493_v8 = vadd.f32 %v1492_v60, %v2891_v20  ;;  %v1581_v29 = vpop.f32.mrf.mxu3  ;;  %v1318_v2 = vadd.f32 %v1317_v1, %v2882_v50  ;;  %v1406_v3 = vpop.f32.mrf.mxu1 }
 0x297   : > { %v1582_v4 = vadd.f32 %v1581_v29, %v1493_v8  ;;  %v1407_v41 = vadd.f32 %v1406_v3, %v1318_v2 }
 0x299   : > { %1653 = vst [vmem:[%s2895_s26 + $0x138] sm:$0xff] %v1582_v4 }
 0x29a   : > { %1654 = vst [vmem:[%s2895_s26 + $0x140] sm:$0xff] %v1407_v41 }
 0x29c   : > { %v1495_v54 = vpop.f32.mrf.mxu2  ;;  %v1319_v10 = vpop.f32.mrf.mxu0 }
 0x29d   : > { %v1496_v62 = vadd.f32 %v1495_v54, %v2891_v20  ;;  %v1584_v7 = vpop.f32.mrf.mxu3  ;;  %v1320_v6 = vadd.f32 %v1319_v10, %v2882_v50  ;;  %v1408_v11 = vpop.f32.mrf.mxu1 }
 0x29f   : > { %v1585_v15 = vadd.f32 %v1584_v7, %v1496_v62  ;;  %v1409_v44 = vadd.f32 %v1408_v11, %v1320_v6 }
 0x2a1   : > { %1655 = vst [vmem:[%s2895_s26 + $0x148] sm:$0xff] %v1585_v15 }
 0x2a2   : > { %1656 = vst [vmem:[%s2895_s26 + $0x150] sm:$0xff] %v1409_v44 }
 0x2a4   : > { %v1497_v13 = vpop.f32.mrf.mxu2  ;;  %v1322_v42 = vpop.f32.mrf.mxu0 }
 0x2a5   : > { %v1498_v14 = vadd.f32 %v1497_v13, %v2891_v20  ;;  %v1586_v56 = vpop.f32.mrf.mxu3  ;;  %v1323_v55 = vadd.f32 %v1322_v42, %v2882_v50  ;;  %v1411_v19 = vpop.f32.mrf.mxu1 }
 0x2a7   : > { %v1587_v21 = vadd.f32 %v1586_v56, %v1498_v14  ;;  %v1412_v23 = vadd.f32 %v1411_v19, %v1323_v55 }
 0x2a9   : > { %1657 = vst [vmem:[%s2895_s26 + $0x158] sm:$0xff] %v1587_v21 }
 0x2aa   : > { %1658 = vst [vmem:[%s2895_s26 + $0x160] sm:$0xff] %v1412_v23 }
 0x2ac   : > { %v1500_v25 = vpop.f32.mrf.mxu2  ;;  %v1324_v26 = vpop.f32.mrf.mxu0 }
 0x2ad   : > { %v1501_v28 = vadd.f32 %v1500_v25, %v2891_v20  ;;  %v1589_v5 = vpop.f32.mrf.mxu3  ;;  %v1325_v45 = vadd.f32 %v1324_v26, %v2882_v50  ;;  %v1413_v30 = vpop.f32.mrf.mxu1 }
 0x2af   : > { %v1590_v36 = vadd.f32 %v1589_v5, %v1501_v28  ;;  %v1414_v0 = vadd.f32 %v1413_v30, %v1325_v45 }
 0x2b1   : > { %1659 = vst [vmem:[%s2895_s26 + $0x168] sm:$0xff] %v1590_v36 }
 0x2b2   : > { %1660 = vst [vmem:[%s2895_s26 + $0x170] sm:$0xff] %v1414_v0 }
 0x2b4   : > { %v1502_v31 = vpop.f32.mrf.mxu2  ;;  %v1327_v33 = vpop.f32.mrf.mxu0 }
 0x2b5   : > { %v1503_v24 = vadd.f32 %v1502_v31, %v2891_v20  ;;  %v1591_v32 = vpop.f32.mrf.mxu3  ;;  %v1328_v17 = vadd.f32 %v1327_v33, %v2882_v50  ;;  %v1416_v18 = vpop.f32.mrf.mxu1 }
 0x2b7   : > { %v1592_v35 = vadd.f32 %v1591_v32, %v1503_v24  ;;  %v1417_v37 = vadd.f32 %v1416_v18, %v1328_v17 }
 0x2b9   : > { %1661 = vst [vmem:[%s2895_s26 + $0x178] sm:$0xff] %v1592_v35 }
 0x2ba   : > { %1662 = vst [vmem:[%s2895_s26 + $0x180] sm:$0xff] %v1417_v37 }
 0x2bc   : > { %v1505_v38 = vpop.f32.mrf.mxu2  ;;  %v1329_v43 = vpop.f32.mrf.mxu0 }
 0x2bd   : > { %v1506_v39 = vadd.f32 %v1505_v38, %v2891_v20  ;;  %v1594_v40 = vpop.f32.mrf.mxu3  ;;  %v1330_v12 = vadd.f32 %v1329_v43, %v2882_v50  ;;  %v1418_v53 = vpop.f32.mrf.mxu1 }
 0x2bf   : > { %v1595_v27 = vadd.f32 %v1594_v40, %v1506_v39  ;;  %v1419_v47 = vadd.f32 %v1418_v53, %v1330_v12 }
 0x2c1   : > { %1663 = vst [vmem:[%s2895_s26 + $0x188] sm:$0xff] %v1595_v27 }
 0x2c2   : > { %1664 = vst [vmem:[%s2895_s26 + $0x190] sm:$0xff] %v1419_v47 }
 0x2c4   : > { %v1507_v63 = vpop.f32.mrf.mxu2  ;;  %v1332_v51 = vpop.f32.mrf.mxu0 }
 0x2c5   : > { %v1508_v48 = vadd.f32 %v1507_v63, %v2891_v20  ;;  %v1596_v49 = vpop.f32.mrf.mxu3  ;;  %v1333_v52 = vadd.f32 %v1332_v51, %v2882_v50  ;;  %v1421_v34 = vpop.f32.mrf.mxu1 }
 0x2c7   : > { %v1597_v9 = vadd.f32 %v1596_v49, %v1508_v48  ;;  %v1422_v22 = vadd.f32 %v1421_v34, %v1333_v52 }
 0x2c9   : > { %1665 = vst [vmem:[%s2895_s26 + $0x198] sm:$0xff] %v1597_v9 }
 0x2ca   : > { %1666 = vst [vmem:[%s2895_s26 + $0x1a0] sm:$0xff] %v1422_v22 }
 0x2cc   : > { %v1510_v46 = vpop.f32.mrf.mxu2  ;;  %v1334_v59 = vpop.f32.mrf.mxu0 }
 0x2cd   : > { %v1511_v57 = vadd.f32 %v1510_v46, %v2891_v20  ;;  %v1599_v58 = vpop.f32.mrf.mxu3  ;;  %v1335_v61 = vadd.f32 %v1334_v59, %v2882_v50  ;;  %v1423_v16 = vpop.f32.mrf.mxu1 }
 0x2cf   : > { %v1600_v60 = vadd.f32 %v1599_v58, %v1511_v57  ;;  %v1424_v8 = vadd.f32 %v1423_v16, %v1335_v61 }
 0x2d1   : > { %1667 = vst [vmem:[%s2895_s26 + $0x1a8] sm:$0xff] %v1600_v60 }
 0x2d2   : > { %1668 = vst [vmem:[%s2895_s26 + $0x1b0] sm:$0xff] %v1424_v8 }
 0x2d4   : > { %v1512_v29 = vpop.f32.mrf.mxu2  ;;  %v1337_v3 = vpop.f32.mrf.mxu0 }
 0x2d5   : > { %v1513_v1 = vadd.f32 %v1512_v29, %v2891_v20  ;;  %v1601_v2 = vpop.f32.mrf.mxu3  ;;  %v1338_v4 = vadd.f32 %v1337_v3, %v2882_v50  ;;  %v1426_v41 = vpop.f32.mrf.mxu1 }
 0x2d7   : > { %v1602_v54 = vadd.f32 %v1601_v2, %v1513_v1  ;;  %v1427_v62 = vadd.f32 %v1426_v41, %v1338_v4 }
 0x2d9   : > { %1669 = vst [vmem:[%s2895_s26 + $0x1b8] sm:$0xff] %v1602_v54 }
 0x2da   : > { %1670 = vst [vmem:[%s2895_s26 + $0x1c0] sm:$0xff] %v1427_v62 }
 0x2dc   : > { %v1515_v7 = vpop.f32.mrf.mxu2  ;;  %v1339_v11 = vpop.f32.mrf.mxu0 }
 0x2dd   : > { %v1516_v10 = vadd.f32 %v1515_v7, %v2891_v20  ;;  %v1604_v6 = vpop.f32.mrf.mxu3  ;;  %v1340_v15 = vadd.f32 %v1339_v11, %v2882_v50  ;;  %v1428_v44 = vpop.f32.mrf.mxu1 }
 0x2df   : > { %v1605_v13 = vadd.f32 %v1604_v6, %v1516_v10  ;;  %v1429_v14 = vadd.f32 %v1428_v44, %v1340_v15 }
 0x2e1   : > { %1671 = vst [vmem:[%s2895_s26 + $0x1c8] sm:$0xff] %v1605_v13 }
 0x2e2   : > { %1672 = vst [vmem:[%s2895_s26 + $0x1d0] sm:$0xff] %v1429_v14 }
 0x2e4   : > { %v1517_v56 = vpop.f32.mrf.mxu2  ;;  %v1342_v19 = vpop.f32.mrf.mxu0 }
 0x2e5   : > { %v1518_v42 = vadd.f32 %v1517_v56, %v2891_v20  ;;  %v1606_v55 = vpop.f32.mrf.mxu3  ;;  %v1343_v21 = vadd.f32 %v1342_v19, %v2882_v50  ;;  %v1431_v23 = vpop.f32.mrf.mxu1 }
 0x2e7   : > { %v1607_v25 = vadd.f32 %v1606_v55, %v1518_v42  ;;  %v1432_v28 = vadd.f32 %v1431_v23, %v1343_v21 }
 0x2e9   : > { %1673 = vst [vmem:[%s2895_s26 + $0x1d8] sm:$0xff] %v1607_v25 }
 0x2ea   : > { %1674 = vst [vmem:[%s2895_s26 + $0x1e0] sm:$0xff] %v1432_v28 }
 0x2ec   : > { %v1520_v5 = vpop.f32.mrf.mxu2  ;;  %v1344_v30 = vpop.f32.mrf.mxu0 }
 0x2ed   : > { %v1521_v26 = vadd.f32 %v1520_v5, %v2891_v20  ;;  %v1609_v45 = vpop.f32.mrf.mxu3  ;;  %v1345_v36 = vadd.f32 %v1344_v30, %v2882_v50  ;;  %v1433_v31 = vpop.f32.mrf.mxu1 }
 0x2ef   : > { %v1610_v0 = vadd.f32 %v1609_v45, %v1521_v26  ;;  %v1434_v24 = vadd.f32 %v1433_v31, %v1345_v36 }
 0x2f1   : > { %1675 = vst [vmem:[%s2895_s26 + $0x1e8] sm:$0xff] %v1610_v0 }
 0x2f2   : > { %1676 = vst [vmem:[%s2895_s26 + $0x1f0] sm:$0xff] %v1434_v24 }
 0x2f4   : > { %v1522_v32 = vpop.f32.mrf.mxu2 }
 0x2f5   : > { %v1523_v33 = vadd.f32 %v1522_v32, %v2891_v20  ;;  %v1611_v17 = vpop.f32.mrf.mxu3  ;;  %1685 = sbr.rel (!%p2548_p11) target bundleno = 793 (0x319), region = 60 }
 0x2f7   : > { %v1612_v18 = vadd.f32 %v1611_v17, %v1523_v33 }
 0x2f9   : > { %1677 = vst [vmem:[%s2895_s26 + $0x1f8] sm:$0xff] %v1612_v18 }
 0x2fa   : > { %s3151_s12 = smov (!%p1688_p6, %s1687_s12), 32 }
 0x2fb   : > { %s2160_s10 = sshll.u32 %s3151_s12, 4 }
 0x2fc   : > { %s1692_s15 = ssub.s32 512, %s2160_s10 }
 0x2fd   : > { %s1693_s11 = sshll.u32 %s1692_s15, 4 }
 0x2fe   : > { %1694 = vsyncadd %s1679_s23, %s1693_s11  ;;  %p3064_p5 = scmp.ne.s32.totalorder %s2160_s10, 0  ;;  %s2162_s9 = sshll.u32 %s2517_s22, 9 }
 0x2ff   : > { %s1698_s8 = scalar_lea.hbm %s3123_s5, %s2162_s9  ;;  %s1700_s25 = sshll.u32 %s2895_s26, 4  ;;  %s3073_s25 = int_to_ptr.vmem [resolvable:$true] %s1700_s25 }
 0x300   : > { %s1702_s13 = sshll.u32 %s1698_s8, 4  ;;  %s2090_s14 = sshll.u32 %s3151_s12, 8  ;;  %s3075_s13 = int_to_ptr.hbm [resolvable:$true] %s1702_s13 }
 0x301   : > { %s2368_s29 = sshra.s32 %s3073_s25, 4  ;;  %s2370_s7 = sshrl.u32 %s2090_s14, 4  ;;  %s2369_s29 = int_to_ptr.vmem [resolvable:$true] %s2368_s29 }
 0x302   : > { %s2375_s28 = scalar_lea.vmem %s2369_s29, %s2370_s7  ;;  %s2463_s22 = smov [#allocation10]  }
 0x303   : > { %p2376_p11 = scmp.ne.s32.totalorder %s2369_s29, %s2375_s28  ;;  %s2379_s10 = scalar_lea.vmem %s2463_s22, 1024 }
 0x304   : > { %p2381_p1 = scmp.lt.s32.totalorder %s2379_s10, %s2375_s28 }
 0x305   : > { %p2377_p9 = pnand %p2376_p11, %p3064_p5 }
 0x307   : > { %p2378_p10 = pneg %p2377_p9 }
 0x309   : > { %p2383_p0 = pnand %p2381_p1, %p2378_p10 }
 0x30b   : > { %2386 = shalt.err (!%p2383_p0)
}
 0x30c   : > { %s2387_s26 = sshra.s32 %s3075_s13, 4  ;;  %s2398_s16 = scalar_lea.hbm %s3123_s5, 768  ;;  %s2388_s26 = int_to_ptr.hbm [resolvable:$true] %s2387_s26 }
 0x30d   : > { %s2394_s15 = scalar_lea.hbm %s2388_s26, %s2370_s7  ;;  %p2399_p4 = scmp.lt.s32.totalorder %s2388_s26, %s3123_s5 }
 0x30e   : > { %p2395_p3 = scmp.ne.s32.totalorder %s2388_s26, %s2394_s15  ;;  %p2400_p12 = scmp.lt.s32.totalorder %s2398_s16, %s2394_s15 }
 0x310   : > { %p2396_p7 = pnand %p2395_p3, %p3064_p5  ;;  %p2401_p13 = por %p2400_p12, %p2399_p4 }
 0x312   : > { %p2397_p8 = pneg %p2396_p7 }
 0x314   : > { %p2402_p2 = pnand %p2401_p13, %p2397_p8 }
 0x316   : > { %2405 = shalt.err (!%p2402_p2)
}
 0x317   : > { %s2464_s29 = smov 256   ;;  %s2465_s7 = smov 16  }
 0x318   : > { %1708 = dma.vmem_to_hbm [thread:$0]  (%p3064_p5), %s3073_s25, %s2090_s14, %s3075_s13, %s1679_s23, %s2464_s29, %s2464_s29, %s2465_s7  }
 0x319 PF: > { %s1717_s28 = sand.u32 1, %s2441_s18   ;;  %p3142_p6 = scmp.ne.s32.totalorder %s3131_s6, 0 }
 0x31a   : > { %p3143_p11 = scmp.ge.s32.totalorder %s2453_s21, 2  ;;  %s1718_s22 = scalar_lea.sflag [#allocation4], %s1717_s28 }
 0x31c   : > { %p2188_p9 = pnand %p3143_p11, %p3142_p6 }
 0x31e   : > { %p2189_p10 = pneg %p2188_p9 }
 0x320   : > { %2436 = dma.done.wait (%p2189_p10), %s1718_s22, 8192  }
 0x321   : > { %2438 = vsyncadd (%p2189_p10), %s1718_s22, 4294959104  ;;  %p20_p1 = scmp.ge.s32.totalorder %s2521_s24, 4   ;;  %s3144_s18 = smov %s2445_s19 }
 0x322   : > { %s3145_s19 = smov %s2449_s20  ;;  %s3146_s20 = smov %s2533_s27 }
 0x323   : > { %s3147_s21 = smov %s2521_s24  ;;  %22 = sbr.rel (!%p20_p1) target bundleno = 9 (0x9), region = 97 }
 0x328   :  { %1724 = vsyncpa [#allocation3], 1 }
 0x329   :  { %1726 = vsyncpa [#allocation3 + $0x1], 1 }
 0x32a   :  { %1727 = vsyncpa [#allocation6], 1 }
 0x32b   :  { %1728 = vsyncpa [#allocation9], 1 }
 0x32c   :  { %1729 = vsyncpa [#allocation4], 1 }
 0x32d   :  { %1731 = vsyncpa [#allocation4 + $0x1], 1 }

// kernel: tpu_custom_call.1
= control target key start
LH: loop header
LB: loop body
LE: loop exit
PB: predicated region body
PF: predicated region fallthrough
CT: control target
= control target key end

     0   :  { %s3118_s0 = inlined_call_operand.hbm [shape: f32[384,256], index: 0, kind: input, shape index: {}]   ;;  %s3119_s1 = inlined_call_operand.hbm [shape: bf16[256,256], index: 1, kind: input, shape index: {}]   ;;  %s3120_s2 = inlined_call_operand.hbm [shape: f32[1,256], index: 2, kind: input, shape index: {}]   ;;  %s3121_s3 = inlined_call_operand.hbm [shape: bf16[256,256], index: 3, kind: input, shape index: {}]   ;;  %s3122_s4 = inlined_call_operand.vmem [shape: f32[1,256], index: 4, kind: input, shape index: {}]   ;;  %s3123_s5 = inlined_call_operand.hbm [shape: f32[384,256], index: 5, kind: output, shape index: {}]  }
   0x1   :  { %3127 = sst [smem:[#allocation15_spill]] %s3119_s1 }
   0x2   :  { %10 = vsyncpa [#allocation3], 0 }
   0x3   :  { %12 = vsyncpa [#allocation3 + $0x1], 0 }
   0x4   :  { %13 = vsyncpa [#allocation6], 0 }
   0x5   :  { %14 = vsyncpa [#allocation9], 0 }
   0x6   :  { %15 = vsyncpa [#allocation4], 0 }
   0x7   :  { %17 = vsyncpa [#allocation4 + $0x1], 0  ;;  %s2496_s18 = smov 0   ;;  %s2498_s19 = smov 0  }
   0x8   :  { %s2500_s20 = smov 0   ;;  %s2502_s21 = smov 0  }
   0x9 LB: > { %s2517_s22 = sadd.s32 4294967295, %s2453_s21   ;;  %s1805_s23 = sadd.s32 4294967294, %s2453_s21   ;;  %s2453_s21 = sphi %s2502_s21, %s3147_s21   ;;  %s2449_s20 = sphi %s2500_s20, %s3146_s20   ;;  %s2445_s19 = sphi %s2498_s19, %s3145_s19   ;;  %s2441_s18 = sphi %s2496_s18, %s3144_s18  }
   0xa   : > { %s2521_s24 = sadd.s32 1, %s2453_s21   ;;  %s30_s25 = sadd.s32 1, %s2449_s20 }
   0xb   : > { %s27_s26 = ssub.s32 %s2453_s21, %s2521_s24  ;;  %p37_p0 = scmp.ne.s32.totalorder %s2449_s20, %s2445_s19 }
   0xc   : > { %p28_p1 = scmp.eq.s32.totalorder %s27_s26, 0  ;;  %p38_p2 = scmp.eq.s32.totalorder %s2453_s21, 0 }
   0xd   : > { %p43_p3 = scmp.ne.s32.totalorder %s2445_s19, %s2441_s18  ;;  %p3126_p4 = scmp.eq.s32.totalorder %s2517_s22, 0 }
   0xe   : > { %s2533_s27 = scalar_select %p28_p1, %s2449_s20, %s30_s25  }
   0xf   : > { %p2535_p5 = por %p38_p2, %p37_p0  ;;  %p2541_p6 = por %p3126_p4, %p43_p3 }
  0x10   : > { %p151_p7 = scmp.eq.s32.totalorder %s2517_s22, 1  ;;  %p157_p8 = scmp.eq.s32.totalorder %s1805_s23, 1 }
  0x11   : > { %p1806_p9 = scmp.ge.s32.totalorder %s2453_s21, 1  ;;  %p164_p10 = scmp.lt.s32.totalorder %s2453_s21, 3 }
  0x12   : > { %p2548_p11 = por %p151_p7, %p37_p0  ;;  %p2552_p12 = por %p157_p8, %p43_p3 }
  0x13   : > { %p2556_p13 = pnand %p1806_p9, %p164_p10  ;;  %s3133_s1 = sld [smem:[#allocation15_spill]] }
  0x14   : > { %s3131_s6 = scalar_select %p2552_p12, 1, 0 }
  0x15   : > { %p2177_p1 = pneg %p2556_p13  ;;  %s2455_s11 = smov [#allocation5]  }
  0x16   : > { %s177_s12 = sshll.u32 %s2455_s11, 4  ;;  %s190_s16 = sshll.u32 %s3120_s2, 4  ;;  %s178_s12 = int_to_ptr.vmem [resolvable:$true] %s177_s12  ;;  %s191_s16 = int_to_ptr.hbm [resolvable:$true] %s190_s16 }
  0x17   : > { %p2567_p0 = pnand %p2177_p1, %p3126_p4  ;;  %s2456_s17 = smov 128  }
  0x18   : > { %s2457_s23 = smov 8   ;;  %s201_s8 = sshll.u32 %s3121_s3, 4  ;;  %s202_s8 = int_to_ptr.hbm [resolvable:$true] %s201_s8 }
  0x19   : > { %s175_s10 = sshll.u32 %s3133_s1, 4  ;;  %s2458_s9 = smov [#allocation7]   ;;  %s176_s10 = int_to_ptr.hbm [resolvable:$true] %s175_s10 }
  0x1a   : > { %2180 = dma.hbm_to_vmem [thread:$0]  (!%p2567_p0), %s176_s10, 4096, %s178_s12, [#allocation6], %s2456_s17, %s2456_s17, %s2457_s23  }
  0x1b   : > { %s192_s11 = sshll.u32 %s2458_s9, 4  ;;  %s2459_s14 = smov [#allocation8]   ;;  %s193_s11 = int_to_ptr.vmem [resolvable:$true] %s192_s11 }
  0x1c   : > { %2183 = dma.hbm_to_vmem [thread:$0]  (!%p2567_p0), %s191_s16, 32, %s193_s11, [#allocation6]  }
  0x1d   : > { %s203_s15 = sshll.u32 %s2459_s14, 4  ;;  %p3125_p2 = scmp.ge.s32.totalorder %s2453_s21, 2  ;;  %s204_s15 = int_to_ptr.vmem [resolvable:$true] %s203_s15 }
  0x1e   : > { %2186 = dma.hbm_to_vmem [thread:$0]  (!%p2567_p0), %s202_s8, 4096, %s204_s15, [#allocation9], %s2456_s17, %s2456_s17, %s2457_s23  }
  0x1f   : > { %216 = sbr.rel (%p3125_p2) target bundleno = 73 (0x49), region = 32 }
  0x24   : > { %219 = sbr.rel (!%p2535_p5) target bundleno = 73 (0x49), region = 36  ;;  %s220_s10 = sand.u32 (%p2535_p5), 1, %s2449_s20  }
  0x25   : > { %s1812_s12 = sshll.u32 (%p2535_p5), %s2453_s21, 5  ;;  %s1811_s25 = sshll.u32 (%p2535_p5), %s220_s10, 9 }
  0x26   : > { %s226_s26 = ssub.s32 (%p2535_p5), 48, %s1812_s12  ;;  %s2593_s23 = scalar_lea.sflag (%p2535_p5), [#allocation3], %s220_s10 }
  0x27   : > { %p227_p3 = scmp.lt.s32.totalorder (%p2535_p5), %s226_s26, 32  ;;  %s224_s8 = scalar_lea.vmem (%p2535_p5), [#allocation2], %s1811_s25 }
  0x29   : > { %s3149_s26 = smov (!%p227_p3, %s226_s26), 32 }
  0x2a   : > { %s2093_s13 = sshll.u32 %s3149_s26, 4 }
  0x2b   : > { %s231_s16 = ssub.s32 512, %s2093_s13 }
  0x2c   : > { %s232_s17 = sshll.u32 %s231_s16, 4 }
  0x2d   : > { %233 = vsyncadd %s2593_s23, %s232_s17  ;;  %p2596_p5 = scmp.ne.s32.totalorder %s2093_s13, 0  ;;  %s2095_s9 = sshll.u32 %s2453_s21, 9 }
  0x2e   : > { %s237_s15 = scalar_lea.hbm %s3118_s0, %s2095_s9  ;;  %s2604_s12 = sshll.u32 %s224_s8, 4  ;;  %s242_s12 = int_to_ptr.vmem [resolvable:$true] %s2604_s12 }
  0x2f   : > { %s239_s10 = sshll.u32 %s237_s15, 4  ;;  %s3124_s25 = sshll.u32 %s3149_s26, 8  ;;  %s2607_s10 = int_to_ptr.hbm [resolvable:$true] %s239_s10 }
  0x30   : > { %s2329_s16 = sshra.s32 %s2607_s10, 4  ;;  %s2331_s13 = sshrl.u32 %s3124_s25, 4  ;;  %s2330_s16 = int_to_ptr.hbm [resolvable:$true] %s2329_s16 }
  0x31   : > { %s2336_s17 = scalar_lea.hbm %s2330_s16, %s2331_s13  ;;  %s2340_s8 = scalar_lea.hbm %s3118_s0, 768 }
  0x32   : > { %p2337_p7 = scmp.ne.s32.totalorder %s2330_s16, %s2336_s17  ;;  %p2341_p10 = scmp.lt.s32.totalorder %s2330_s16, %s3118_s0 }
  0x33   : > { %p2342_p1 = scmp.lt.s32.totalorder %s2340_s8, %s2336_s17 }
  0x34   : > { %p2338_p8 = pnand %p2337_p7, %p2596_p5 }
  0x35   : > { %p2343_p0 = por %p2342_p1, %p2341_p10 }
  0x36   : > { %p2339_p9 = pneg %p2338_p8 }
  0x38   : > { %p2344_p3 = pnand %p2343_p0, %p2339_p9 }
  0x3a   : > { %2347 = shalt.err (!%p2344_p3)
}
  0x3b   : > { %s2348_s25 = sshra.s32 %s242_s12, 4  ;;  %s2460_s11 = smov [#allocation2]   ;;  %s2349_s25 = int_to_ptr.vmem [resolvable:$true] %s2348_s25 }
  0x3c   : > { %s2355_s1 = scalar_lea.vmem %s2349_s25, %s2331_s13  ;;  %s2359_s9 = scalar_lea.vmem %s2460_s11, 1024 }
  0x3d   : > { %p2356_p7 = scmp.ne.s32.totalorder %s2349_s25, %s2355_s1  ;;  %p2361_p4 = scmp.lt.s32.totalorder %s2359_s9, %s2355_s1 }
  0x3f   : > { %p2357_p8 = pnand %p2356_p7, %p2596_p5 }
  0x41   : > { %p2358_p2 = pneg %p2357_p8 }
  0x43   : > { %p2363_p12 = pnand %p2361_p4, %p2358_p2 }
  0x45   : > { %2366 = shalt.err (!%p2363_p12)
}
  0x46   : > { %s2461_s16 = smov 256   ;;  %s2462_s17 = smov 16  }
  0x47   : > { %s3136_s8 = sshll.u32 %s3149_s26, 8 }
  0x48   : > { %247 = dma.hbm_to_vmem [thread:$0]  (%p2596_p5), %s2607_s10, %s3136_s8, %s242_s12, %s2593_s23, %s2461_s16, %s2461_s16, %s2462_s17  }
  0x49 PF: > { %253 = sbr.rel (%p2556_p13) target bundleno = 793 (0x319), region = 40  ;;  %s2636_s1 = sand.u32 (!%p2556_p13), 1, %s2445_s19  }
  0x4a   : > { %s1821_s25 = sshll.u32 (!%p2556_p13), %s2636_s1, 9  ;;  %s256_s13 = scalar_lea.sflag (!%p2556_p13), [#allocation3], %s2636_s1 }
  0x4b   : > { %s2642_s14 = scalar_lea.vmem (!%p2556_p13), [#allocation2], %s1821_s25 }
  0x4e   : > { %2424 = dma.done.wait (%p2541_p6), %s256_s13, 8192  }
  0x4f   : > { %2426 = vsyncadd (%p2541_p6), %s256_s13, 4294959104  ;;  %p3137_p4 = scmp.eq.s32.totalorder %s2517_s22, 0 }
  0x51   : > { %2428 = dma.done.wait (%p3137_p4), [#allocation6], 4128   ;;  %p3138_p12 = pmov %p3137_p4 }
  0x52   : > { %p3139_p13 = pmov %p3137_p4 }
  0x53   : > { %2430 = vsyncadd (%p3138_p12), [#allocation6], 4294963168 }
  0x54   : > { %2432 = dma.done.wait (%p3139_p13), [#allocation9], 4096   ;;  %p3140_p2 = pmov %p3137_p4 }
  0x55   : > { %v1884_v0 = vld [vmem:[#allocation5 + $0x70] sm:$0xf]  ;;  %v2111_v1 = vld [vmem:[#allocation5 + $0x74] sm:$0xf0]  ;;  %v2110_v5 = vld [vmem:[#allocation5 + $0x74] sm:$0xf] }
  0x56   : > { %2434 = vsyncadd (%p3140_p2), [#allocation9], 4294963200  ;;  %v1948_v2 = vld [vmem:[#allocation5 + $0xf0] sm:$0xf]  ;;  %v1885_v3 = vor.u32 %v2111_v1, %v1884_v0  ;;  %v2127_v4 = vld [vmem:[#allocation5 + $0xf4] sm:$0xf0] }
  0x57   : > { %v1886_v6 = vld [vmem:[#allocation5 + $0x78] sm:$0xf0]  ;;  %v1949_v7 = vor.u32 %v2127_v4, %v1948_v2  ;;  %v2126_v9 = vld [vmem:[#allocation5 + $0xf4] sm:$0xf]  ;;  %v1876_v11 = vld [vmem:[#allocation5 + $0x60] sm:$0xf] }
  0x58   : > { %v1889_v8 = vor.u32 %v2110_v5, %v1886_v6  ;;  %v1950_v10 = vld [vmem:[#allocation5 + $0xf8] sm:$0xf0]  ;;  %609 = vmatpush.bf16.msra.mxu0 %v1885_v3  ;;  %v2109_v13 = vld [vmem:[#allocation5 + $0x64] sm:$0xf0]  ;;  %v1940_v14 = vld [vmem:[#allocation5 + $0xe0] sm:$0xf] }
  0x59   : > { %v1953_v12 = vor.u32 %v2126_v9, %v1950_v10  ;;  %v2125_v15 = vld [vmem:[#allocation5 + $0xe4] sm:$0xf0]  ;;  %698 = vmatpush.bf16.msra.mxu1 %v1949_v7  ;;  %v1877_v16 = vor.u32 %v2109_v13, %v1876_v11  ;;  %v2108_v18 = vld [vmem:[#allocation5 + $0x64] sm:$0xf]  ;;  %v1878_v19 = vld [vmem:[#allocation5 + $0x68] sm:$0xf0] }
  0x5a   : > { %787 = vmatpush.bf16.msra.mxu2 %v1889_v8  ;;  %v1941_v17 = vor.u32 %v2125_v15, %v1940_v14  ;;  %v2124_v20 = vld [vmem:[#allocation5 + $0xe4] sm:$0xf]  ;;  %v1881_v21 = vor.u32 %v2108_v18, %v1878_v19  ;;  %v1942_v22 = vld [vmem:[#allocation5 + $0xe8] sm:$0xf0]  ;;  %v1868_v23 = vld [vmem:[#allocation5 + $0x50] sm:$0xf] }
  0x5b   : > { %876 = vmatpush.bf16.msra.mxu3 %v1953_v12  ;;  %v2107_v24 = vld [vmem:[#allocation5 + $0x54] sm:$0xf0]  ;;  %v1945_v25 = vor.u32 %v2124_v20, %v1942_v22  ;;  %v1932_v26 = vld [vmem:[#allocation5 + $0xd0] sm:$0xf]  ;;  %v2106_v28 = vld [vmem:[#allocation5 + $0x54] sm:$0xf] }
  0x5c   : > { %v2123_v27 = vld [vmem:[#allocation5 + $0xd4] sm:$0xf0]  ;;  %610 = vmatpush.bf16.msra.mxu0 %v1877_v16  ;;  %v1869_v29 = vor.u32 %v2107_v24, %v1868_v23  ;;  %v1870_v30 = vld [vmem:[#allocation5 + $0x58] sm:$0xf0]  ;;  %v2122_v31 = vld [vmem:[#allocation5 + $0xd4] sm:$0xf] }
  0x5d   : > { %v1934_v32 = vld [vmem:[#allocation5 + $0xd8] sm:$0xf0]  ;;  %699 = vmatpush.bf16.msra.mxu1 %v1941_v17  ;;  %v1933_v33 = vor.u32 %v2123_v27, %v1932_v26  ;;  %v1873_v34 = vor.u32 %v2106_v28, %v1870_v30  ;;  %v1860_v35 = vld [vmem:[#allocation5 + $0x40] sm:$0xf]  ;;  %v2105_v36 = vld [vmem:[#allocation5 + $0x44] sm:$0xf0] }
  0x5e   : > { %788 = vmatpush.bf16.msra.mxu2 %v1881_v21  ;;  %v1924_v37 = vld [vmem:[#allocation5 + $0xc0] sm:$0xf]  ;;  %v1937_v38 = vor.u32 %v2122_v31, %v1934_v32  ;;  %v2121_v39 = vld [vmem:[#allocation5 + $0xc4] sm:$0xf0]  ;;  %v2104_v40 = vld [vmem:[#allocation5 + $0x44] sm:$0xf]  ;;  %v1861_v44 = vor.u32 %v2105_v36, %v1860_v35 }
  0x5f   : > { %877 = vmatpush.bf16.msra.mxu3 %v1945_v25  ;;  %v1862_v41 = vld [vmem:[#allocation5 + $0x48] sm:$0xf0]  ;;  %v2120_v42 = vld [vmem:[#allocation5 + $0xc4] sm:$0xf]  ;;  %v1925_v45 = vor.u32 %v2121_v39, %v1924_v37  ;;  %v1852_v47 = vld [vmem:[#allocation5 + $0x30] sm:$0xf] }
  0x60   : > { %v1926_v43 = vld [vmem:[#allocation5 + $0xc8] sm:$0xf0]  ;;  %611 = vmatpush.bf16.msra.mxu0 %v1869_v29  ;;  %v1865_v46 = vor.u32 %v2104_v40, %v1862_v41  ;;  %v2103_v48 = vld [vmem:[#allocation5 + $0x34] sm:$0xf0]  ;;  %v1916_v49 = vld [vmem:[#allocation5 + $0xb0] sm:$0xf] }
  0x61   : > { %700 = vmatpush.bf16.msra.mxu1 %v1933_v33  ;;  %v1929_v50 = vor.u32 %v2120_v42, %v1926_v43  ;;  %v2119_v51 = vld [vmem:[#allocation5 + $0xb4] sm:$0xf0]  ;;  %v2102_v52 = vld [vmem:[#allocation5 + $0x34] sm:$0xf]  ;;  %v1854_v53 = vld [vmem:[#allocation5 + $0x38] sm:$0xf0]  ;;  %v1853_v56 = vor.u32 %v2103_v48, %v1852_v47 }
  0x62   : > { %789 = vmatpush.bf16.msra.mxu2 %v1873_v34  ;;  %v2118_v54 = vld [vmem:[#allocation5 + $0xb4] sm:$0xf]  ;;  %v1918_v55 = vld [vmem:[#allocation5 + $0xb8] sm:$0xf0]  ;;  %v1917_v57 = vor.u32 %v2119_v51, %v1916_v49  ;;  %v1857_v58 = vor.u32 %v2102_v52, %v1854_v53  ;;  %v1844_v59 = vld [vmem:[#allocation5 + $0x20] sm:$0xf] }
  0x63   : > { %878 = vmatpush.bf16.msra.mxu3 %v1937_v38  ;;  %v2101_v60 = vld [vmem:[#allocation5 + $0x24] sm:$0xf0]  ;;  %v1908_v61 = vld [vmem:[#allocation5 + $0xa0] sm:$0xf]  ;;  %v1921_v62 = vor.u32 %v2118_v54, %v1918_v55  ;;  %v2100_v0 = vld [vmem:[#allocation5 + $0x24] sm:$0xf] }
  0x64   : > { %612 = vmatpush.bf16.msra.mxu0 %v1861_v44  ;;  %v2117_v63 = vld [vmem:[#allocation5 + $0xa4] sm:$0xf0]  ;;  %v1846_v1 = vld [vmem:[#allocation5 + $0x28] sm:$0xf0]  ;;  %v2116_v2 = vld [vmem:[#allocation5 + $0xa4] sm:$0xf]  ;;  %v1845_v4 = vor.u32 %v2101_v60, %v1844_v59 }
  0x65   : > { %701 = vmatpush.bf16.msra.mxu1 %v1925_v45  ;;  %v1910_v3 = vld [vmem:[#allocation5 + $0xa8] sm:$0xf0]  ;;  %v1909_v5 = vor.u32 %v2117_v63, %v1908_v61  ;;  %v1849_v6 = vor.u32 %v2100_v0, %v1846_v1  ;;  %v1836_v7 = vld [vmem:[#allocation5 + $0x10] sm:$0xf]  ;;  %v2099_v8 = vld [vmem:[#allocation5 + $0x14] sm:$0xf0] }
  0x66   : > { %790 = vmatpush.bf16.msra.mxu2 %v1865_v46  ;;  %v1900_v9 = vld [vmem:[#allocation5 + $0x90] sm:$0xf]  ;;  %v1913_v10 = vor.u32 %v2116_v2, %v1910_v3  ;;  %v2115_v11 = vld [vmem:[#allocation5 + $0x94] sm:$0xf0]  ;;  %v2098_v12 = vld [vmem:[#allocation5 + $0x14] sm:$0xf]  ;;  %v1837_v16 = vor.u32 %v2099_v8, %v1836_v7 }
  0x67   : > { %879 = vmatpush.bf16.msra.mxu3 %v1929_v50  ;;  %v1838_v13 = vld [vmem:[#allocation5 + $0x18] sm:$0xf0]  ;;  %v2114_v14 = vld [vmem:[#allocation5 + $0x94] sm:$0xf]  ;;  %v1828_v17 = vld [vmem:[#allocation5] sm:$0xf]  ;;  %v1901_v19 = vor.u32 %v2115_v11, %v1900_v9 }
  0x68   : > { %613 = vmatpush.bf16.msra.mxu0 %v1853_v56  ;;  %v1902_v15 = vld [vmem:[#allocation5 + $0x98] sm:$0xf0]  ;;  %v2097_v18 = vld [vmem:[#allocation5 + $0x4] sm:$0xf0]  ;;  %v1841_v20 = vor.u32 %v2098_v12, %v1838_v13  ;;  %v1892_v21 = vld [vmem:[#allocation5 + $0x80] sm:$0xf] }
  0x69   : > { %702 = vmatpush.bf16.msra.mxu1 %v1917_v57  ;;  %v2113_v22 = vld [vmem:[#allocation5 + $0x84] sm:$0xf0]  ;;  %v2096_v23 = vld [vmem:[#allocation5 + $0x4] sm:$0xf]  ;;  %v1905_v24 = vor.u32 %v2114_v14, %v1902_v15  ;;  %v1830_v25 = vld [vmem:[#allocation5 + $0x8] sm:$0xf0]  ;;  %v1829_v31 = vor.u32 %v2097_v18, %v1828_v17 }
  0x6a   : > { %791 = vmatpush.bf16.msra.mxu2 %v1857_v58  ;;  %v2112_v26 = vld [vmem:[#allocation5 + $0x84] sm:$0xf]  ;;  %v1894_v27 = vld [vmem:[#allocation5 + $0x88] sm:$0xf0]  ;;  %v2142_v29 = vld [vmem:[#allocation8 + $0x74] sm:$0xf]  ;;  %v1893_v35 = vor.u32 %v2113_v22, %v1892_v21  ;;  %v1833_v36 = vor.u32 %v2096_v23, %v1830_v25 }
  0x6b   : > { %880 = vmatpush.bf16.msra.mxu3 %v1921_v62  ;;  %v316_v28 = vld [vmem:[%s2642_s14] sm:$0xff]  ;;  %v318_v32 = vld [vmem:[%s2642_s14 + $0x10] sm:$0xff]  ;;  %v317_v37 = vld [vmem:[%s2642_s14 + $0x8] sm:$0xff]  ;;  %v1897_v39 = vor.u32 %v2112_v26, %v1894_v27  ;;  %s2895_s26 = scalar_lea.vmem [#allocation10], %s1821_s25  ;;  %s1679_s23 = scalar_lea.sflag [#allocation4], %s2636_s1 }
  0x6c   : > { %614 = vmatpush.bf16.msra.mxu0 %v1845_v4  ;;  %v2014_v30 = vld [vmem:[#allocation8 + $0x78] sm:$0xf0]  ;;  %v2158_v33 = vld [vmem:[#allocation8 + $0xf4] sm:$0xf]  ;;  %v2012_v41 = vld [vmem:[#allocation8 + $0x70] sm:$0xf]  ;;  %v380_v43 = vpack.c.bf16 %v318_v32, %v316_v28 }
  0x6d   : > { %703 = vmatpush.bf16.msra.mxu1 %v1909_v5  ;;  %v2078_v34 = vld [vmem:[#allocation8 + $0xf8] sm:$0xf0]  ;;  %v2017_v40 = vor.u32 %v2142_v29, %v2014_v30  ;;  %v2143_v42 = vld [vmem:[#allocation8 + $0x74] sm:$0xf0]  ;;  %v2076_v45 = vld [vmem:[#allocation8 + $0xf0] sm:$0xf] }
  0x6e   : > { %792 = vmatpush.bf16.msra.mxu2 %v1849_v6  ;;  %v319_v38 = vld [vmem:[%s2642_s14 + $0x18] sm:$0xff]  ;;  %v2081_v44 = vor.u32 %v2158_v33, %v2078_v34  ;;  %v2013_v48 = vor.u32 %v2143_v42, %v2012_v41  ;;  %v2140_v50 = vld [vmem:[#allocation8 + $0x64] sm:$0xf]  ;;  %v2006_v51 = vld [vmem:[#allocation8 + $0x68] sm:$0xf0]  ;;  %s2083_s28 = sshll.u32 (%p2548_p11), %s2517_s22, 5 }
  0x6f   : > { %881 = vmatpush.bf16.msra.mxu3 %v1913_v10  ;;  %v2159_v46 = vld [vmem:[#allocation8 + $0xf4] sm:$0xf0]  ;;  %v381_v47 = vpack.c.bf16 %v319_v38, %v317_v37  ;;  %v2156_v52 = vld [vmem:[#allocation8 + $0xe4] sm:$0xf]  ;;  %v2009_v53 = vor.u32 %v2140_v50, %v2006_v51  ;;  %v2070_v54 = vld [vmem:[#allocation8 + $0xe8] sm:$0xf0] }
  0x70   : > { %615 = vmatpush.bf16.msra.mxu0 %v1837_v16  ;;  %v2077_v49 = vor.u32 %v2159_v46, %v2076_v45  ;;  %v2004_v55 = vld [vmem:[#allocation8 + $0x60] sm:$0xf]  ;;  %v2141_v56 = vld [vmem:[#allocation8 + $0x64] sm:$0xf0]  ;;  %v2073_v57 = vor.u32 %v2156_v52, %v2070_v54  ;;  %v322_v63 = vld [vmem:[%s2642_s14 + $0x30] sm:$0xff]  ;;  %s1687_s12 = ssub.s32 (%p2548_p11), 48, %s2083_s28 }
  0x71   : > { %704 = vmatpush.bf16.msra.mxu1 %v1901_v19  ;;  %v2005_v58 = vor.u32 %v2141_v56, %v2004_v55  ;;  %v2068_v59 = vld [vmem:[#allocation8 + $0xe0] sm:$0xf]  ;;  %v2157_v60 = vld [vmem:[#allocation8 + $0xe4] sm:$0xf0]  ;;  %v323_v1 = vld [vmem:[%s2642_s14 + $0x38] sm:$0xff]  ;;  %p1688_p6 = scmp.lt.s32.totalorder (%p2548_p11), %s1687_s12, 32 }
  0x72   : > { %793 = vmatpush.bf16.msra.mxu2 %v1841_v20  ;;  %v2069_v61 = vor.u32 %v2157_v60, %v2068_v59  ;;  %v320_v62 = vld [vmem:[%s2642_s14 + $0x20] sm:$0xff]  ;;  %v321_v0 = vld [vmem:[%s2642_s14 + $0x28] sm:$0xff]  ;;  %v326_v5 = vld [vmem:[%s2642_s14 + $0x50] sm:$0xff] }
  0x73   : > { %882 = vmatpush.bf16.msra.mxu3 %v1905_v24  ;;  %v382_v2 = vpack.c.bf16 %v322_v63, %v320_v62  ;;  %v383_v3 = vpack.c.bf16 %v323_v1, %v321_v0  ;;  %v324_v4 = vld [vmem:[%s2642_s14 + $0x40] sm:$0xff]  ;;  %v325_v6 = vld [vmem:[%s2642_s14 + $0x48] sm:$0xff]  ;;  %v327_v7 = vld [vmem:[%s2642_s14 + $0x58] sm:$0xff] }
  0x74   : > { %616 = vmatpush.bf16.msra.mxu0 %v1829_v31  ;;  %v384_v8 = vpack.c.bf16 %v326_v5, %v324_v4  ;;  %v385_v9 = vpack.c.bf16 %v327_v7, %v325_v6  ;;  %v2138_v10 = vld [vmem:[#allocation8 + $0x54] sm:$0xf]  ;;  %v1998_v11 = vld [vmem:[#allocation8 + $0x58] sm:$0xf0]  ;;  %v1996_v15 = vld [vmem:[#allocation8 + $0x50] sm:$0xf] }
  0x75   : > { %705 = vmatpush.bf16.msra.mxu1 %v1893_v35  ;;  %v2154_v12 = vld [vmem:[#allocation8 + $0xd4] sm:$0xf]  ;;  %v2001_v13 = vor.u32 %v2138_v10, %v1998_v11  ;;  %v2062_v14 = vld [vmem:[#allocation8 + $0xd8] sm:$0xf0]  ;;  %v2139_v16 = vld [vmem:[#allocation8 + $0x54] sm:$0xf0] }
  0x76   : > { %794 = vmatpush.bf16.msra.mxu2 %v1833_v36  ;;  %v2065_v17 = vor.u32 %v2154_v12, %v2062_v14  ;;  %v1997_v18 = vor.u32 %v2139_v16, %v1996_v15  ;;  %v2060_v19 = vld [vmem:[#allocation8 + $0xd0] sm:$0xf]  ;;  %v2155_v20 = vld [vmem:[#allocation8 + $0xd4] sm:$0xf0]  ;;  %v328_v22 = vld [vmem:[%s2642_s14 + $0x60] sm:$0xff] }
  0x77   : > { %883 = vmatpush.bf16.msra.mxu3 %v1897_v39  ;;  %617 = vmatmul.bf16.vlgmr.msra.gmra.mxu0 %v380_v43  ;;  %v2061_v21 = vor.u32 %v2155_v20, %v2060_v19  ;;  %v330_v23 = vld [vmem:[%s2642_s14 + $0x70] sm:$0xff]  ;;  %v329_v24 = vld [vmem:[%s2642_s14 + $0x68] sm:$0xff]  ;;  %v331_v25 = vld [vmem:[%s2642_s14 + $0x78] sm:$0xff] }
  0x78   : > { %706 = vmatmul.bf16.vlgmr.msra.gmra.mxu1 %v381_v47  ;;  %1258 = vmatpush.bf16.msrb.mxu0 %v2013_v48  ;;  %v386_v26 = vpack.c.bf16 %v330_v23, %v328_v22  ;;  %v387_v27 = vpack.c.bf16 %v331_v25, %v329_v24  ;;  %v332_v28 = vld [vmem:[%s2642_s14 + $0x80] sm:$0xff]  ;;  %v334_v29 = vld [vmem:[%s2642_s14 + $0x90] sm:$0xff]  ;;  %v333_v30 = vld [vmem:[%s2642_s14 + $0x88] sm:$0xff] }
  0x79   : > { %795 = vmatmul.bf16.vlgmr.msra.gmra.mxu2 %v380_v43  ;;  %1347 = vmatpush.bf16.msrb.mxu1 %v2077_v49  ;;  %v335_v31 = vld [vmem:[%s2642_s14 + $0x98] sm:$0xff]  ;;  %v388_v32 = vpack.c.bf16 %v334_v29, %v332_v28  ;;  %v2136_v34 = vld [vmem:[#allocation8 + $0x44] sm:$0xf]  ;;  %v1990_v35 = vld [vmem:[#allocation8 + $0x48] sm:$0xf0] }
  0x7a   : > { %1436 = vmatpush.bf16.msrb.mxu2 %v2017_v40  ;;  %884 = vmatmul.bf16.vlgmr.msra.gmra.mxu3 %v381_v47  ;;  %v389_v33 = vpack.c.bf16 %v335_v31, %v333_v30  ;;  %v2152_v36 = vld [vmem:[#allocation8 + $0xc4] sm:$0xf]  ;;  %v1993_v37 = vor.u32 %v2136_v34, %v1990_v35  ;;  %v2054_v38 = vld [vmem:[#allocation8 + $0xc8] sm:$0xf0]  ;;  %v1988_v39 = vld [vmem:[#allocation8 + $0x40] sm:$0xf] }
  0x7b   : > { %1525 = vmatpush.bf16.msrb.mxu3 %v2081_v44  ;;  %v2137_v40 = vld [vmem:[#allocation8 + $0x44] sm:$0xf0]  ;;  %v2057_v41 = vor.u32 %v2152_v36, %v2054_v38  ;;  %v2052_v43 = vld [vmem:[#allocation8 + $0xc0] sm:$0xf]  ;;  %v338_v47 = vld [vmem:[%s2642_s14 + $0xb0] sm:$0xff] }
  0x7c   : > { %1259 = vmatpush.bf16.msrb.mxu0 %v2005_v58  ;;  %v1989_v42 = vor.u32 %v2137_v40, %v1988_v39  ;;  %v2153_v44 = vld [vmem:[#allocation8 + $0xc4] sm:$0xf0]  ;;  %v336_v46 = vld [vmem:[%s2642_s14 + $0xa0] sm:$0xff]  ;;  %v339_v49 = vld [vmem:[%s2642_s14 + $0xb8] sm:$0xff] }
  0x7d   : > { %1348 = vmatpush.bf16.msrb.mxu1 %v2069_v61  ;;  %v2053_v45 = vor.u32 %v2153_v44, %v2052_v43  ;;  %v337_v48 = vld [vmem:[%s2642_s14 + $0xa8] sm:$0xff]  ;;  %v390_v50 = vpack.c.bf16 %v338_v47, %v336_v46  ;;  %v340_v52 = vld [vmem:[%s2642_s14 + $0xc0] sm:$0xff]  ;;  %v343_v55 = vld [vmem:[%s2642_s14 + $0xd8] sm:$0xff] }
  0x7e   : > { %1437 = vmatpush.bf16.msrb.mxu2 %v2009_v53  ;;  %v391_v51 = vpack.c.bf16 %v339_v49, %v337_v48  ;;  %v342_v53 = vld [vmem:[%s2642_s14 + $0xd0] sm:$0xff]  ;;  %v341_v54 = vld [vmem:[%s2642_s14 + $0xc8] sm:$0xff]  ;;  %v1982_v59 = vld [vmem:[#allocation8 + $0x38] sm:$0xf0] }
  0x7f   : > { %1526 = vmatpush.bf16.msrb.mxu3 %v2073_v57  ;;  %v392_v56 = vpack.c.bf16 %v342_v53, %v340_v52  ;;  %v393_v57 = vpack.c.bf16 %v343_v55, %v341_v54  ;;  %v2134_v58 = vld [vmem:[#allocation8 + $0x34] sm:$0xf]  ;;  %v2046_v62 = vld [vmem:[#allocation8 + $0xb8] sm:$0xf0]  ;;  %v1980_v5 = vld [vmem:[#allocation8 + $0x30] sm:$0xf] }
  0x80   : > { %1260 = vmatpush.bf16.msrb.mxu0 %v1997_v18  ;;  %v2150_v60 = vld [vmem:[#allocation8 + $0xb4] sm:$0xf]  ;;  %v1985_v61 = vor.u32 %v2134_v58, %v1982_v59  ;;  %v344_v0 = vld [vmem:[%s2642_s14 + $0xe0] sm:$0xff]  ;;  %v2135_v6 = vld [vmem:[#allocation8 + $0x34] sm:$0xf0] }
  0x81   : > { %1349 = vmatpush.bf16.msrb.mxu1 %v2061_v21  ;;  %v2049_v63 = vor.u32 %v2150_v60, %v2046_v62  ;;  %v346_v1 = vld [vmem:[%s2642_s14 + $0xf0] sm:$0xff]  ;;  %v2151_v10 = vld [vmem:[#allocation8 + $0xb4] sm:$0xf0]  ;;  %v314_v12 = vld [vmem:[#allocation7] sm:$0x3] }
  0x82   : > { %1438 = vmatpush.bf16.msrb.mxu2 %v2001_v13  ;;  %v394_v4 = vpack.c.bf16 %v346_v1, %v344_v0  ;;  %v2044_v7 = vld [vmem:[#allocation8 + $0xb0] sm:$0xf]  ;;  %v348_v13 = vld [vmem:[%s2642_s14 + $0x100] sm:$0xff]  ;;  %v2690_v15 = vperm.slane %v314_v12, 0  ;;  %v349_v16 = vld [vmem:[%s2642_s14 + $0x108] sm:$0xff]  ;;  %v2695_v24 = vperm.slane %v314_v12, 1 }
  0x83   : > { %1527 = vmatpush.bf16.msrb.mxu3 %v2065_v17  ;;  %v2045_v11 = vor.u32 %v2151_v10, %v2044_v7  ;;  %v350_v14 = vld [vmem:[%s2642_s14 + $0x110] sm:$0xff]  ;;  %v351_v17 = vld [vmem:[%s2642_s14 + $0x118] sm:$0xff]  ;;  %v2132_v25 = vld [vmem:[#allocation8 + $0x24] sm:$0xf] }
  0x84   : > { %1261 = vmatpush.bf16.msrb.mxu0 %v1989_v42  ;;  %v396_v18 = vpack.c.bf16 %v350_v14, %v348_v13  ;;  %v397_v20 = vpack.c.bf16 %v351_v17, %v349_v16  ;;  %v2148_v28 = vld [vmem:[#allocation8 + $0xa4] sm:$0xf]  ;;  %v2038_v29 = vld [vmem:[#allocation8 + $0xa8] sm:$0xf0]  ;;  %v355_v42 = vld [vmem:[%s2642_s14 + $0x138] sm:$0xff] }
  0x85   : > { %1350 = vmatpush.bf16.msrb.mxu1 %v2053_v45  ;;  %v2041_v31 = vor.u32 %v2148_v28, %v2038_v29  ;;  %v352_v39 = vld [vmem:[%s2642_s14 + $0x120] sm:$0xff]  ;;  %v354_v40 = vld [vmem:[%s2642_s14 + $0x130] sm:$0xff]  ;;  %v2133_v46 = vld [vmem:[#allocation8 + $0x24] sm:$0xf0] }
  0x86   : > { %1439 = vmatpush.bf16.msrb.mxu2 %v1993_v37  ;;  %v1972_v45 = vld [vmem:[#allocation8 + $0x20] sm:$0xf]  ;;  %v2149_v49 = vld [vmem:[#allocation8 + $0xa4] sm:$0xf0]  ;;  %v398_v52 = vpack.c.bf16 %v354_v40, %v352_v39  ;;  %v358_v10 = vld [vmem:[%s2642_s14 + $0x150] sm:$0xff] }
  0x87   : > { %622 = vmatmul.bf16.gmra.mxu0 %v382_v2  ;;  %1528 = vmatpush.bf16.msrb.mxu3 %v2057_v41  ;;  %v353_v41 = vld [vmem:[%s2642_s14 + $0x128] sm:$0xff]  ;;  %v1973_v47 = vor.u32 %v2133_v46, %v1972_v45  ;;  %v2036_v48 = vld [vmem:[#allocation8 + $0xa0] sm:$0xf]  ;;  %v359_v14 = vld [vmem:[%s2642_s14 + $0x158] sm:$0xff] }
  0x88   : > { %711 = vmatmul.bf16.gmra.mxu1 %v383_v3  ;;  %v2037_v53 = vor.u32 %v2149_v49, %v2036_v48  ;;  %v357_v13 = vld [vmem:[%s2642_s14 + $0x148] sm:$0xff]  ;;  %v360_v45 = vld [vmem:[%s2642_s14 + $0x160] sm:$0xff]  ;;  %v362_v46 = vld [vmem:[%s2642_s14 + $0x170] sm:$0xff] }
  0x89   : > { %800 = vmatmul.bf16.gmra.mxu2 %v382_v2  ;;  %v345_v2 = vld [vmem:[%s2642_s14 + $0xe8] sm:$0xff]  ;;  %1351 = vmatpush.bf16.msrb.mxu1 %v2045_v11  ;;  %v363_v48 = vld [vmem:[%s2642_s14 + $0x178] sm:$0xff] }
  0x8a   : > { %889 = vmatmul.bf16.gmra.mxu3 %v383_v3  ;;  %1440 = vmatpush.bf16.msrb.mxu2 %v1985_v61  ;;  %v347_v3 = vld [vmem:[%s2642_s14 + $0xf8] sm:$0xff] }
  0x8b   : > { %1529 = vmatpush.bf16.msrb.mxu3 %v2049_v63 }
  0x8d   : > { %1352 = vmatpush.bf16.msrb.mxu1 %v2037_v53  ;;  %v2131_v53 = vld [vmem:[#allocation8 + $0x14] sm:$0xf0] }
  0x8f   : > { %1530 = vmatpush.bf16.msrb.mxu3 %v2041_v31  ;;  %v1966_v31 = vld [vmem:[#allocation8 + $0x18] sm:$0xf0] }
  0x97   : > { %627 = vmatmul.bf16.gmra.mxu0 %v384_v8 }
  0x98   : > { %716 = vmatmul.bf16.gmra.mxu1 %v385_v9 }
  0x99   : > { %805 = vmatmul.bf16.gmra.mxu2 %v384_v8  ;;  %v395_v8 = vpack.c.bf16 %v347_v3, %v345_v2 }
  0x9a   : > { %894 = vmatmul.bf16.gmra.mxu3 %v385_v9  ;;  %v1981_v9 = vor.u32 %v2135_v6, %v1980_v5 }
  0x9c   : > { %1262 = vmatpush.bf16.msrb.mxu0 %v1981_v9  ;;  %v356_v9 = vld [vmem:[%s2642_s14 + $0x140] sm:$0xff] }
  0x9d   : > { %v400_v17 = vpack.c.bf16 %v358_v10, %v356_v9 }
  0xa0   : > { %1263 = vmatpush.bf16.msrb.mxu0 %v1973_v47  ;;  %v361_v47 = vld [vmem:[%s2642_s14 + $0x168] sm:$0xff] }
  0xa7   : > { %632 = vmatmul.bf16.gmra.mxu0 %v386_v26 }
  0xa8   : > { %721 = vmatmul.bf16.gmra.mxu1 %v387_v27 }
  0xa9   : > { %810 = vmatmul.bf16.gmra.mxu2 %v386_v26  ;;  %v1974_v26 = vld [vmem:[#allocation8 + $0x28] sm:$0xf0] }
  0xaa   : > { %899 = vmatmul.bf16.gmra.mxu3 %v387_v27  ;;  %v1977_v27 = vor.u32 %v2132_v25, %v1974_v26 }
  0xac   : > { %1441 = vmatpush.bf16.msrb.mxu2 %v1977_v27 }
  0xb7   : > { %637 = vmatmul.bf16.gmra.mxu0 %v388_v32 }
  0xb8   : > { %726 = vmatmul.bf16.gmra.mxu1 %v389_v33 }
  0xb9   : > { %815 = vmatmul.bf16.gmra.mxu2 %v388_v32 }
  0xba   : > { %904 = vmatmul.bf16.gmra.mxu3 %v389_v33 }
  0xc7   : > { %642 = vmatmul.bf16.gmra.mxu0 %v390_v50 }
  0xc8   : > { %731 = vmatmul.bf16.gmra.mxu1 %v391_v51 }
  0xc9   : > { %820 = vmatmul.bf16.gmra.mxu2 %v390_v50 }
  0xca   : > { %909 = vmatmul.bf16.gmra.mxu3 %v391_v51 }
  0xd7   : > { %647 = vmatmul.bf16.gmra.mxu0 %v392_v56 }
  0xd8   : > { %736 = vmatmul.bf16.gmra.mxu1 %v393_v57 }
  0xd9   : > { %825 = vmatmul.bf16.gmra.mxu2 %v392_v56 }
  0xda   : > { %914 = vmatmul.bf16.gmra.mxu3 %v393_v57  ;;  %v399_v57 = vpack.c.bf16 %v355_v42, %v353_v41 }
  0xe7   : > { %652 = vmatmul.bf16.gmra.mxu0 %v394_v4 }
  0xe8   : > { %741 = vmatmul.bf16.gmra.mxu1 %v395_v8 }
  0xe9   : > { %830 = vmatmul.bf16.gmra.mxu2 %v394_v4 }
  0xea   : > { %919 = vmatmul.bf16.gmra.mxu3 %v395_v8 }
  0xf4   : > { %v618_v19 = vpop.f32.mrf.mxu0 }
  0xf5   : > { %v619_v21 = vadd.f32 %v618_v19, %v2690_v15  ;;  %v707_v22 = vpop.f32.mrf.mxu1 }
  0xf7   : > { %v708_v23 = vadd.f32 %v707_v22, %v619_v21  ;;  %657 = vmatmul.bf16.gmra.mxu0 %v396_v18  ;;  %v401_v22 = vpack.c.bf16 %v359_v14, %v357_v13 }
  0xf8   : > { %746 = vmatmul.bf16.gmra.mxu1 %v397_v20 }
  0xf9   : > { %835 = vmatmul.bf16.gmra.mxu2 %v396_v18  ;;  %v965_v43 = vmax.f32 %v708_v23, 0.0 }
  0xfa   : > { %924 = vmatmul.bf16.gmra.mxu3 %v397_v20 }
  0xfc   : > { %v796_v30 = vpop.f32.mrf.mxu2  ;;  %v620_v34 = vpop.f32.mrf.mxu0 }
  0xfd   : > { %v797_v32 = vadd.f32 %v796_v30, %v2695_v24  ;;  %v885_v33 = vpop.f32.mrf.mxu3  ;;  %v621_v35 = vadd.f32 %v620_v34, %v2690_v15  ;;  %v709_v36 = vpop.f32.mrf.mxu1  ;;  %v2130_v30 = vld [vmem:[#allocation8 + $0x14] sm:$0xf]  ;;  %v2030_v34 = vld [vmem:[#allocation8 + $0x98] sm:$0xf0] }
  0xff   : > { %v886_v37 = vadd.f32 %v885_v33, %v797_v32  ;;  %v710_v38 = vadd.f32 %v709_v36, %v621_v35  ;;  %v1969_v32 = vor.u32 %v2130_v30, %v1966_v31  ;;  %v2146_v33 = vld [vmem:[#allocation8 + $0x94] sm:$0xf] }
 0x101   : > { %v967_v44 = vmax.f32 %v710_v38, 0.0  ;;  %v966_v62 = vmax.f32 %v886_v37, 0.0  ;;  %v2033_v37 = vor.u32 %v2146_v33, %v2030_v34  ;;  %1442 = vmatpush.bf16.msrb.mxu2 %v1969_v32 }
 0x103   : > { %v2703_v50 = vpack.c.bf16 %v967_v44, %v965_v43  ;;  %1531 = vmatpush.bf16.msrb.mxu3 %v2033_v37 }
 0x104   : > { %v798_v51 = vpop.f32.mrf.mxu2  ;;  %v623_v56 = vpop.f32.mrf.mxu0 }
 0x105   : > { %v799_v54 = vadd.f32 %v798_v51, %v2695_v24  ;;  %v887_v55 = vpop.f32.mrf.mxu3  ;;  %v624_v58 = vadd.f32 %v623_v56, %v2690_v15  ;;  %v712_v59 = vpop.f32.mrf.mxu1  ;;  %v2147_v56 = vld [vmem:[#allocation8 + $0x94] sm:$0xf0] }
 0x107   : > { %v888_v60 = vadd.f32 %v887_v55, %v799_v54  ;;  %v713_v61 = vadd.f32 %v712_v59, %v624_v58  ;;  %662 = vmatmul.bf16.gmra.mxu0 %v398_v52  ;;  %v2028_v55 = vld [vmem:[#allocation8 + $0x90] sm:$0xf]  ;;  %v402_v58 = vpack.c.bf16 %v362_v46, %v360_v45 }
 0x108   : > { %751 = vmatmul.bf16.gmra.mxu1 %v399_v57  ;;  %v2029_v59 = vor.u32 %v2147_v56, %v2028_v55  ;;  %v368_v56 = vld [vmem:[%s2642_s14 + $0x1a0] sm:$0xff] }
 0x109   : > { %v968_v63 = vmax.f32 %v888_v60, 0.0  ;;  %840 = vmatmul.bf16.gmra.mxu2 %v398_v52  ;;  %v969_v11 = vmax.f32 %v713_v61, 0.0  ;;  %v1964_v52 = vld [vmem:[#allocation8 + $0x10] sm:$0xf] }
 0x10a   : > { %929 = vmatmul.bf16.gmra.mxu3 %v399_v57  ;;  %v1965_v54 = vor.u32 %v2131_v53, %v1964_v52  ;;  %1353 = vmatpush.bf16.msrb.mxu1 %v2029_v59  ;;  %v371_v59 = vld [vmem:[%s2642_s14 + $0x1b8] sm:$0xff] }
 0x10b   : > { %v2707_v0 = vpack.c.bf16 %v968_v63, %v966_v62 }
 0x10c   : > { %v801_v1 = vpop.f32.mrf.mxu2  ;;  %v625_v4 = vpop.f32.mrf.mxu0  ;;  %1264 = vmatpush.bf16.msrb.mxu0 %v1965_v54 }
 0x10d   : > { %v802_v2 = vadd.f32 %v801_v1, %v2695_v24  ;;  %v890_v3 = vpop.f32.mrf.mxu3  ;;  %v626_v5 = vadd.f32 %v625_v4, %v2690_v15  ;;  %v714_v6 = vpop.f32.mrf.mxu1  ;;  %v403_v1 = vpack.c.bf16 %v363_v48, %v361_v47 }
 0x10f   : > { %v891_v7 = vadd.f32 %v890_v3, %v802_v2  ;;  %v715_v8 = vadd.f32 %v714_v6, %v626_v5 }
 0x111   : > { %v971_v12 = vmax.f32 %v715_v8, 0.0  ;;  %v970_v28 = vmax.f32 %v891_v7, 0.0 }
 0x113   : > { %v2715_v18 = vpack.c.bf16 %v971_v12, %v969_v11 }
 0x114   : > { %v803_v16 = vpop.f32.mrf.mxu2  ;;  %v628_v21 = vpop.f32.mrf.mxu0 }
 0x115   : > { %v804_v19 = vadd.f32 %v803_v16, %v2695_v24  ;;  %v892_v20 = vpop.f32.mrf.mxu3  ;;  %v629_v23 = vadd.f32 %v628_v21, %v2690_v15  ;;  %v717_v25 = vpop.f32.mrf.mxu1 }
 0x117   : > { %v893_v26 = vadd.f32 %v892_v20, %v804_v19  ;;  %v718_v27 = vadd.f32 %v717_v25, %v629_v23  ;;  %667 = vmatmul.bf16.gmra.mxu0 %v400_v17  ;;  %v364_v19 = vld [vmem:[%s2642_s14 + $0x180] sm:$0xff]  ;;  %v366_v20 = vld [vmem:[%s2642_s14 + $0x190] sm:$0xff]  ;;  %v365_v23 = vld [vmem:[%s2642_s14 + $0x188] sm:$0xff] }
 0x118   : > { %756 = vmatmul.bf16.gmra.mxu1 %v401_v22  ;;  %v367_v25 = vld [vmem:[%s2642_s14 + $0x198] sm:$0xff] }
 0x119   : > { %v972_v29 = vmax.f32 %v893_v26, 0.0  ;;  %845 = vmatmul.bf16.gmra.mxu2 %v400_v17  ;;  %v973_v49 = vmax.f32 %v718_v27, 0.0  ;;  %v404_v27 = vpack.c.bf16 %v366_v20, %v364_v19  ;;  %v405_v32 = vpack.c.bf16 %v367_v25, %v365_v23 }
 0x11a   : > { %934 = vmatmul.bf16.gmra.mxu3 %v401_v22 }
 0x11b   : > { %v2719_v35 = vpack.c.bf16 %v972_v29, %v970_v28 }
 0x11c   : > { %v806_v36 = vpop.f32.mrf.mxu2  ;;  %v630_v40 = vpop.f32.mrf.mxu0 }
 0x11d   : > { %v807_v38 = vadd.f32 %v806_v36, %v2695_v24  ;;  %v895_v39 = vpop.f32.mrf.mxu3  ;;  %v631_v41 = vadd.f32 %v630_v40, %v2690_v15  ;;  %v719_v42 = vpop.f32.mrf.mxu1  ;;  %v2128_v40 = vld [vmem:[#allocation8 + $0x4] sm:$0xf] }
 0x11f   : > { %v896_v43 = vadd.f32 %v895_v39, %v807_v38  ;;  %v720_v44 = vadd.f32 %v719_v42, %v631_v41  ;;  %v1958_v41 = vld [vmem:[#allocation8 + $0x8] sm:$0xf0] }
 0x120   : > { %v1961_v42 = vor.u32 %v2128_v40, %v1958_v41 }
 0x121   : > { %v975_v51 = vmax.f32 %v720_v44, 0.0  ;;  %v974_v6 = vmax.f32 %v896_v43, 0.0  ;;  %v2144_v43 = vld [vmem:[#allocation8 + $0x84] sm:$0xf]  ;;  %v2022_v44 = vld [vmem:[#allocation8 + $0x88] sm:$0xf0] }
 0x122   : > { %v2025_v47 = vor.u32 %v2144_v43, %v2022_v44  ;;  %1443 = vmatpush.bf16.msrb.mxu2 %v1961_v42 }
 0x123   : > { %v2727_v60 = vpack.c.bf16 %v975_v51, %v973_v49 }
 0x124   : > { %v808_v57 = vpop.f32.mrf.mxu2  ;;  %v633_v63 = vpop.f32.mrf.mxu0  ;;  %1532 = vmatpush.bf16.msrb.mxu3 %v2025_v47 }
 0x125   : > { %v809_v61 = vadd.f32 %v808_v57, %v2695_v24  ;;  %v897_v62 = vpop.f32.mrf.mxu3  ;;  %v634_v2 = vadd.f32 %v633_v63, %v2690_v15  ;;  %v722_v3 = vpop.f32.mrf.mxu1  ;;  %v370_v57 = vld [vmem:[%s2642_s14 + $0x1b0] sm:$0xff]  ;;  %v1956_v63 = vld [vmem:[#allocation8] sm:$0xf] }
 0x127   : > { %v898_v4 = vadd.f32 %v897_v62, %v809_v61  ;;  %v723_v5 = vadd.f32 %v722_v3, %v634_v2  ;;  %672 = vmatmul.bf16.gmra.mxu0 %v402_v58  ;;  %v2020_v3 = vld [vmem:[#allocation8 + $0x80] sm:$0xf] }
 0x128   : > { %761 = vmatmul.bf16.gmra.mxu1 %v403_v1 }
 0x129   : > { %v976_v7 = vmax.f32 %v898_v4, 0.0  ;;  %850 = vmatmul.bf16.gmra.mxu2 %v402_v58  ;;  %v977_v21 = vmax.f32 %v723_v5, 0.0  ;;  %v369_v58 = vld [vmem:[%s2642_s14 + $0x1a8] sm:$0xff] }
 0x12a   : > { %939 = vmatmul.bf16.gmra.mxu3 %v403_v1  ;;  %v2129_v1 = vld [vmem:[#allocation8 + $0x4] sm:$0xf0] }
 0x12b   : > { %v2731_v8 = vpack.c.bf16 %v976_v7, %v974_v6  ;;  %v1957_v2 = vor.u32 %v2129_v1, %v1956_v63  ;;  %v2145_v4 = vld [vmem:[#allocation8 + $0x84] sm:$0xf0]  ;;  %v406_v6 = vpack.c.bf16 %v370_v57, %v368_v56 }
 0x12c   : > { %v811_v9 = vpop.f32.mrf.mxu2  ;;  %v635_v12 = vpop.f32.mrf.mxu0  ;;  %v2021_v7 = vor.u32 %v2145_v4, %v2020_v3  ;;  %v378_v3 = vld [vmem:[%s2642_s14 + $0x1f0] sm:$0xff] }
 0x12d   : > { %v812_v10 = vadd.f32 %v811_v9, %v2695_v24  ;;  %v900_v11 = vpop.f32.mrf.mxu3  ;;  %v636_v13 = vadd.f32 %v635_v12, %v2690_v15  ;;  %v724_v14 = vpop.f32.mrf.mxu1  ;;  %1265 = vmatpush.bf16.msrb.mxu0 %v1957_v2  ;;  %v376_v2 = vld [vmem:[%s2642_s14 + $0x1e0] sm:$0xff] }
 0x12e   : > { %1354 = vmatpush.bf16.msrb.mxu1 %v2021_v7  ;;  %v379_v7 = vld [vmem:[%s2642_s14 + $0x1f8] sm:$0xff] }
 0x12f   : > { %v901_v16 = vadd.f32 %v900_v11, %v812_v10  ;;  %v725_v17 = vadd.f32 %v724_v14, %v636_v13  ;;  %v407_v13 = vpack.c.bf16 %v371_v59, %v369_v58 }
 0x131   : > { %v979_v22 = vmax.f32 %v725_v17, 0.0  ;;  %v978_v38 = vmax.f32 %v901_v16, 0.0 }
 0x133   : > { %v2739_v28 = vpack.c.bf16 %v979_v22, %v977_v21 }
 0x134   : > { %v813_v26 = vpop.f32.mrf.mxu2  ;;  %v638_v31 = vpop.f32.mrf.mxu0 }
 0x135   : > { %v814_v29 = vadd.f32 %v813_v26, %v2695_v24  ;;  %v902_v30 = vpop.f32.mrf.mxu3  ;;  %v639_v33 = vadd.f32 %v638_v31, %v2690_v15  ;;  %v727_v34 = vpop.f32.mrf.mxu1 }
 0x137   : > { %v903_v36 = vadd.f32 %v902_v30, %v814_v29  ;;  %v728_v37 = vadd.f32 %v727_v34, %v639_v33  ;;  %677 = vmatmul.bf16.gmra.mxu0 %v404_v27  ;;  %v372_v33 = vld [vmem:[%s2642_s14 + $0x1c0] sm:$0xff]  ;;  %v374_v34 = vld [vmem:[%s2642_s14 + $0x1d0] sm:$0xff] }
 0x138   : > { %766 = vmatmul.bf16.gmra.mxu1 %v405_v32  ;;  %v408_v41 = vpack.c.bf16 %v374_v34, %v372_v33 }
 0x139   : > { %v980_v39 = vmax.f32 %v903_v36, 0.0  ;;  %855 = vmatmul.bf16.gmra.mxu2 %v404_v27  ;;  %v981_v61 = vmax.f32 %v728_v37, 0.0 }
 0x13a   : > { %944 = vmatmul.bf16.gmra.mxu3 %v405_v32 }
 0x13b   : > { %v2743_v45 = vpack.c.bf16 %v980_v39, %v978_v38  ;;  %v373_v38 = vld [vmem:[%s2642_s14 + $0x1c8] sm:$0xff]  ;;  %v375_v39 = vld [vmem:[%s2642_s14 + $0x1d8] sm:$0xff] }
 0x13c   : > { %v816_v46 = vpop.f32.mrf.mxu2  ;;  %v640_v51 = vpop.f32.mrf.mxu0  ;;  %v409_v47 = vpack.c.bf16 %v375_v39, %v373_v38 }
 0x13d   : > { %v817_v48 = vadd.f32 %v816_v46, %v2695_v24  ;;  %v905_v49 = vpop.f32.mrf.mxu3  ;;  %v641_v52 = vadd.f32 %v640_v51, %v2690_v15  ;;  %v729_v53 = vpop.f32.mrf.mxu1 }
 0x13f   : > { %v906_v54 = vadd.f32 %v905_v49, %v817_v48  ;;  %v730_v55 = vadd.f32 %v729_v53, %v641_v52 }
 0x141   : > { %v983_v62 = vmax.f32 %v730_v55, 0.0  ;;  %v982_v20 = vmax.f32 %v906_v54, 0.0 }
 0x143   : > { %v2751_v9 = vpack.c.bf16 %v983_v62, %v981_v61 }
 0x144   : > { %v818_v5 = vpop.f32.mrf.mxu2  ;;  %v643_v12 = vpop.f32.mrf.mxu0 }
 0x145   : > { %v819_v10 = vadd.f32 %v818_v5, %v2695_v24  ;;  %v907_v11 = vpop.f32.mrf.mxu3  ;;  %v644_v14 = vadd.f32 %v643_v12, %v2690_v15  ;;  %v732_v16 = vpop.f32.mrf.mxu1 }
 0x147   : > { %v908_v17 = vadd.f32 %v907_v11, %v819_v10  ;;  %v733_v19 = vadd.f32 %v732_v16, %v644_v14  ;;  %682 = vmatmul.bf16.gmra.mxu0 %v406_v6  ;;  %v410_v11 = vpack.c.bf16 %v378_v3, %v376_v2 }
 0x148   : > { %771 = vmatmul.bf16.gmra.mxu1 %v407_v13 }
 0x149   : > { %v984_v21 = vmax.f32 %v908_v17, 0.0  ;;  %860 = vmatmul.bf16.gmra.mxu2 %v406_v6  ;;  %v985_v36 = vmax.f32 %v733_v19, 0.0  ;;  %v377_v6 = vld [vmem:[%s2642_s14 + $0x1e8] sm:$0xff] }
 0x14a   : > { %949 = vmatmul.bf16.gmra.mxu3 %v407_v13  ;;  %v411_v17 = vpack.c.bf16 %v379_v7, %v377_v6 }
 0x14b   : > { %v2755_v22 = vpack.c.bf16 %v984_v21, %v982_v20 }
 0x14c   : > { %v821_v23 = vpop.f32.mrf.mxu2  ;;  %v645_v27 = vpop.f32.mrf.mxu0 }
 0x14d   : > { %v822_v25 = vadd.f32 %v821_v23, %v2695_v24  ;;  %v910_v26 = vpop.f32.mrf.mxu3  ;;  %v646_v29 = vadd.f32 %v645_v27, %v2690_v15  ;;  %v734_v30 = vpop.f32.mrf.mxu1 }
 0x14f   : > { %v911_v31 = vadd.f32 %v910_v26, %v822_v25  ;;  %v735_v32 = vadd.f32 %v734_v30, %v646_v29 }
 0x151   : > { %v987_v37 = vmax.f32 %v735_v32, 0.0  ;;  %v986_v53 = vmax.f32 %v911_v31, 0.0 }
 0x153   : > { %v2763_v42 = vpack.c.bf16 %v987_v37, %v985_v36 }
 0x154   : > { %v823_v40 = vpop.f32.mrf.mxu2  ;;  %v648_v46 = vpop.f32.mrf.mxu0 }
 0x155   : > { %v824_v43 = vadd.f32 %v823_v40, %v2695_v24  ;;  %v912_v44 = vpop.f32.mrf.mxu3  ;;  %v649_v48 = vadd.f32 %v648_v46, %v2690_v15  ;;  %v737_v49 = vpop.f32.mrf.mxu1 }
 0x157   : > { %v913_v51 = vadd.f32 %v912_v44, %v824_v43  ;;  %v738_v52 = vadd.f32 %v737_v49, %v649_v48  ;;  %687 = vmatmul.bf16.gmra.mxu0 %v408_v41 }
 0x158   : > { %776 = vmatmul.bf16.gmra.mxu1 %v409_v47 }
 0x159   : > { %v988_v54 = vmax.f32 %v913_v51, 0.0  ;;  %865 = vmatmul.bf16.gmra.mxu2 %v408_v41  ;;  %v989_v4 = vmax.f32 %v738_v52, 0.0 }
 0x15a   : > { %954 = vmatmul.bf16.gmra.mxu3 %v409_v47 }
 0x15b   : > { %v2767_v55 = vpack.c.bf16 %v988_v54, %v986_v53 }
 0x15c   : > { %v826_v56 = vpop.f32.mrf.mxu2  ;;  %v650_v59 = vpop.f32.mrf.mxu0 }
 0x15d   : > { %v827_v57 = vadd.f32 %v826_v56, %v2695_v24  ;;  %v915_v58 = vpop.f32.mrf.mxu3  ;;  %v651_v61 = vadd.f32 %v650_v59, %v2690_v15  ;;  %v739_v62 = vpop.f32.mrf.mxu1 }
 0x15f   : > { %v916_v63 = vadd.f32 %v915_v58, %v827_v57  ;;  %v740_v1 = vadd.f32 %v739_v62, %v651_v61 }
 0x161   : > { %v991_v5 = vmax.f32 %v740_v1, 0.0  ;;  %v990_v25 = vmax.f32 %v916_v63, 0.0 }
 0x163   : > { %v2775_v12 = vpack.c.bf16 %v991_v5, %v989_v4 }
 0x164   : > { %v828_v10 = vpop.f32.mrf.mxu2  ;;  %v653_v16 = vpop.f32.mrf.mxu0 }
 0x165   : > { %v829_v13 = vadd.f32 %v828_v10, %v2695_v24  ;;  %v917_v14 = vpop.f32.mrf.mxu3  ;;  %v654_v19 = vadd.f32 %v653_v16, %v2690_v15  ;;  %v742_v20 = vpop.f32.mrf.mxu1 }
 0x167   : > { %v918_v21 = vadd.f32 %v917_v14, %v829_v13  ;;  %v743_v23 = vadd.f32 %v742_v20, %v654_v19  ;;  %692 = vmatmul.bf16.gmra.mxu0 %v410_v11 }
 0x168   : > { %781 = vmatmul.bf16.gmra.mxu1 %v411_v17 }
 0x169   : > { %v992_v26 = vmax.f32 %v918_v21, 0.0  ;;  %870 = vmatmul.bf16.gmra.mxu2 %v410_v11  ;;  %v993_v38 = vmax.f32 %v743_v23, 0.0 }
 0x16a   : > { %959 = vmatmul.bf16.gmra.mxu3 %v411_v17 }
 0x16b   : > { %v2779_v27 = vpack.c.bf16 %v992_v26, %v990_v25 }
 0x16c   : > { %v831_v29 = vpop.f32.mrf.mxu2  ;;  %v655_v32 = vpop.f32.mrf.mxu0 }
 0x16d   : > { %v832_v30 = vadd.f32 %v831_v29, %v2695_v24  ;;  %v920_v31 = vpop.f32.mrf.mxu3  ;;  %v656_v33 = vadd.f32 %v655_v32, %v2690_v15  ;;  %v744_v34 = vpop.f32.mrf.mxu1 }
 0x16f   : > { %v921_v36 = vadd.f32 %v920_v31, %v832_v30  ;;  %v745_v37 = vadd.f32 %v744_v34, %v656_v33 }
 0x171   : > { %v995_v39 = vmax.f32 %v745_v37, 0.0  ;;  %v994_v52 = vmax.f32 %v921_v36, 0.0 }
 0x173   : > { %v2783_v41 = vpack.c.bf16 %v995_v39, %v993_v38 }
 0x174   : > { %v833_v40 = vpop.f32.mrf.mxu2  ;;  %v658_v46 = vpop.f32.mrf.mxu0 }
 0x175   : > { %v834_v43 = vadd.f32 %v833_v40, %v2695_v24  ;;  %v922_v44 = vpop.f32.mrf.mxu3  ;;  %v659_v47 = vadd.f32 %v658_v46, %v2690_v15  ;;  %v747_v48 = vpop.f32.mrf.mxu1 }
 0x177   : > { %v923_v49 = vadd.f32 %v922_v44, %v834_v43  ;;  %v748_v51 = vadd.f32 %v747_v48, %v659_v47  ;;  %1266 = vmatmul.bf16.vlgmr.msrb.gmra.mxu0 %v2703_v50 }
 0x178   : > { %1355 = vmatmul.bf16.vlgmr.msrb.gmra.mxu1 %v2707_v0 }
 0x179   : > { %v996_v53 = vmax.f32 %v923_v49, 0.0  ;;  %1444 = vmatmul.bf16.vlgmr.msrb.gmra.mxu2 %v2703_v50  ;;  %v997_v2 = vmax.f32 %v748_v51, 0.0 }
 0x17a   : > { %1533 = vmatmul.bf16.vlgmr.msrb.gmra.mxu3 %v2707_v0 }
 0x17b   : > { %v2791_v54 = vpack.c.bf16 %v996_v53, %v994_v52 }
 0x17c   : > { %v836_v56 = vpop.f32.mrf.mxu2  ;;  %v660_v59 = vpop.f32.mrf.mxu0 }
 0x17d   : > { %v837_v57 = vadd.f32 %v836_v56, %v2695_v24  ;;  %v925_v58 = vpop.f32.mrf.mxu3  ;;  %v661_v61 = vadd.f32 %v660_v59, %v2690_v15  ;;  %v749_v62 = vpop.f32.mrf.mxu1 }
 0x17f   : > { %v926_v63 = vadd.f32 %v925_v58, %v837_v57  ;;  %v750_v1 = vadd.f32 %v749_v62, %v661_v61 }
 0x181   : > { %v999_v3 = vmax.f32 %v750_v1, 0.0  ;;  %v998_v14 = vmax.f32 %v926_v63, 0.0 }
 0x183   : > { %v2795_v5 = vpack.c.bf16 %v999_v3, %v997_v2 }
 0x184   : > { %v838_v4 = vpop.f32.mrf.mxu2  ;;  %v663_v6 = vpop.f32.mrf.mxu0 }
 0x185   : > { %v839_v50 = vadd.f32 %v838_v4, %v2695_v24  ;;  %v927_v0 = vpop.f32.mrf.mxu3  ;;  %v664_v7 = vadd.f32 %v663_v6, %v2690_v15  ;;  %v752_v10 = vpop.f32.mrf.mxu1 }
 0x187   : > { %v928_v11 = vadd.f32 %v927_v0, %v839_v50  ;;  %v753_v13 = vadd.f32 %v752_v10, %v664_v7  ;;  %1271 = vmatmul.bf16.gmra.mxu0 %v2715_v18 }
 0x188   : > { %1360 = vmatmul.bf16.gmra.mxu1 %v2719_v35 }
 0x189   : > { %v1000_v16 = vmax.f32 %v928_v11, 0.0  ;;  %1449 = vmatmul.bf16.gmra.mxu2 %v2715_v18  ;;  %v1001_v31 = vmax.f32 %v753_v13, 0.0 }
 0x18a   : > { %1538 = vmatmul.bf16.gmra.mxu3 %v2719_v35 }
 0x18b   : > { %v2803_v17 = vpack.c.bf16 %v1000_v16, %v998_v14 }
 0x18c   : > { %v841_v19 = vpop.f32.mrf.mxu2  ;;  %v665_v23 = vpop.f32.mrf.mxu0 }
 0x18d   : > { %v842_v20 = vadd.f32 %v841_v19, %v2695_v24  ;;  %v930_v21 = vpop.f32.mrf.mxu3  ;;  %v666_v25 = vadd.f32 %v665_v23, %v2690_v15  ;;  %v754_v26 = vpop.f32.mrf.mxu1 }
 0x18f   : > { %v931_v29 = vadd.f32 %v930_v21, %v842_v20  ;;  %v755_v30 = vadd.f32 %v754_v26, %v666_v25 }
 0x191   : > { %v1003_v32 = vmax.f32 %v755_v30, 0.0  ;;  %v1002_v43 = vmax.f32 %v931_v29, 0.0 }
 0x193   : > { %v2807_v34 = vpack.c.bf16 %v1003_v32, %v1001_v31 }
 0x194   : > { %v843_v33 = vpop.f32.mrf.mxu2  ;;  %v668_v36 = vpop.f32.mrf.mxu0 }
 0x195   : > { %v844_v18 = vadd.f32 %v843_v33, %v2695_v24  ;;  %v932_v35 = vpop.f32.mrf.mxu3  ;;  %v669_v37 = vadd.f32 %v668_v36, %v2690_v15  ;;  %v757_v38 = vpop.f32.mrf.mxu1 }
 0x197   : > { %v933_v39 = vadd.f32 %v932_v35, %v844_v18  ;;  %v758_v40 = vadd.f32 %v757_v38, %v669_v37  ;;  %1276 = vmatmul.bf16.gmra.mxu0 %v2727_v60 }
 0x198   : > { %1365 = vmatmul.bf16.gmra.mxu1 %v2731_v8 }
 0x199   : > { %v1004_v44 = vmax.f32 %v933_v39, 0.0  ;;  %1454 = vmatmul.bf16.gmra.mxu2 %v2727_v60  ;;  %v1005_v58 = vmax.f32 %v758_v40, 0.0 }
 0x19a   : > { %1543 = vmatmul.bf16.gmra.mxu3 %v2731_v8 }
 0x19b   : > { %v2815_v46 = vpack.c.bf16 %v1004_v44, %v1002_v43 }
 0x19c   : > { %v846_v47 = vpop.f32.mrf.mxu2  ;;  %v670_v51 = vpop.f32.mrf.mxu0 }
 0x19d   : > { %v847_v48 = vadd.f32 %v846_v47, %v2695_v24  ;;  %v935_v49 = vpop.f32.mrf.mxu3  ;;  %v671_v52 = vadd.f32 %v670_v51, %v2690_v15  ;;  %v759_v53 = vpop.f32.mrf.mxu1 }
 0x19f   : > { %v936_v56 = vadd.f32 %v935_v49, %v847_v48  ;;  %v760_v57 = vadd.f32 %v759_v53, %v671_v52 }
 0x1a1   : > { %v1007_v59 = vmax.f32 %v760_v57, 0.0  ;;  %v1006_v50 = vmax.f32 %v936_v56, 0.0 }
 0x1a3   : > { %v2819_v62 = vpack.c.bf16 %v1007_v59, %v1005_v58 }
 0x1a4   : > { %v848_v61 = vpop.f32.mrf.mxu2  ;;  %v673_v63 = vpop.f32.mrf.mxu0 }
 0x1a5   : > { %v849_v60 = vadd.f32 %v848_v61, %v2695_v24  ;;  %v937_v8 = vpop.f32.mrf.mxu3  ;;  %v674_v1 = vadd.f32 %v673_v63, %v2690_v15  ;;  %v762_v2 = vpop.f32.mrf.mxu1 }
 0x1a7   : > { %v938_v3 = vadd.f32 %v937_v8, %v849_v60  ;;  %v763_v4 = vadd.f32 %v762_v2, %v674_v1  ;;  %1281 = vmatmul.bf16.gmra.mxu0 %v2739_v28 }
 0x1a8   : > { %1370 = vmatmul.bf16.gmra.mxu1 %v2743_v45 }
 0x1a9   : > { %v1008_v0 = vmax.f32 %v938_v3, 0.0  ;;  %1459 = vmatmul.bf16.gmra.mxu2 %v2739_v28  ;;  %v1009_v21 = vmax.f32 %v763_v4, 0.0 }
 0x1aa   : > { %1548 = vmatmul.bf16.gmra.mxu3 %v2743_v45 }
 0x1ab   : > { %v2827_v6 = vpack.c.bf16 %v1008_v0, %v1006_v50 }
 0x1ac   : > { %v851_v7 = vpop.f32.mrf.mxu2  ;;  %v675_v13 = vpop.f32.mrf.mxu0 }
 0x1ad   : > { %v852_v10 = vadd.f32 %v851_v7, %v2695_v24  ;;  %v940_v11 = vpop.f32.mrf.mxu3  ;;  %v676_v14 = vadd.f32 %v675_v13, %v2690_v15  ;;  %v764_v16 = vpop.f32.mrf.mxu1 }
 0x1af   : > { %v941_v19 = vadd.f32 %v940_v11, %v852_v10  ;;  %v765_v20 = vadd.f32 %v764_v16, %v676_v14 }
 0x1b1   : > { %v1011_v23 = vmax.f32 %v765_v20, 0.0  ;;  %v1010_v18 = vmax.f32 %v941_v19, 0.0 }
 0x1b3   : > { %v2831_v26 = vpack.c.bf16 %v1011_v23, %v1009_v21 }
 0x1b4   : > { %v853_v25 = vpop.f32.mrf.mxu2  ;;  %v678_v29 = vpop.f32.mrf.mxu0 }
 0x1b5   : > { %v854_v28 = vadd.f32 %v853_v25, %v2695_v24  ;;  %v942_v45 = vpop.f32.mrf.mxu3  ;;  %v679_v30 = vadd.f32 %v678_v29, %v2690_v15  ;;  %v767_v31 = vpop.f32.mrf.mxu1 }
 0x1b7   : > { %v943_v32 = vadd.f32 %v942_v45, %v854_v28  ;;  %v768_v33 = vadd.f32 %v767_v31, %v679_v30  ;;  %1286 = vmatmul.bf16.gmra.mxu0 %v2751_v9 }
 0x1b8   : > { %1375 = vmatmul.bf16.gmra.mxu1 %v2755_v22 }
 0x1b9   : > { %v1012_v35 = vmax.f32 %v943_v32, 0.0  ;;  %1464 = vmatmul.bf16.gmra.mxu2 %v2751_v9  ;;  %v1013_v49 = vmax.f32 %v768_v33, 0.0 }
 0x1ba   : > { %1553 = vmatmul.bf16.gmra.mxu3 %v2755_v22 }
 0x1bb   : > { %v2839_v36 = vpack.c.bf16 %v1012_v35, %v1010_v18 }
 0x1bc   : > { %v856_v37 = vpop.f32.mrf.mxu2  ;;  %v680_v40 = vpop.f32.mrf.mxu0 }
 0x1bd   : > { %v857_v38 = vadd.f32 %v856_v37, %v2695_v24  ;;  %v945_v39 = vpop.f32.mrf.mxu3  ;;  %v681_v43 = vadd.f32 %v680_v40, %v2690_v15  ;;  %v769_v44 = vpop.f32.mrf.mxu1 }
 0x1bf   : > { %v946_v47 = vadd.f32 %v945_v39, %v857_v38  ;;  %v770_v48 = vadd.f32 %v769_v44, %v681_v43 }
 0x1c1   : > { %v1015_v51 = vmax.f32 %v770_v48, 0.0  ;;  %v1014_v60 = vmax.f32 %v946_v47, 0.0 }
 0x1c3   : > { %v2843_v53 = vpack.c.bf16 %v1015_v51, %v1013_v49 }
 0x1c4   : > { %v858_v52 = vpop.f32.mrf.mxu2  ;;  %v683_v56 = vpop.f32.mrf.mxu0 }
 0x1c5   : > { %v859_v9 = vadd.f32 %v858_v52, %v2695_v24  ;;  %v947_v22 = vpop.f32.mrf.mxu3  ;;  %v684_v57 = vadd.f32 %v683_v56, %v2690_v15  ;;  %v772_v58 = vpop.f32.mrf.mxu1 }
 0x1c7   : > { %v948_v59 = vadd.f32 %v947_v22, %v859_v9  ;;  %v773_v61 = vadd.f32 %v772_v58, %v684_v57  ;;  %1291 = vmatmul.bf16.gmra.mxu0 %v2763_v42 }
 0x1c8   : > { %1380 = vmatmul.bf16.gmra.mxu1 %v2767_v55 }
 0x1c9   : > { %v1016_v8 = vmax.f32 %v948_v59, 0.0  ;;  %1469 = vmatmul.bf16.gmra.mxu2 %v2763_v42  ;;  %v1017_v11 = vmax.f32 %v773_v61, 0.0 }
 0x1ca   : > { %1558 = vmatmul.bf16.gmra.mxu3 %v2767_v55 }
 0x1cb   : > { %v2851_v63 = vpack.c.bf16 %v1016_v8, %v1014_v60 }
 0x1cc   : > { %v861_v1 = vpop.f32.mrf.mxu2  ;;  %v685_v4 = vpop.f32.mrf.mxu0 }
 0x1cd   : > { %v862_v2 = vadd.f32 %v861_v1, %v2695_v24  ;;  %v950_v3 = vpop.f32.mrf.mxu3  ;;  %v686_v50 = vadd.f32 %v685_v4, %v2690_v15  ;;  %v774_v0 = vpop.f32.mrf.mxu1 }
 0x1cf   : > { %v951_v7 = vadd.f32 %v950_v3, %v862_v2  ;;  %v775_v10 = vadd.f32 %v774_v0, %v686_v50  ;;  %v315_v2 = vld [vmem:[%s3122_s4] sm:$0x3] }
 0x1d0   : > { %v2882_v50 = vperm.slane %v315_v2, 0 }
 0x1d1   : > { %v1019_v13 = vmax.f32 %v775_v10, 0.0  ;;  %v1018_v28 = vmax.f32 %v951_v7, 0.0 }
 0x1d3   : > { %v2855_v16 = vpack.c.bf16 %v1019_v13, %v1017_v11 }
 0x1d4   : > { %v863_v14 = vpop.f32.mrf.mxu2  ;;  %v688_v19 = vpop.f32.mrf.mxu0 }
 0x1d5   : > { %v864_v42 = vadd.f32 %v863_v14, %v2695_v24  ;;  %v952_v55 = vpop.f32.mrf.mxu3  ;;  %v689_v20 = vadd.f32 %v688_v19, %v2690_v15  ;;  %v777_v21 = vpop.f32.mrf.mxu1 }
 0x1d7   : > { %v953_v23 = vadd.f32 %v952_v55, %v864_v42  ;;  %v778_v25 = vadd.f32 %v777_v21, %v689_v20  ;;  %1296 = vmatmul.bf16.gmra.mxu0 %v2775_v12  ;;  %v2891_v20 = vperm.slane %v315_v2, 1 }
 0x1d8   : > { %1385 = vmatmul.bf16.gmra.mxu1 %v2779_v27 }
 0x1d9   : > { %v1020_v45 = vmax.f32 %v953_v23, 0.0  ;;  %1474 = vmatmul.bf16.gmra.mxu2 %v2775_v12  ;;  %v1021_v39 = vmax.f32 %v778_v25, 0.0 }
 0x1da   : > { %1563 = vmatmul.bf16.gmra.mxu3 %v2779_v27 }
 0x1db   : > { %v2863_v29 = vpack.c.bf16 %v1020_v45, %v1018_v28 }
 0x1dc   : > { %v866_v30 = vpop.f32.mrf.mxu2  ;;  %v690_v33 = vpop.f32.mrf.mxu0 }
 0x1dd   : > { %v867_v31 = vadd.f32 %v866_v30, %v2695_v24  ;;  %v955_v32 = vpop.f32.mrf.mxu3  ;;  %v691_v18 = vadd.f32 %v690_v33, %v2690_v15  ;;  %v779_v35 = vpop.f32.mrf.mxu1 }
 0x1df   : > { %v956_v37 = vadd.f32 %v955_v32, %v867_v31  ;;  %v780_v38 = vadd.f32 %v779_v35, %v691_v18 }
 0x1e1   : > { %v1023_v40 = vmax.f32 %v780_v38, 0.0  ;;  %v1022_v9 = vmax.f32 %v956_v37, 0.0 }
 0x1e3   : > { %v2867_v44 = vpack.c.bf16 %v1023_v40, %v1021_v39 }
 0x1e4   : > { %v868_v43 = vpop.f32.mrf.mxu2  ;;  %v693_v47 = vpop.f32.mrf.mxu0 }
 0x1e5   : > { %v869_v12 = vadd.f32 %v868_v43, %v2695_v24  ;;  %v957_v27 = vpop.f32.mrf.mxu3  ;;  %v694_v48 = vadd.f32 %v693_v47, %v2690_v15  ;;  %v782_v49 = vpop.f32.mrf.mxu1 }
 0x1e7   : > { %v958_v51 = vadd.f32 %v957_v27, %v869_v12  ;;  %v783_v52 = vadd.f32 %v782_v49, %v694_v48  ;;  %1301 = vmatmul.bf16.gmra.mxu0 %v2783_v41 }
 0x1e8   : > { %1390 = vmatmul.bf16.gmra.mxu1 %v2791_v54 }
 0x1e9   : > { %v1024_v22 = vmax.f32 %v958_v51, 0.0  ;;  %1479 = vmatmul.bf16.gmra.mxu2 %v2783_v41  ;;  %v1025_v4 = vmax.f32 %v783_v52, 0.0 }
 0x1ea   : > { %1568 = vmatmul.bf16.gmra.mxu3 %v2791_v54 }
 0x1eb   : > { %v2875_v56 = vpack.c.bf16 %v1024_v22, %v1022_v9 }
 0x1ec   : > { %v871_v57 = vpop.f32.mrf.mxu2  ;;  %v695_v61 = vpop.f32.mrf.mxu0 }
 0x1ed   : > { %v872_v58 = vadd.f32 %v871_v57, %v2695_v24  ;;  %v960_v59 = vpop.f32.mrf.mxu3  ;;  %v696_v60 = vadd.f32 %v695_v61, %v2690_v15  ;;  %v784_v8 = vpop.f32.mrf.mxu1 }
 0x1ef   : > { %v961_v1 = vadd.f32 %v960_v59, %v872_v58  ;;  %v785_v3 = vadd.f32 %v784_v8, %v696_v60 }
 0x1f1   : > { %v1027_v41 = vmax.f32 %v785_v3, 0.0  ;;  %v1026_v55 = vmax.f32 %v961_v1, 0.0 }
 0x1f3   : > { %v2884_v0 = vpack.c.bf16 %v1027_v41, %v1025_v4 }
 0x1f4   : > { %v873_v54 = vpop.f32.mrf.mxu2  ;;  %v1267_v11 = vpop.f32.mrf.mxu0 }
 0x1f5   : > { %v874_v7 = vadd.f32 %v873_v54, %v2695_v24  ;;  %v962_v10 = vpop.f32.mrf.mxu3  ;;  %v1268_v15 = vadd.f32 %v1267_v11, %v2882_v50  ;;  %v1356_v13 = vpop.f32.mrf.mxu1 }
 0x1f7   : > { %v963_v14 = vadd.f32 %v962_v10, %v874_v7  ;;  %v1357_v42 = vadd.f32 %v1356_v13, %v1268_v15  ;;  %1306 = vmatmul.bf16.gmra.mxu0 %v2795_v5 }
 0x1f8   : > { %1395 = vmatmul.bf16.gmra.mxu1 %v2803_v17 }
 0x1f9   : > { %v1028_v19 = vmax.f32 %v963_v14, 0.0  ;;  %1484 = vmatmul.bf16.gmra.mxu2 %v2795_v5  ;;  %1614 = vst [vmem:[%s2895_s26] sm:$0xff] %v1357_v42 }
 0x1fa   : > { %1573 = vmatmul.bf16.gmra.mxu3 %v2803_v17 }
 0x1fb   : > { %v2899_v24 = vpack.c.bf16 %v1028_v19, %v1026_v55 }
 0x1fc   : > { %v1445_v21 = vpop.f32.mrf.mxu2  ;;  %v1269_v28 = vpop.f32.mrf.mxu0 }
 0x1fd   : > { %v1446_v23 = vadd.f32 %v1445_v21, %v2891_v20  ;;  %v1534_v25 = vpop.f32.mrf.mxu3  ;;  %v1270_v5 = vadd.f32 %v1269_v28, %v2882_v50  ;;  %v1358_v45 = vpop.f32.mrf.mxu1 }
 0x1ff   : > { %v1535_v30 = vadd.f32 %v1534_v25, %v1446_v23  ;;  %v1359_v31 = vadd.f32 %v1358_v45, %v1270_v5 }
 0x201   : > { %1615 = vst [vmem:[%s2895_s26 + $0x8] sm:$0xff] %v1535_v30 }
 0x202   : > { %1616 = vst [vmem:[%s2895_s26 + $0x10] sm:$0xff] %v1359_v31 }
 0x204   : > { %v1447_v32 = vpop.f32.mrf.mxu2  ;;  %v1272_v18 = vpop.f32.mrf.mxu0 }
 0x205   : > { %v1448_v33 = vadd.f32 %v1447_v32, %v2891_v20  ;;  %v1536_v17 = vpop.f32.mrf.mxu3  ;;  %v1273_v35 = vadd.f32 %v1272_v18, %v2882_v50  ;;  %v1361_v37 = vpop.f32.mrf.mxu1 }
 0x207   : > { %v1537_v38 = vadd.f32 %v1536_v17, %v1448_v33  ;;  %v1362_v39 = vadd.f32 %v1361_v37, %v1273_v35  ;;  %1311 = vmatmul.bf16.gmra.mxu0 %v2807_v34 }
 0x208   : > { %1400 = vmatmul.bf16.gmra.mxu1 %v2815_v46 }
 0x209   : > { %1617 = vst [vmem:[%s2895_s26 + $0x18] sm:$0xff] %v1537_v38  ;;  %1489 = vmatmul.bf16.gmra.mxu2 %v2807_v34 }
 0x20a   : > { %1618 = vst [vmem:[%s2895_s26 + $0x20] sm:$0xff] %v1362_v39  ;;  %1578 = vmatmul.bf16.gmra.mxu3 %v2815_v46 }
 0x20c   : > { %v1450_v40 = vpop.f32.mrf.mxu2  ;;  %v1274_v27 = vpop.f32.mrf.mxu0 }
 0x20d   : > { %v1451_v43 = vadd.f32 %v1450_v40, %v2891_v20  ;;  %v1539_v12 = vpop.f32.mrf.mxu3  ;;  %v1275_v47 = vadd.f32 %v1274_v27, %v2882_v50  ;;  %v1363_v48 = vpop.f32.mrf.mxu1 }
 0x20f   : > { %v1540_v49 = vadd.f32 %v1539_v12, %v1451_v43  ;;  %v1364_v51 = vadd.f32 %v1363_v48, %v1275_v47 }
 0x211   : > { %1619 = vst [vmem:[%s2895_s26 + $0x28] sm:$0xff] %v1540_v49 }
 0x212   : > { %1620 = vst [vmem:[%s2895_s26 + $0x30] sm:$0xff] %v1364_v51 }
 0x214   : > { %v1452_v52 = vpop.f32.mrf.mxu2  ;;  %v1277_v22 = vpop.f32.mrf.mxu0 }
 0x215   : > { %v1453_v34 = vadd.f32 %v1452_v52, %v2891_v20  ;;  %v1541_v9 = vpop.f32.mrf.mxu3  ;;  %v1278_v46 = vadd.f32 %v1277_v22, %v2882_v50  ;;  %v1366_v57 = vpop.f32.mrf.mxu1 }
 0x217   : > { %v1542_v58 = vadd.f32 %v1541_v9, %v1453_v34  ;;  %v1367_v59 = vadd.f32 %v1366_v57, %v1278_v46  ;;  %1316 = vmatmul.bf16.gmra.mxu0 %v2819_v62 }
 0x218   : > { %1405 = vmatmul.bf16.gmra.mxu1 %v2827_v6 }
 0x219   : > { %1621 = vst [vmem:[%s2895_s26 + $0x38] sm:$0xff] %v1542_v58  ;;  %1494 = vmatmul.bf16.gmra.mxu2 %v2819_v62 }
 0x21a   : > { %1622 = vst [vmem:[%s2895_s26 + $0x40] sm:$0xff] %v1367_v59  ;;  %1583 = vmatmul.bf16.gmra.mxu3 %v2827_v6 }
 0x21c   : > { %v1455_v61 = vpop.f32.mrf.mxu2  ;;  %v1279_v1 = vpop.f32.mrf.mxu0 }
 0x21d   : > { %v1456_v60 = vadd.f32 %v1455_v61, %v2891_v20  ;;  %v1544_v8 = vpop.f32.mrf.mxu3  ;;  %v1280_v2 = vadd.f32 %v1279_v1, %v2882_v50  ;;  %v1368_v3 = vpop.f32.mrf.mxu1 }
 0x21f   : > { %v1545_v4 = vadd.f32 %v1544_v8, %v1456_v60  ;;  %v1369_v41 = vadd.f32 %v1368_v3, %v1280_v2 }
 0x221   : > { %1623 = vst [vmem:[%s2895_s26 + $0x48] sm:$0xff] %v1545_v4 }
 0x222   : > { %1624 = vst [vmem:[%s2895_s26 + $0x50] sm:$0xff] %v1369_v41 }
 0x224   : > { %v1457_v54 = vpop.f32.mrf.mxu2  ;;  %v1282_v10 = vpop.f32.mrf.mxu0 }
 0x225   : > { %v1458_v62 = vadd.f32 %v1457_v54, %v2891_v20  ;;  %v1546_v7 = vpop.f32.mrf.mxu3  ;;  %v1283_v6 = vadd.f32 %v1282_v10, %v2882_v50  ;;  %v1371_v11 = vpop.f32.mrf.mxu1 }
 0x227   : > { %v1547_v15 = vadd.f32 %v1546_v7, %v1458_v62  ;;  %v1372_v13 = vadd.f32 %v1371_v11, %v1283_v6  ;;  %1321 = vmatmul.bf16.gmra.mxu0 %v2831_v26 }
 0x228   : > { %1410 = vmatmul.bf16.gmra.mxu1 %v2839_v36 }
 0x229   : > { %1625 = vst [vmem:[%s2895_s26 + $0x58] sm:$0xff] %v1547_v15  ;;  %1499 = vmatmul.bf16.gmra.mxu2 %v2831_v26 }
 0x22a   : > { %1626 = vst [vmem:[%s2895_s26 + $0x60] sm:$0xff] %v1372_v13  ;;  %1588 = vmatmul.bf16.gmra.mxu3 %v2839_v36 }
 0x22c   : > { %v1460_v14 = vpop.f32.mrf.mxu2  ;;  %v1284_v19 = vpop.f32.mrf.mxu0 }
 0x22d   : > { %v1461_v42 = vadd.f32 %v1460_v14, %v2891_v20  ;;  %v1549_v55 = vpop.f32.mrf.mxu3  ;;  %v1285_v21 = vadd.f32 %v1284_v19, %v2882_v50  ;;  %v1373_v23 = vpop.f32.mrf.mxu1 }
 0x22f   : > { %v1550_v25 = vadd.f32 %v1549_v55, %v1461_v42  ;;  %v1374_v28 = vadd.f32 %v1373_v23, %v1285_v21 }
 0x231   : > { %1627 = vst [vmem:[%s2895_s26 + $0x68] sm:$0xff] %v1550_v25 }
 0x232   : > { %1628 = vst [vmem:[%s2895_s26 + $0x70] sm:$0xff] %v1374_v28 }
 0x234   : > { %v1462_v5 = vpop.f32.mrf.mxu2  ;;  %v1287_v30 = vpop.f32.mrf.mxu0 }
 0x235   : > { %v1463_v26 = vadd.f32 %v1462_v5, %v2891_v20  ;;  %v1551_v45 = vpop.f32.mrf.mxu3  ;;  %v1288_v36 = vadd.f32 %v1287_v30, %v2882_v50  ;;  %v1376_v31 = vpop.f32.mrf.mxu1 }
 0x237   : > { %v1552_v32 = vadd.f32 %v1551_v45, %v1463_v26  ;;  %v1377_v33 = vadd.f32 %v1376_v31, %v1288_v36  ;;  %1326 = vmatmul.bf16.gmra.mxu0 %v2843_v53 }
 0x238   : > { %1415 = vmatmul.bf16.gmra.mxu1 %v2851_v63 }
 0x239   : > { %1629 = vst [vmem:[%s2895_s26 + $0x78] sm:$0xff] %v1552_v32  ;;  %1504 = vmatmul.bf16.gmra.mxu2 %v2843_v53 }
 0x23a   : > { %1630 = vst [vmem:[%s2895_s26 + $0x80] sm:$0xff] %v1377_v33  ;;  %1593 = vmatmul.bf16.gmra.mxu3 %v2851_v63 }
 0x23c   : > { %v1465_v17 = vpop.f32.mrf.mxu2  ;;  %v1289_v37 = vpop.f32.mrf.mxu0 }
 0x23d   : > { %v1466_v18 = vadd.f32 %v1465_v17, %v2891_v20  ;;  %v1554_v35 = vpop.f32.mrf.mxu3  ;;  %v1290_v38 = vadd.f32 %v1289_v37, %v2882_v50  ;;  %v1378_v39 = vpop.f32.mrf.mxu1 }
 0x23f   : > { %v1555_v40 = vadd.f32 %v1554_v35, %v1466_v18  ;;  %v1379_v43 = vadd.f32 %v1378_v39, %v1290_v38 }
 0x241   : > { %1631 = vst [vmem:[%s2895_s26 + $0x88] sm:$0xff] %v1555_v40 }
 0x242   : > { %1632 = vst [vmem:[%s2895_s26 + $0x90] sm:$0xff] %v1379_v43 }
 0x244   : > { %v1467_v12 = vpop.f32.mrf.mxu2  ;;  %v1292_v47 = vpop.f32.mrf.mxu0 }
 0x245   : > { %v1468_v53 = vadd.f32 %v1467_v12, %v2891_v20  ;;  %v1556_v27 = vpop.f32.mrf.mxu3  ;;  %v1293_v63 = vadd.f32 %v1292_v47, %v2882_v50  ;;  %v1381_v48 = vpop.f32.mrf.mxu1 }
 0x247   : > { %v1557_v49 = vadd.f32 %v1556_v27, %v1468_v53  ;;  %v1382_v51 = vadd.f32 %v1381_v48, %v1293_v63  ;;  %1331 = vmatmul.bf16.gmra.mxu0 %v2855_v16 }
 0x248   : > { %1420 = vmatmul.bf16.gmra.mxu1 %v2863_v29 }
 0x249   : > { %1633 = vst [vmem:[%s2895_s26 + $0x98] sm:$0xff] %v1557_v49  ;;  %1509 = vmatmul.bf16.gmra.mxu2 %v2855_v16 }
 0x24a   : > { %1634 = vst [vmem:[%s2895_s26 + $0xa0] sm:$0xff] %v1382_v51  ;;  %1598 = vmatmul.bf16.gmra.mxu3 %v2863_v29 }
 0x24c   : > { %v1470_v52 = vpop.f32.mrf.mxu2  ;;  %v1294_v22 = vpop.f32.mrf.mxu0 }
 0x24d   : > { %v1471_v34 = vadd.f32 %v1470_v52, %v2891_v20  ;;  %v1559_v9 = vpop.f32.mrf.mxu3  ;;  %v1295_v46 = vadd.f32 %v1294_v22, %v2882_v50  ;;  %v1383_v57 = vpop.f32.mrf.mxu1 }
 0x24f   : > { %v1560_v58 = vadd.f32 %v1559_v9, %v1471_v34  ;;  %v1384_v59 = vadd.f32 %v1383_v57, %v1295_v46 }
 0x251   : > { %1635 = vst [vmem:[%s2895_s26 + $0xa8] sm:$0xff] %v1560_v58 }
 0x252   : > { %1636 = vst [vmem:[%s2895_s26 + $0xb0] sm:$0xff] %v1384_v59 }
 0x254   : > { %v1472_v61 = vpop.f32.mrf.mxu2  ;;  %v1297_v8 = vpop.f32.mrf.mxu0 }
 0x255   : > { %v1473_v16 = vadd.f32 %v1472_v61, %v2891_v20  ;;  %v1561_v60 = vpop.f32.mrf.mxu3  ;;  %v1298_v29 = vadd.f32 %v1297_v8, %v2882_v50  ;;  %v1386_v1 = vpop.f32.mrf.mxu1 }
 0x257   : > { %v1562_v2 = vadd.f32 %v1561_v60, %v1473_v16  ;;  %v1387_v3 = vadd.f32 %v1386_v1, %v1298_v29  ;;  %1336 = vmatmul.bf16.gmra.mxu0 %v2867_v44 }
 0x258   : > { %1425 = vmatmul.bf16.gmra.mxu1 %v2875_v56 }
 0x259   : > { %1637 = vst [vmem:[%s2895_s26 + $0xb8] sm:$0xff] %v1562_v2  ;;  %1514 = vmatmul.bf16.gmra.mxu2 %v2867_v44 }
 0x25a   : > { %1638 = vst [vmem:[%s2895_s26 + $0xc0] sm:$0xff] %v1387_v3  ;;  %1603 = vmatmul.bf16.gmra.mxu3 %v2875_v56 }
 0x25c   : > { %v1475_v4 = vpop.f32.mrf.mxu2  ;;  %v1299_v62 = vpop.f32.mrf.mxu0 }
 0x25d   : > { %v1476_v41 = vadd.f32 %v1475_v4, %v2891_v20  ;;  %v1564_v54 = vpop.f32.mrf.mxu3  ;;  %v1300_v7 = vadd.f32 %v1299_v62, %v2882_v50  ;;  %v1388_v10 = vpop.f32.mrf.mxu1 }
 0x25f   : > { %v1565_v6 = vadd.f32 %v1564_v54, %v1476_v41  ;;  %v1389_v11 = vadd.f32 %v1388_v10, %v1300_v7 }
 0x261   : > { %1639 = vst [vmem:[%s2895_s26 + $0xc8] sm:$0xff] %v1565_v6 }
 0x262   : > { %1640 = vst [vmem:[%s2895_s26 + $0xd0] sm:$0xff] %v1389_v11 }
 0x264   : > { %v1477_v15 = vpop.f32.mrf.mxu2  ;;  %v1302_v14 = vpop.f32.mrf.mxu0 }
 0x265   : > { %v1478_v44 = vadd.f32 %v1477_v15, %v2891_v20  ;;  %v1566_v13 = vpop.f32.mrf.mxu3  ;;  %v1303_v56 = vadd.f32 %v1302_v14, %v2882_v50  ;;  %v1391_v42 = vpop.f32.mrf.mxu1 }
 0x267   : > { %v1567_v55 = vadd.f32 %v1566_v13, %v1478_v44  ;;  %v1392_v19 = vadd.f32 %v1391_v42, %v1303_v56  ;;  %1341 = vmatmul.bf16.gmra.mxu0 %v2884_v0 }
 0x268   : > { %1430 = vmatmul.bf16.gmra.mxu1 %v2899_v24 }
 0x269   : > { %1641 = vst [vmem:[%s2895_s26 + $0xd8] sm:$0xff] %v1567_v55  ;;  %1519 = vmatmul.bf16.gmra.mxu2 %v2884_v0 }
 0x26a   : > { %1642 = vst [vmem:[%s2895_s26 + $0xe0] sm:$0xff] %v1392_v19  ;;  %1608 = vmatmul.bf16.gmra.mxu3 %v2899_v24 }
 0x26c   : > { %v1480_v21 = vpop.f32.mrf.mxu2  ;;  %v1304_v28 = vpop.f32.mrf.mxu0 }
 0x26d   : > { %v1481_v23 = vadd.f32 %v1480_v21, %v2891_v20  ;;  %v1569_v25 = vpop.f32.mrf.mxu3  ;;  %v1305_v5 = vadd.f32 %v1304_v28, %v2882_v50  ;;  %v1393_v26 = vpop.f32.mrf.mxu1 }
 0x26f   : > { %v1570_v45 = vadd.f32 %v1569_v25, %v1481_v23  ;;  %v1394_v30 = vadd.f32 %v1393_v26, %v1305_v5 }
 0x271   : > { %1643 = vst [vmem:[%s2895_s26 + $0xe8] sm:$0xff] %v1570_v45 }
 0x272   : > { %1644 = vst [vmem:[%s2895_s26 + $0xf0] sm:$0xff] %v1394_v30 }
 0x274   : > { %v1482_v36 = vpop.f32.mrf.mxu2  ;;  %v1307_v24 = vpop.f32.mrf.mxu0 }
 0x275   : > { %v1483_v0 = vadd.f32 %v1482_v36, %v2891_v20  ;;  %v1571_v31 = vpop.f32.mrf.mxu3  ;;  %v1308_v32 = vadd.f32 %v1307_v24, %v2882_v50  ;;  %v1396_v33 = vpop.f32.mrf.mxu1 }
 0x277   : > { %v1572_v17 = vadd.f32 %v1571_v31, %v1483_v0  ;;  %v1397_v18 = vadd.f32 %v1396_v33, %v1308_v32 }
 0x279   : > { %1645 = vst [vmem:[%s2895_s26 + $0xf8] sm:$0xff] %v1572_v17 }
 0x27a   : > { %1646 = vst [vmem:[%s2895_s26 + $0x100] sm:$0xff] %v1397_v18 }
 0x27c   : > { %v1485_v35 = vpop.f32.mrf.mxu2  ;;  %v1309_v39 = vpop.f32.mrf.mxu0 }
 0x27d   : > { %v1486_v37 = vadd.f32 %v1485_v35, %v2891_v20  ;;  %v1574_v38 = vpop.f32.mrf.mxu3  ;;  %v1310_v40 = vadd.f32 %v1309_v39, %v2882_v50  ;;  %v1398_v43 = vpop.f32.mrf.mxu1 }
 0x27f   : > { %v1575_v12 = vadd.f32 %v1574_v38, %v1486_v37  ;;  %v1399_v53 = vadd.f32 %v1398_v43, %v1310_v40 }
 0x281   : > { %1647 = vst [vmem:[%s2895_s26 + $0x108] sm:$0xff] %v1575_v12 }
 0x282   : > { %1648 = vst [vmem:[%s2895_s26 + $0x110] sm:$0xff] %v1399_v53 }
 0x284   : > { %v1487_v27 = vpop.f32.mrf.mxu2  ;;  %v1312_v48 = vpop.f32.mrf.mxu0 }
 0x285   : > { %v1488_v47 = vadd.f32 %v1487_v27, %v2891_v20  ;;  %v1576_v63 = vpop.f32.mrf.mxu3  ;;  %v1313_v49 = vadd.f32 %v1312_v48, %v2882_v50  ;;  %v1401_v51 = vpop.f32.mrf.mxu1 }
 0x287   : > { %v1577_v52 = vadd.f32 %v1576_v63, %v1488_v47  ;;  %v1402_v34 = vadd.f32 %v1401_v51, %v1313_v49 }
 0x289   : > { %1649 = vst [vmem:[%s2895_s26 + $0x118] sm:$0xff] %v1577_v52 }
 0x28a   : > { %1650 = vst [vmem:[%s2895_s26 + $0x120] sm:$0xff] %v1402_v34 }
 0x28c   : > { %v1490_v9 = vpop.f32.mrf.mxu2  ;;  %v1314_v57 = vpop.f32.mrf.mxu0 }
 0x28d   : > { %v1491_v22 = vadd.f32 %v1490_v9, %v2891_v20  ;;  %v1579_v46 = vpop.f32.mrf.mxu3  ;;  %v1315_v58 = vadd.f32 %v1314_v57, %v2882_v50  ;;  %v1403_v59 = vpop.f32.mrf.mxu1 }
 0x28f   : > { %v1580_v61 = vadd.f32 %v1579_v46, %v1491_v22  ;;  %v1404_v16 = vadd.f32 %v1403_v59, %v1315_v58 }
 0x291   : > { %1651 = vst [vmem:[%s2895_s26 + $0x128] sm:$0xff] %v1580_v61 }
 0x292   : > { %1652 = vst [vmem:[%s2895_s26 + $0x130] sm:$0xff] %v1404_v16 }
 0x294   : > { %v1492_v60 = vpop.f32.mrf.mxu2  ;;  %v1317_v1 = vpop.f32.mrf.mxu0 }
 0x295   : > { %v1493_v8 = vadd.f32 %v1492_v60, %v2891_v20  ;;  %v1581_v29 = vpop.f32.mrf.mxu3  ;;  %v1318_v2 = vadd.f32 %v1317_v1, %v2882_v50  ;;  %v1406_v3 = vpop.f32.mrf.mxu1 }
 0x297   : > { %v1582_v4 = vadd.f32 %v1581_v29, %v1493_v8  ;;  %v1407_v41 = vadd.f32 %v1406_v3, %v1318_v2 }
 0x299   : > { %1653 = vst [vmem:[%s2895_s26 + $0x138] sm:$0xff] %v1582_v4 }
 0x29a   : > { %1654 = vst [vmem:[%s2895_s26 + $0x140] sm:$0xff] %v1407_v41 }
 0x29c   : > { %v1495_v54 = vpop.f32.mrf.mxu2  ;;  %v1319_v10 = vpop.f32.mrf.mxu0 }
 0x29d   : > { %v1496_v62 = vadd.f32 %v1495_v54, %v2891_v20  ;;  %v1584_v7 = vpop.f32.mrf.mxu3  ;;  %v1320_v6 = vadd.f32 %v1319_v10, %v2882_v50  ;;  %v1408_v11 = vpop.f32.mrf.mxu1 }
 0x29f   : > { %v1585_v15 = vadd.f32 %v1584_v7, %v1496_v62  ;;  %v1409_v44 = vadd.f32 %v1408_v11, %v1320_v6 }
 0x2a1   : > { %1655 = vst [vmem:[%s2895_s26 + $0x148] sm:$0xff] %v1585_v15 }
 0x2a2   : > { %1656 = vst [vmem:[%s2895_s26 + $0x150] sm:$0xff] %v1409_v44 }
 0x2a4   : > { %v1497_v13 = vpop.f32.mrf.mxu2  ;;  %v1322_v42 = vpop.f32.mrf.mxu0 }
 0x2a5   : > { %v1498_v14 = vadd.f32 %v1497_v13, %v2891_v20  ;;  %v1586_v56 = vpop.f32.mrf.mxu3  ;;  %v1323_v55 = vadd.f32 %v1322_v42, %v2882_v50  ;;  %v1411_v19 = vpop.f32.mrf.mxu1 }
 0x2a7   : > { %v1587_v21 = vadd.f32 %v1586_v56, %v1498_v14  ;;  %v1412_v23 = vadd.f32 %v1411_v19, %v1323_v55 }
 0x2a9   : > { %1657 = vst [vmem:[%s2895_s26 + $0x158] sm:$0xff] %v1587_v21 }
 0x2aa   : > { %1658 = vst [vmem:[%s2895_s26 + $0x160] sm:$0xff] %v1412_v23 }
 0x2ac   : > { %v1500_v25 = vpop.f32.mrf.mxu2  ;;  %v1324_v26 = vpop.f32.mrf.mxu0 }
 0x2ad   : > { %v1501_v28 = vadd.f32 %v1500_v25, %v2891_v20  ;;  %v1589_v5 = vpop.f32.mrf.mxu3  ;;  %v1325_v45 = vadd.f32 %v1324_v26, %v2882_v50  ;;  %v1413_v30 = vpop.f32.mrf.mxu1 }
 0x2af   : > { %v1590_v36 = vadd.f32 %v1589_v5, %v1501_v28  ;;  %v1414_v0 = vadd.f32 %v1413_v30, %v1325_v45 }
 0x2b1   : > { %1659 = vst [vmem:[%s2895_s26 + $0x168] sm:$0xff] %v1590_v36 }
 0x2b2   : > { %1660 = vst [vmem:[%s2895_s26 + $0x170] sm:$0xff] %v1414_v0 }
 0x2b4   : > { %v1502_v31 = vpop.f32.mrf.mxu2  ;;  %v1327_v33 = vpop.f32.mrf.mxu0 }
 0x2b5   : > { %v1503_v24 = vadd.f32 %v1502_v31, %v2891_v20  ;;  %v1591_v32 = vpop.f32.mrf.mxu3  ;;  %v1328_v17 = vadd.f32 %v1327_v33, %v2882_v50  ;;  %v1416_v18 = vpop.f32.mrf.mxu1 }
 0x2b7   : > { %v1592_v35 = vadd.f32 %v1591_v32, %v1503_v24  ;;  %v1417_v37 = vadd.f32 %v1416_v18, %v1328_v17 }
 0x2b9   : > { %1661 = vst [vmem:[%s2895_s26 + $0x178] sm:$0xff] %v1592_v35 }
 0x2ba   : > { %1662 = vst [vmem:[%s2895_s26 + $0x180] sm:$0xff] %v1417_v37 }
 0x2bc   : > { %v1505_v38 = vpop.f32.mrf.mxu2  ;;  %v1329_v43 = vpop.f32.mrf.mxu0 }
 0x2bd   : > { %v1506_v39 = vadd.f32 %v1505_v38, %v2891_v20  ;;  %v1594_v40 = vpop.f32.mrf.mxu3  ;;  %v1330_v12 = vadd.f32 %v1329_v43, %v2882_v50  ;;  %v1418_v53 = vpop.f32.mrf.mxu1 }
 0x2bf   : > { %v1595_v27 = vadd.f32 %v1594_v40, %v1506_v39  ;;  %v1419_v47 = vadd.f32 %v1418_v53, %v1330_v12 }
 0x2c1   : > { %1663 = vst [vmem:[%s2895_s26 + $0x188] sm:$0xff] %v1595_v27 }
 0x2c2   : > { %1664 = vst [vmem:[%s2895_s26 + $0x190] sm:$0xff] %v1419_v47 }
 0x2c4   : > { %v1507_v63 = vpop.f32.mrf.mxu2  ;;  %v1332_v51 = vpop.f32.mrf.mxu0 }
 0x2c5   : > { %v1508_v48 = vadd.f32 %v1507_v63, %v2891_v20  ;;  %v1596_v49 = vpop.f32.mrf.mxu3  ;;  %v1333_v52 = vadd.f32 %v1332_v51, %v2882_v50  ;;  %v1421_v34 = vpop.f32.mrf.mxu1 }
 0x2c7   : > { %v1597_v9 = vadd.f32 %v1596_v49, %v1508_v48  ;;  %v1422_v22 = vadd.f32 %v1421_v34, %v1333_v52 }
 0x2c9   : > { %1665 = vst [vmem:[%s2895_s26 + $0x198] sm:$0xff] %v1597_v9 }
 0x2ca   : > { %1666 = vst [vmem:[%s2895_s26 + $0x1a0] sm:$0xff] %v1422_v22 }
 0x2cc   : > { %v1510_v46 = vpop.f32.mrf.mxu2  ;;  %v1334_v59 = vpop.f32.mrf.mxu0 }
 0x2cd   : > { %v1511_v57 = vadd.f32 %v1510_v46, %v2891_v20  ;;  %v1599_v58 = vpop.f32.mrf.mxu3  ;;  %v1335_v61 = vadd.f32 %v1334_v59, %v2882_v50  ;;  %v1423_v16 = vpop.f32.mrf.mxu1 }
 0x2cf   : > { %v1600_v60 = vadd.f32 %v1599_v58, %v1511_v57  ;;  %v1424_v8 = vadd.f32 %v1423_v16, %v1335_v61 }
 0x2d1   : > { %1667 = vst [vmem:[%s2895_s26 + $0x1a8] sm:$0xff] %v1600_v60 }
 0x2d2   : > { %1668 = vst [vmem:[%s2895_s26 + $0x1b0] sm:$0xff] %v1424_v8 }
 0x2d4   : > { %v1512_v29 = vpop.f32.mrf.mxu2  ;;  %v1337_v3 = vpop.f32.mrf.mxu0 }
 0x2d5   : > { %v1513_v1 = vadd.f32 %v1512_v29, %v2891_v20  ;;  %v1601_v2 = vpop.f32.mrf.mxu3  ;;  %v1338_v4 = vadd.f32 %v1337_v3, %v2882_v50  ;;  %v1426_v41 = vpop.f32.mrf.mxu1 }
 0x2d7   : > { %v1602_v54 = vadd.f32 %v1601_v2, %v1513_v1  ;;  %v1427_v62 = vadd.f32 %v1426_v41, %v1338_v4 }
 0x2d9   : > { %1669 = vst [vmem:[%s2895_s26 + $0x1b8] sm:$0xff] %v1602_v54 }
 0x2da   : > { %1670 = vst [vmem:[%s2895_s26 + $0x1c0] sm:$0xff] %v1427_v62 }
 0x2dc   : > { %v1515_v7 = vpop.f32.mrf.mxu2  ;;  %v1339_v11 = vpop.f32.mrf.mxu0 }
 0x2dd   : > { %v1516_v10 = vadd.f32 %v1515_v7, %v2891_v20  ;;  %v1604_v6 = vpop.f32.mrf.mxu3  ;;  %v1340_v15 = vadd.f32 %v1339_v11, %v2882_v50  ;;  %v1428_v44 = vpop.f32.mrf.mxu1 }
 0x2df   : > { %v1605_v13 = vadd.f32 %v1604_v6, %v1516_v10  ;;  %v1429_v14 = vadd.f32 %v1428_v44, %v1340_v15 }
 0x2e1   : > { %1671 = vst [vmem:[%s2895_s26 + $0x1c8] sm:$0xff] %v1605_v13 }
 0x2e2   : > { %1672 = vst [vmem:[%s2895_s26 + $0x1d0] sm:$0xff] %v1429_v14 }
 0x2e4   : > { %v1517_v56 = vpop.f32.mrf.mxu2  ;;  %v1342_v19 = vpop.f32.mrf.mxu0 }
 0x2e5   : > { %v1518_v42 = vadd.f32 %v1517_v56, %v2891_v20  ;;  %v1606_v55 = vpop.f32.mrf.mxu3  ;;  %v1343_v21 = vadd.f32 %v1342_v19, %v2882_v50  ;;  %v1431_v23 = vpop.f32.mrf.mxu1 }
 0x2e7   : > { %v1607_v25 = vadd.f32 %v1606_v55, %v1518_v42  ;;  %v1432_v28 = vadd.f32 %v1431_v23, %v1343_v21 }
 0x2e9   : > { %1673 = vst [vmem:[%s2895_s26 + $0x1d8] sm:$0xff] %v1607_v25 }
 0x2ea   : > { %1674 = vst [vmem:[%s2895_s26 + $0x1e0] sm:$0xff] %v1432_v28 }
 0x2ec   : > { %v1520_v5 = vpop.f32.mrf.mxu2  ;;  %v1344_v30 = vpop.f32.mrf.mxu0 }
 0x2ed   : > { %v1521_v26 = vadd.f32 %v1520_v5, %v2891_v20  ;;  %v1609_v45 = vpop.f32.mrf.mxu3  ;;  %v1345_v36 = vadd.f32 %v1344_v30, %v2882_v50  ;;  %v1433_v31 = vpop.f32.mrf.mxu1 }
 0x2ef   : > { %v1610_v0 = vadd.f32 %v1609_v45, %v1521_v26  ;;  %v1434_v24 = vadd.f32 %v1433_v31, %v1345_v36 }
 0x2f1   : > { %1675 = vst [vmem:[%s2895_s26 + $0x1e8] sm:$0xff] %v1610_v0 }
 0x2f2   : > { %1676 = vst [vmem:[%s2895_s26 + $0x1f0] sm:$0xff] %v1434_v24 }
 0x2f4   : > { %v1522_v32 = vpop.f32.mrf.mxu2 }
 0x2f5   : > { %v1523_v33 = vadd.f32 %v1522_v32, %v2891_v20  ;;  %v1611_v17 = vpop.f32.mrf.mxu3  ;;  %1685 = sbr.rel (!%p2548_p11) target bundleno = 793 (0x319), region = 60 }
 0x2f7   : > { %v1612_v18 = vadd.f32 %v1611_v17, %v1523_v33 }
 0x2f9   : > { %1677 = vst [vmem:[%s2895_s26 + $0x1f8] sm:$0xff] %v1612_v18 }
 0x2fa   : > { %s3151_s12 = smov (!%p1688_p6, %s1687_s12), 32 }
 0x2fb   : > { %s2160_s10 = sshll.u32 %s3151_s12, 4 }
 0x2fc   : > { %s1692_s15 = ssub.s32 512, %s2160_s10 }
 0x2fd   : > { %s1693_s11 = sshll.u32 %s1692_s15, 4 }
 0x2fe   : > { %1694 = vsyncadd %s1679_s23, %s1693_s11  ;;  %p3064_p5 = scmp.ne.s32.totalorder %s2160_s10, 0  ;;  %s2162_s9 = sshll.u32 %s2517_s22, 9 }
 0x2ff   : > { %s1698_s8 = scalar_lea.hbm %s3123_s5, %s2162_s9  ;;  %s1700_s25 = sshll.u32 %s2895_s26, 4  ;;  %s3073_s25 = int_to_ptr.vmem [resolvable:$true] %s1700_s25 }
 0x300   : > { %s1702_s13 = sshll.u32 %s1698_s8, 4  ;;  %s2090_s14 = sshll.u32 %s3151_s12, 8  ;;  %s3075_s13 = int_to_ptr.hbm [resolvable:$true] %s1702_s13 }
 0x301   : > { %s2368_s29 = sshra.s32 %s3073_s25, 4  ;;  %s2370_s7 = sshrl.u32 %s2090_s14, 4  ;;  %s2369_s29 = int_to_ptr.vmem [resolvable:$true] %s2368_s29 }
 0x302   : > { %s2375_s28 = scalar_lea.vmem %s2369_s29, %s2370_s7  ;;  %s2463_s22 = smov [#allocation10]  }
 0x303   : > { %p2376_p11 = scmp.ne.s32.totalorder %s2369_s29, %s2375_s28  ;;  %s2379_s10 = scalar_lea.vmem %s2463_s22, 1024 }
 0x304   : > { %p2381_p1 = scmp.lt.s32.totalorder %s2379_s10, %s2375_s28 }
 0x305   : > { %p2377_p9 = pnand %p2376_p11, %p3064_p5 }
 0x307   : > { %p2378_p10 = pneg %p2377_p9 }
 0x309   : > { %p2383_p0 = pnand %p2381_p1, %p2378_p10 }
 0x30b   : > { %2386 = shalt.err (!%p2383_p0)
}
 0x30c   : > { %s2387_s26 = sshra.s32 %s3075_s13, 4  ;;  %s2398_s16 = scalar_lea.hbm %s3123_s5, 768  ;;  %s2388_s26 = int_to_ptr.hbm [resolvable:$true] %s2387_s26 }
 0x30d   : > { %s2394_s15 = scalar_lea.hbm %s2388_s26, %s2370_s7  ;;  %p2399_p4 = scmp.lt.s32.totalorder %s2388_s26, %s3123_s5 }
 0x30e   : > { %p2395_p3 = scmp.ne.s32.totalorder %s2388_s26, %s2394_s15  ;;  %p2400_p12 = scmp.lt.s32.totalorder %s2398_s16, %s2394_s15 }
 0x310   : > { %p2396_p7 = pnand %p2395_p3, %p3064_p5  ;;  %p2401_p13 = por %p2400_p12, %p2399_p4 }
 0x312   : > { %p2397_p8 = pneg %p2396_p7 }
 0x314   : > { %p2402_p2 = pnand %p2401_p13, %p2397_p8 }
 0x316   : > { %2405 = shalt.err (!%p2402_p2)
}
 0x317   : > { %s2464_s29 = smov 256   ;;  %s2465_s7 = smov 16  }
 0x318   : > { %1708 = dma.vmem_to_hbm [thread:$0]  (%p3064_p5), %s3073_s25, %s2090_s14, %s3075_s13, %s1679_s23, %s2464_s29, %s2464_s29, %s2465_s7  }
 0x319 PF: > { %s1717_s28 = sand.u32 1, %s2441_s18   ;;  %p3142_p6 = scmp.ne.s32.totalorder %s3131_s6, 0 }
 0x31a   : > { %p3143_p11 = scmp.ge.s32.totalorder %s2453_s21, 2  ;;  %s1718_s22 = scalar_lea.sflag [#allocation4], %s1717_s28 }
 0x31c   : > { %p2188_p9 = pnand %p3143_p11, %p3142_p6 }
 0x31e   : > { %p2189_p10 = pneg %p2188_p9 }
 0x320   : > { %2436 = dma.done.wait (%p2189_p10), %s1718_s22, 8192  }
 0x321   : > { %2438 = vsyncadd (%p2189_p10), %s1718_s22, 4294959104  ;;  %p20_p1 = scmp.ge.s32.totalorder %s2521_s24, 4   ;;  %s3144_s18 = smov %s2445_s19 }
 0x322   : > { %s3145_s19 = smov %s2449_s20  ;;  %s3146_s20 = smov %s2533_s27 }
 0x323   : > { %s3147_s21 = smov %s2521_s24  ;;  %22 = sbr.rel (!%p20_p1) target bundleno = 9 (0x9), region = 97 }
 0x328   :  { %1724 = vsyncpa [#allocation3], 1 }
 0x329   :  { %1726 = vsyncpa [#allocation3 + $0x1], 1 }
 0x32a   :  { %1727 = vsyncpa [#allocation6], 1 }
 0x32b   :  { %1728 = vsyncpa [#allocation9], 1 }
 0x32c   :  { %1729 = vsyncpa [#allocation4], 1 }
 0x32d   :  { %1731 = vsyncpa [#allocation4 + $0x1], 1 }

</bundles_post_ra>
